<compile_context>
chip_gen: v7x
topology: tpu7x:2x2x1
jax: 0.10.0
libtpu: 0.0.40
codegen_flags: <defaults>
</compile_context>

<pallas_src>
import numpy as np
import jax
import jax.numpy as jnp
from jax.experimental import pallas as pl
from jax.experimental.pallas import tpu as pltpu

SIZE = 8        # board size -> p and lp are (B, 1, 8, 8)
B_TILE = 256    # samples per grid step (fills the 256-wide MXU on v6e/v7x)


# ---------------------------------------------------------------------------
# Static lowering tables (pure numpy, computed once at import time).
# ---------------------------------------------------------------------------
def _conv_lowering_indices(Cout, Cin, K, Hin, Win, pad):
    """Index triples to scatter conv weights into a dense (out_flat, in_flat) matrix.

    The input space is the UNPADDED (Cin, Hin, Win) activation; the conv's
    zero padding is folded in here (out-of-range taps are simply dropped).
    """
    Ho = Hin + 2 * pad - K + 1
    Wo = Win + 2 * pad - K + 1
    rows, cols, widx = [], [], []
    for o in range(Cout):
        for ho in range(Ho):
            for wo in range(Wo):
                r = (o * Ho + ho) * Wo + wo
                for c in range(Cin):
                    for kh in range(K):
                        for kw in range(K):
                            y, x = ho + kh - pad, wo + kw - pad
                            if 0 <= y < Hin and 0 <= x < Win:
                                rows.append(r)
                                cols.append((c * Hin + y) * Win + x)
                                widx.append(((o * Cin + c) * K + kh) * K + kw)
    return (np.asarray(rows, np.int32), np.asarray(cols, np.int32),
            np.asarray(widx, np.int32), Cout * Ho * Wo, Cin * Hin * Win)


# conv1: input (2,8,8), pad=2 -> out (3,9,9)   => (243, 128)
# conv2: input = pool1 out (3,5,5), pad=2 -> (5,6,6) => (180,  75)
# conv3: input = pool2 out (5,3,3), pad=2 -> (9,4,4) => (144,  45)
_C1_IDX = _conv_lowering_indices(3, 2, 4, 8, 8, 2)
_C2_IDX = _conv_lowering_indices(5, 3, 4, 5, 5, 2)
_C3_IDX = _conv_lowering_indices(9, 5, 4, 3, 3, 2)


def _pool_col_select_np(C, Hd, Wd, Wo):
    """Stage-1 (column) taps of the separable 3x3/stride-2/pad-1 max pool.

    Tap kw maps dense input (C,Hd,Wd) -> (C,Hd,Wo) via x = 2j-1+kw.
    Out-of-range taps stay all-zero rows (valid: input is post-ReLU >= 0 and
    every window contains the in-range column 2j).
    """
    mats = np.zeros((3, C * Hd * Wo, C * Hd * Wd), np.float32)
    for kw in range(3):
        for c in range(C):
            for h in range(Hd):
                for j in range(Wo):
                    x = 2 * j - 1 + kw
                    if 0 <= x < Wd:
                        mats[kw, (c * Hd + h) * Wo + j, (c * Hd + h) * Wd + x] = 1.0
    return mats


def _pool_row_select_np(C, Hd, Wo, Ho):
    """Stage-2 (row) taps: (C,Hd,Wo) -> (C,Ho,Wo) via y = 2i-1+kh."""
    mats = np.zeros((3, C * Ho * Wo, C * Hd * Wo), np.float32)
    for kh in range(3):
        for c in range(C):
            for i in range(Ho):
                for j in range(Wo):
                    y = 2 * i - 1 + kh
                    if 0 <= y < Hd:
                        mats[kh, (c * Ho + i) * Wo + j, (c * Hd + y) * Wo + j] = 1.0
    return mats


_S1A = _pool_col_select_np(3, 9, 9, 5)   # (3, 135, 243)
_S1B = _pool_row_select_np(3, 9, 5, 5)   # (3,  75, 135)
_S2A = _pool_col_select_np(5, 6, 6, 3)   # (3,  90, 180)
_S2B = _pool_row_select_np(5, 6, 3, 3)   # (3,  45,  90)
_S3A = _pool_col_select_np(9, 4, 4, 2)   # (3,  72, 144)
_S3B = _pool_row_select_np(9, 4, 2, 2)   # (3,  36,  72)


def _conv_dense(w, idx):
    """Scatter torch-layout conv weights (Cout,Cin,K,K) into the dense matrix."""
    rows, cols, widx, nrow, ncol = idx
    mat = jnp.zeros((nrow, ncol), jnp.float32)
    return mat.at[rows, cols].add(w.reshape(-1).astype(jnp.float32)[widx])


# ---------------------------------------------------------------------------
# Fused trunk + head kernel: one batch tile (B_TILE lanes) per grid step.
# Matmul operands are bf16 (taps are exact 0/1 in bf16); accumulation,
# bias-add, ReLU and the pool max are all f32.
# ---------------------------------------------------------------------------
def qnet_kernel(x_ref, w1_ref, b1_ref, s1a_ref, s1b_ref,
                w2_ref, b2_ref, s2a_ref, s2b_ref,
                w3_ref, b3_ref, s3a_ref, s3b_ref,
                wl_ref, bl_ref, out_ref):
    f32, bf16 = jnp.float32, jnp.bfloat16

    def mm(a, b):
        return jnp.dot(a, b, preferred_element_type=f32)

    def conv_relu(w_ref, b_ref, act16):
        # act16: bf16 (in_flat, Bt); w: bf16 (out_flat, in_flat); b: f32 (out_flat, 1)
        return jnp.maximum(mm(w_ref[...], act16) + b_ref[...], 0.0)

    def maxpool(sa_ref, sb_ref, act):
        # Separable 3x3 / stride-2 / pad-1 max pool on post-ReLU act (f32, >= 0).
        a16 = act.astype(bf16)
        col = mm(sa_ref[0], a16)                      # column stage
        for t in range(1, 3):
            col = jnp.maximum(col, mm(sa_ref[t], a16))
        c16 = col.astype(bf16)
        row = mm(sb_ref[0], c16)                      # row stage
        for t in range(1, 3):
            row = jnp.maximum(row, mm(sb_ref[t], c16))
        return row

    a = conv_relu(w1_ref, b1_ref, x_ref[...])          # (243, Bt)
    a = maxpool(s1a_ref, s1b_ref, a)                   # ( 75, Bt)  pool1
    a = conv_relu(w2_ref, b2_ref, a.astype(bf16))      # (180, Bt)
    a = maxpool(s2a_ref, s2b_ref, a)                   # ( 45, Bt)  pool2
    a = conv_relu(w3_ref, b3_ref, a.astype(bf16))      # (144, Bt)
    a = maxpool(s3a_ref, s3b_ref, a)                   # ( 36, Bt)  pool3 == flat feats
    out_ref[...] = mm(wl_ref[...], a.astype(bf16)) + bl_ref[...]   # (4, Bt) lane-dense


# ---------------------------------------------------------------------------
# Wrapper
# ---------------------------------------------------------------------------
def init_params(key):
    ks = jax.random.split(key, 8)
    return dict(
        w1=jax.random.normal(ks[0], (3, 2, 4, 4), jnp.float32) * 0.2,
        b1=jax.random.normal(ks[1], (3,), jnp.float32) * 0.1,
        w2=jax.random.normal(ks[2], (5, 3, 4, 4), jnp.float32) * 0.2,
        b2=jax.random.normal(ks[3], (5,), jnp.float32) * 0.1,
        w3=jax.random.normal(ks[4], (9, 5, 4, 4), jnp.float32) * 0.2,
        b3=jax.random.normal(ks[5], (9,), jnp.float32) * 0.1,
        wl=jax.random.normal(ks[6], (4, 36), jnp.float32) * 0.2,  # torch Linear: (out, in)
        bl=jax.random.normal(ks[7], (4,), jnp.float32) * 0.1,
    )


@jax.jit
def qlearning_forward(p, lp, params):
    f32, bf16 = jnp.float32, jnp.bfloat16
    B = p.shape[0]

    # Flatten to feature order c*64 + h*8 + w (channel 0 = p, channel 1 = lp),
    # matching torch.cat([p, lp], 1) followed by the conv1 dense matrix.
    x = jnp.concatenate(
        [p.reshape(B, SIZE * SIZE), lp.reshape(B, SIZE * SIZE)], axis=1
    ).astype(f32)                                      # (B, 128)
    x_t = x.T                                          # (128, B): batch on lanes
    Bp = ((B + B_TILE - 1) // B_TILE) * B_TILE
    if Bp != B:
        x_t = jnp.pad(x_t, ((0, 0), (0, Bp - B)))
    x_t = x_t.astype(bf16)                             # halves input DMA

    # Dense conv matrices (next-layer padding folded in) + per-row bias columns.
    w1m = _conv_dense(params["w1"], _C1_IDX).astype(bf16)          # (243, 128)
    w2m = _conv_dense(params["w2"], _C2_IDX).astype(bf16)          # (180,  75)
    w3m = _conv_dense(params["w3"], _C3_IDX).astype(bf16)          # (144,  45)
    b1v = jnp.repeat(params["b1"].astype(f32), 9 * 9)[:, None]     # (243, 1)
    b2v = jnp.repeat(params["b2"].astype(f32), 6 * 6)[:, None]     # (180, 1)
    b3v = jnp.repeat(params["b3"].astype(f32), 4 * 4)[:, None]     # (144, 1)
    wl = params["wl"].astype(bf16)                                 # (4, 36)
    bl = params["bl"].astype(f32)[:, None]                         # (4, 1)

    # 0/1 separable pool taps: exact in bf16.
    s1a = jnp.asarray(_S1A, bf16); s1b = jnp.asarray(_S1B, bf16)
    s2a = jnp.asarray(_S2A, bf16); s2b = jnp.asarray(_S2B, bf16)
    s3a = jnp.asarray(_S3A, bf16); s3b = jnp.asarray(_S3B, bf16)

    consts = (w1m, b1v, s1a, s1b, w2m, b2v, s2a, s2b,
              w3m, b3v, s3a, s3b, wl, bl)

    def full_spec(arr):
        if arr.ndim == 2:
            return pl.BlockSpec(arr.shape, lambda b: (0, 0))
        return pl.BlockSpec(arr.shape, lambda b: (0, 0, 0))

    # Advisory cost estimate so XLA can schedule surrounding ops sensibly.
    mac_per_lane = (
        w1m.shape[0] * w1m.shape[1]
        + 3 * (s1a.shape[1] * s1a.shape[2] + s1b.shape[1] * s1b.shape[2])
        + w2m.shape[0] * w2m.shape[1]
        + 3 * (s2a.shape[1] * s2a.shape[2] + s2b.shape[1] * s2b.shape[2])
        + w3m.shape[0] * w3m.shape[1]
        + 3 * (s3a.shape[1] * s3a.shape[2] + s3b.shape[1] * s3b.shape[2])
        + wl.shape[0] * wl.shape[1])
    bytes_accessed = int(
        x_t.size * 2 + 4 * Bp * 4
        + sum(int(a.size) * a.dtype.itemsize for a in consts))
    cost = pl.CostEstimate(flops=2 * mac_per_lane * Bp, transcendentals=0,
                           bytes_accessed=bytes_accessed)

    q_t = pl.pallas_call(
        qnet_kernel,
        out_shape=jax.ShapeDtypeStruct((4, Bp), f32),
        grid=(Bp // B_TILE,),
        in_specs=[pl.BlockSpec((2 * SIZE * SIZE, B_TILE), lambda b: (0, b))]  # x tile
                 + [full_spec(a) for a in consts],                            # resident
        out_specs=pl.BlockSpec((4, B_TILE), lambda b: (0, b)),                # lane-dense
        compiler_params=pltpu.CompilerParams(
            dimension_semantics=("parallel",)),
        cost_estimate=cost,
    )(x_t, *consts)

    return q_t[:, :B].T.astype(f32)                    # (B, 4)


# ---------------------------------------------------------------------------
# Pure-JAX reference mirroring the PyTorch forward exactly (f32).
# ---------------------------------------------------------------------------
def qlearning_reference(p, lp, params):
    x = jnp.concatenate([p, lp], axis=1).astype(jnp.float32)

    def conv(x, w, b):
        y = jax.lax.conv_general_dilated(
            x, w, window_strides=(1, 1), padding=((2, 2), (2, 2)),
            dimension_numbers=("NCHW", "OIHW", "NCHW"))
        return jax.nn.relu(y + b[None, :, None, None])

    def pool(x):
        return jax.lax.reduce_window(
            x, -jnp.inf, jax.lax.max,
            window_dimensions=(1, 1, 3, 3), window_strides=(1, 1, 2, 2),
            padding=((0, 0), (0, 0), (1, 1), (1, 1)))

    x = pool(conv(x, params["w1"], params["b1"]))
    x = pool(conv(x, params["w2"], params["b2"]))
    x = pool(conv(x, params["w3"], params["b3"]))
    flat = x.reshape(x.shape[0], -1)
    return flat @ params["wl"].T + params["bl"]


if __name__ == "__main__":
    key = jax.random.PRNGKey(0)
    kp, klp, kparam = jax.random.split(key, 3)
    B = 500  # non-multiple of B_TILE to exercise batch padding; 2 grid steps
    p = jax.random.uniform(kp, (B, 1, SIZE, SIZE), jnp.float32)    # current frame
    lp = jax.random.uniform(klp, (B, 1, SIZE, SIZE), jnp.float32)  # last frame
    params = init_params(kparam)

    q = qlearning_forward(p, lp, params)
    q = jax.block_until_ready(q)

    q_ref = qlearning_reference(p, lp, params)
    assert q.shape == (B, 4)
    assert bool(jnp.all(jnp.isfinite(q)))
    assert bool(jnp.allclose(q, q_ref, rtol=5e-2, atol=5e-2)), (q[:4], q_ref[:4])
    print("KERNEL_OK")
</pallas_src>

<mosaic_0001>
module attributes {stable_mosaic.version = 11 : i64} {
  func.func @qnet_kernel(%arg0: i32, %arg1: memref<128x256xbf16, #tpu.memory_space<vmem>>, %arg2: memref<243x128xbf16, #tpu.memory_space<vmem>>, %arg3: memref<243x1xf32, #tpu.memory_space<vmem>>, %arg4: memref<3x135x243xbf16, #tpu.memory_space<vmem>>, %arg5: memref<3x75x135xbf16, #tpu.memory_space<vmem>>, %arg6: memref<180x75xbf16, #tpu.memory_space<vmem>>, %arg7: memref<180x1xf32, #tpu.memory_space<vmem>>, %arg8: memref<3x90x180xbf16, #tpu.memory_space<vmem>>, %arg9: memref<3x45x90xbf16, #tpu.memory_space<vmem>>, %arg10: memref<144x45xbf16, #tpu.memory_space<vmem>>, %arg11: memref<144x1xf32, #tpu.memory_space<vmem>>, %arg12: memref<3x72x144xbf16, #tpu.memory_space<vmem>>, %arg13: memref<3x36x72xbf16, #tpu.memory_space<vmem>>, %arg14: memref<4x36xbf16, #tpu.memory_space<vmem>>, %arg15: memref<4x1xf32, #tpu.memory_space<vmem>>, %arg16: memref<4x256xf32, #tpu.memory_space<vmem>>) attributes {dimension_semantics = [#tpu.dimension_semantics<parallel>], iteration_bounds = array<i64: 2>, scalar_prefetch = 0 : i64, scratch_operands = 0 : i64, tpu.core_type = #tpu.core_type<tc>, window_params = [{transform_indices = @transform_0, window_bounds = array<i64: 128, 256>}, {pipeline_mode = #tpu.pipeline_mode<synchronous>, transform_indices = @transform_1, window_bounds = array<i64: 243, 128>}, {pipeline_mode = #tpu.pipeline_mode<synchronous>, transform_indices = @transform_2, window_bounds = array<i64: 243, 1>}, {pipeline_mode = #tpu.pipeline_mode<synchronous>, transform_indices = @transform_3, window_bounds = array<i64: 3, 135, 243>}, {pipeline_mode = #tpu.pipeline_mode<synchronous>, transform_indices = @transform_4, window_bounds = array<i64: 3, 75, 135>}, {pipeline_mode = #tpu.pipeline_mode<synchronous>, transform_indices = @transform_5, window_bounds = array<i64: 180, 75>}, {pipeline_mode = #tpu.pipeline_mode<synchronous>, transform_indices = @transform_6, window_bounds = array<i64: 180, 1>}, {pipeline_mode = #tpu.pipeline_mode<synchronous>, transform_indices = @transform_7, window_bounds = array<i64: 3, 90, 180>}, {pipeline_mode = #tpu.pipeline_mode<synchronous>, transform_indices = @transform_8, window_bounds = array<i64: 3, 45, 90>}, {pipeline_mode = #tpu.pipeline_mode<synchronous>, transform_indices = @transform_9, window_bounds = array<i64: 144, 45>}, {pipeline_mode = #tpu.pipeline_mode<synchronous>, transform_indices = @transform_10, window_bounds = array<i64: 144, 1>}, {pipeline_mode = #tpu.pipeline_mode<synchronous>, transform_indices = @transform_11, window_bounds = array<i64: 3, 72, 144>}, {pipeline_mode = #tpu.pipeline_mode<synchronous>, transform_indices = @transform_12, window_bounds = array<i64: 3, 36, 72>}, {pipeline_mode = #tpu.pipeline_mode<synchronous>, transform_indices = @transform_13, window_bounds = array<i64: 4, 36>}, {pipeline_mode = #tpu.pipeline_mode<synchronous>, transform_indices = @transform_14, window_bounds = array<i64: 4, 1>}, {transform_indices = @transform_15, window_bounds = array<i64: 4, 256>}]} {
    %c0 = arith.constant 0 : index
    %c0_0 = arith.constant 0 : index
    %0 = vector.load %arg1[%c0, %c0_0] : memref<128x256xbf16, #tpu.memory_space<vmem>>, vector<128x256xbf16>
    %c0_1 = arith.constant 0 : index
    %c0_2 = arith.constant 0 : index
    %1 = vector.load %arg2[%c0_1, %c0_2] : memref<243x128xbf16, #tpu.memory_space<vmem>>, vector<243x128xbf16>
    %cst = arith.constant dense<0.000000e+00> : vector<243x256xf32>
    %2 = tpu.matmul %1, %0, %cst {dimension_numbers = #tpu.dot_dimension_numbers<[1], [0], [0], [1], [0, 0, 1, 1], [], []>} : vector<243x128xbf16>, vector<128x256xbf16>, vector<243x256xf32> -> vector<243x256xf32>
    %c0_3 = arith.constant 0 : index
    %c0_4 = arith.constant 0 : index
    %3 = vector.load %arg3[%c0_3, %c0_4] : memref<243x1xf32, #tpu.memory_space<vmem>>, vector<243x1xf32>
    %4 = vector.broadcast %3 : vector<243x1xf32> to vector<243x256xf32>
    %5 = arith.addf %2, %4 : vector<243x256xf32>
    %cst_5 = arith.constant 0.000000e+00 : f32
    %6 = vector.broadcast %cst_5 : f32 to vector<243x256xf32>
    %7 = arith.maximumf %5, %6 : vector<243x256xf32>
    %8 = arith.truncf %7 : vector<243x256xf32> to vector<243x256xbf16>
    %c0_6 = arith.constant 0 : index
    %c0_7 = arith.constant 0 : index
    %c0_8 = arith.constant 0 : index
    %9 = vector.load %arg4[%c0_6, %c0_7, %c0_8] : memref<3x135x243xbf16, #tpu.memory_space<vmem>>, vector<1x135x243xbf16>
    %10 = vector.shape_cast %9 : vector<1x135x243xbf16> to vector<135x243xbf16>
    %cst_9 = arith.constant dense<0.000000e+00> : vector<135x256xf32>
    %11 = tpu.matmul %10, %8, %cst_9 {dimension_numbers = #tpu.dot_dimension_numbers<[1], [0], [0], [1], [0, 0, 1, 1], [], []>} : vector<135x243xbf16>, vector<243x256xbf16>, vector<135x256xf32> -> vector<135x256xf32>
    %c1 = arith.constant 1 : index
    %c0_10 = arith.constant 0 : index
    %c0_11 = arith.constant 0 : index
    %12 = vector.load %arg4[%c1, %c0_10, %c0_11] : memref<3x135x243xbf16, #tpu.memory_space<vmem>>, vector<1x135x243xbf16>
    %13 = vector.shape_cast %12 : vector<1x135x243xbf16> to vector<135x243xbf16>
    %cst_12 = arith.constant dense<0.000000e+00> : vector<135x256xf32>
    %14 = tpu.matmul %13, %8, %cst_12 {dimension_numbers = #tpu.dot_dimension_numbers<[1], [0], [0], [1], [0, 0, 1, 1], [], []>} : vector<135x243xbf16>, vector<243x256xbf16>, vector<135x256xf32> -> vector<135x256xf32>
    %15 = arith.maximumf %11, %14 : vector<135x256xf32>
    %c2 = arith.constant 2 : index
    %c0_13 = arith.constant 0 : index
    %c0_14 = arith.constant 0 : index
    %16 = vector.load %arg4[%c2, %c0_13, %c0_14] : memref<3x135x243xbf16, #tpu.memory_space<vmem>>, vector<1x135x243xbf16>
    %17 = vector.shape_cast %16 : vector<1x135x243xbf16> to vector<135x243xbf16>
    %cst_15 = arith.constant dense<0.000000e+00> : vector<135x256xf32>
    %18 = tpu.matmul %17, %8, %cst_15 {dimension_numbers = #tpu.dot_dimension_numbers<[1], [0], [0], [1], [0, 0, 1, 1], [], []>} : vector<135x243xbf16>, vector<243x256xbf16>, vector<135x256xf32> -> vector<135x256xf32>
    %19 = arith.maximumf %15, %18 : vector<135x256xf32>
    %20 = arith.truncf %19 : vector<135x256xf32> to vector<135x256xbf16>
    %c0_16 = arith.constant 0 : index
    %c0_17 = arith.constant 0 : index
    %c0_18 = arith.constant 0 : index
    %21 = vector.load %arg5[%c0_16, %c0_17, %c0_18] : memref<3x75x135xbf16, #tpu.memory_space<vmem>>, vector<1x75x135xbf16>
    %22 = vector.shape_cast %21 : vector<1x75x135xbf16> to vector<75x135xbf16>
    %cst_19 = arith.constant dense<0.000000e+00> : vector<75x256xf32>
    %23 = tpu.matmul %22, %20, %cst_19 {dimension_numbers = #tpu.dot_dimension_numbers<[1], [0], [0], [1], [0, 0, 1, 1], [], []>} : vector<75x135xbf16>, vector<135x256xbf16>, vector<75x256xf32> -> vector<75x256xf32>
    %c1_20 = arith.constant 1 : index
    %c0_21 = arith.constant 0 : index
    %c0_22 = arith.constant 0 : index
    %24 = vector.load %arg5[%c1_20, %c0_21, %c0_22] : memref<3x75x135xbf16, #tpu.memory_space<vmem>>, vector<1x75x135xbf16>
    %25 = vector.shape_cast %24 : vector<1x75x135xbf16> to vector<75x135xbf16>
    %cst_23 = arith.constant dense<0.000000e+00> : vector<75x256xf32>
    %26 = tpu.matmul %25, %20, %cst_23 {dimension_numbers = #tpu.dot_dimension_numbers<[1], [0], [0], [1], [0, 0, 1, 1], [], []>} : vector<75x135xbf16>, vector<135x256xbf16>, vector<75x256xf32> -> vector<75x256xf32>
    %27 = arith.maximumf %23, %26 : vector<75x256xf32>
    %c2_24 = arith.constant 2 : index
    %c0_25 = arith.constant 0 : index
    %c0_26 = arith.constant 0 : index
    %28 = vector.load %arg5[%c2_24, %c0_25, %c0_26] : memref<3x75x135xbf16, #tpu.memory_space<vmem>>, vector<1x75x135xbf16>
    %29 = vector.shape_cast %28 : vector<1x75x135xbf16> to vector<75x135xbf16>
    %cst_27 = arith.constant dense<0.000000e+00> : vector<75x256xf32>
    %30 = tpu.matmul %29, %20, %cst_27 {dimension_numbers = #tpu.dot_dimension_numbers<[1], [0], [0], [1], [0, 0, 1, 1], [], []>} : vector<75x135xbf16>, vector<135x256xbf16>, vector<75x256xf32> -> vector<75x256xf32>
    %31 = arith.maximumf %27, %30 : vector<75x256xf32>
    %32 = arith.truncf %31 : vector<75x256xf32> to vector<75x256xbf16>
    %c0_28 = arith.constant 0 : index
    %c0_29 = arith.constant 0 : index
    %33 = vector.load %arg6[%c0_28, %c0_29] : memref<180x75xbf16, #tpu.memory_space<vmem>>, vector<180x75xbf16>
    %cst_30 = arith.constant dense<0.000000e+00> : vector<180x256xf32>
    %34 = tpu.matmul %33, %32, %cst_30 {dimension_numbers = #tpu.dot_dimension_numbers<[1], [0], [0], [1], [0, 0, 1, 1], [], []>} : vector<180x75xbf16>, vector<75x256xbf16>, vector<180x256xf32> -> vector<180x256xf32>
    %c0_31 = arith.constant 0 : index
    %c0_32 = arith.constant 0 : index
    %35 = vector.load %arg7[%c0_31, %c0_32] : memref<180x1xf32, #tpu.memory_space<vmem>>, vector<180x1xf32>
    %36 = vector.broadcast %35 : vector<180x1xf32> to vector<180x256xf32>
    %37 = arith.addf %34, %36 : vector<180x256xf32>
    %cst_33 = arith.constant 0.000000e+00 : f32
    %38 = vector.broadcast %cst_33 : f32 to vector<180x256xf32>
    %39 = arith.maximumf %37, %38 : vector<180x256xf32>
    %40 = arith.truncf %39 : vector<180x256xf32> to vector<180x256xbf16>
    %c0_34 = arith.constant 0 : index
    %c0_35 = arith.constant 0 : index
    %c0_36 = arith.constant 0 : index
    %41 = vector.load %arg8[%c0_34, %c0_35, %c0_36] : memref<3x90x180xbf16, #tpu.memory_space<vmem>>, vector<1x90x180xbf16>
    %42 = vector.shape_cast %41 : vector<1x90x180xbf16> to vector<90x180xbf16>
    %cst_37 = arith.constant dense<0.000000e+00> : vector<90x256xf32>
    %43 = tpu.matmul %42, %40, %cst_37 {dimension_numbers = #tpu.dot_dimension_numbers<[1], [0], [0], [1], [0, 0, 1, 1], [], []>} : vector<90x180xbf16>, vector<180x256xbf16>, vector<90x256xf32> -> vector<90x256xf32>
    %c1_38 = arith.constant 1 : index
    %c0_39 = arith.constant 0 : index
    %c0_40 = arith.constant 0 : index
    %44 = vector.load %arg8[%c1_38, %c0_39, %c0_40] : memref<3x90x180xbf16, #tpu.memory_space<vmem>>, vector<1x90x180xbf16>
    %45 = vector.shape_cast %44 : vector<1x90x180xbf16> to vector<90x180xbf16>
    %cst_41 = arith.constant dense<0.000000e+00> : vector<90x256xf32>
    %46 = tpu.matmul %45, %40, %cst_41 {dimension_numbers = #tpu.dot_dimension_numbers<[1], [0], [0], [1], [0, 0, 1, 1], [], []>} : vector<90x180xbf16>, vector<180x256xbf16>, vector<90x256xf32> -> vector<90x256xf32>
    %47 = arith.maximumf %43, %46 : vector<90x256xf32>
    %c2_42 = arith.constant 2 : index
    %c0_43 = arith.constant 0 : index
    %c0_44 = arith.constant 0 : index
    %48 = vector.load %arg8[%c2_42, %c0_43, %c0_44] : memref<3x90x180xbf16, #tpu.memory_space<vmem>>, vector<1x90x180xbf16>
    %49 = vector.shape_cast %48 : vector<1x90x180xbf16> to vector<90x180xbf16>
    %cst_45 = arith.constant dense<0.000000e+00> : vector<90x256xf32>
    %50 = tpu.matmul %49, %40, %cst_45 {dimension_numbers = #tpu.dot_dimension_numbers<[1], [0], [0], [1], [0, 0, 1, 1], [], []>} : vector<90x180xbf16>, vector<180x256xbf16>, vector<90x256xf32> -> vector<90x256xf32>
    %51 = arith.maximumf %47, %50 : vector<90x256xf32>
    %52 = arith.truncf %51 : vector<90x256xf32> to vector<90x256xbf16>
    %c0_46 = arith.constant 0 : index
    %c0_47 = arith.constant 0 : index
    %c0_48 = arith.constant 0 : index
    %53 = vector.load %arg9[%c0_46, %c0_47, %c0_48] : memref<3x45x90xbf16, #tpu.memory_space<vmem>>, vector<1x45x90xbf16>
    %54 = vector.shape_cast %53 : vector<1x45x90xbf16> to vector<45x90xbf16>
    %cst_49 = arith.constant dense<0.000000e+00> : vector<45x256xf32>
    %55 = tpu.matmul %54, %52, %cst_49 {dimension_numbers = #tpu.dot_dimension_numbers<[1], [0], [0], [1], [0, 0, 1, 1], [], []>} : vector<45x90xbf16>, vector<90x256xbf16>, vector<45x256xf32> -> vector<45x256xf32>
    %c1_50 = arith.constant 1 : index
    %c0_51 = arith.constant 0 : index
    %c0_52 = arith.constant 0 : index
    %56 = vector.load %arg9[%c1_50, %c0_51, %c0_52] : memref<3x45x90xbf16, #tpu.memory_space<vmem>>, vector<1x45x90xbf16>
    %57 = vector.shape_cast %56 : vector<1x45x90xbf16> to vector<45x90xbf16>
    %cst_53 = arith.constant dense<0.000000e+00> : vector<45x256xf32>
    %58 = tpu.matmul %57, %52, %cst_53 {dimension_numbers = #tpu.dot_dimension_numbers<[1], [0], [0], [1], [0, 0, 1, 1], [], []>} : vector<45x90xbf16>, vector<90x256xbf16>, vector<45x256xf32> -> vector<45x256xf32>
    %59 = arith.maximumf %55, %58 : vector<45x256xf32>
    %c2_54 = arith.constant 2 : index
    %c0_55 = arith.constant 0 : index
    %c0_56 = arith.constant 0 : index
    %60 = vector.load %arg9[%c2_54, %c0_55, %c0_56] : memref<3x45x90xbf16, #tpu.memory_space<vmem>>, vector<1x45x90xbf16>
    %61 = vector.shape_cast %60 : vector<1x45x90xbf16> to vector<45x90xbf16>
    %cst_57 = arith.constant dense<0.000000e+00> : vector<45x256xf32>
    %62 = tpu.matmul %61, %52, %cst_57 {dimension_numbers = #tpu.dot_dimension_numbers<[1], [0], [0], [1], [0, 0, 1, 1], [], []>} : vector<45x90xbf16>, vector<90x256xbf16>, vector<45x256xf32> -> vector<45x256xf32>
    %63 = arith.maximumf %59, %62 : vector<45x256xf32>
    %64 = arith.truncf %63 : vector<45x256xf32> to vector<45x256xbf16>
    %c0_58 = arith.constant 0 : index
    %c0_59 = arith.constant 0 : index
    %65 = vector.load %arg10[%c0_58, %c0_59] : memref<144x45xbf16, #tpu.memory_space<vmem>>, vector<144x45xbf16>
    %cst_60 = arith.constant dense<0.000000e+00> : vector<144x256xf32>
    %66 = tpu.matmul %65, %64, %cst_60 {dimension_numbers = #tpu.dot_dimension_numbers<[1], [0], [0], [1], [0, 0, 1, 1], [], []>} : vector<144x45xbf16>, vector<45x256xbf16>, vector<144x256xf32> -> vector<144x256xf32>
    %c0_61 = arith.constant 0 : index
    %c0_62 = arith.constant 0 : index
    %67 = vector.load %arg11[%c0_61, %c0_62] : memref<144x1xf32, #tpu.memory_space<vmem>>, vector<144x1xf32>
    %68 = vector.broadcast %67 : vector<144x1xf32> to vector<144x256xf32>
    %69 = arith.addf %66, %68 : vector<144x256xf32>
    %cst_63 = arith.constant 0.000000e+00 : f32
    %70 = vector.broadcast %cst_63 : f32 to vector<144x256xf32>
    %71 = arith.maximumf %69, %70 : vector<144x256xf32>
    %72 = arith.truncf %71 : vector<144x256xf32> to vector<144x256xbf16>
    %c0_64 = arith.constant 0 : index
    %c0_65 = arith.constant 0 : index
    %c0_66 = arith.constant 0 : index
    %73 = vector.load %arg12[%c0_64, %c0_65, %c0_66] : memref<3x72x144xbf16, #tpu.memory_space<vmem>>, vector<1x72x144xbf16>
    %74 = vector.shape_cast %73 : vector<1x72x144xbf16> to vector<72x144xbf16>
    %cst_67 = arith.constant dense<0.000000e+00> : vector<72x256xf32>
    %75 = tpu.matmul %74, %72, %cst_67 {dimension_numbers = #tpu.dot_dimension_numbers<[1], [0], [0], [1], [0, 0, 1, 1], [], []>} : vector<72x144xbf16>, vector<144x256xbf16>, vector<72x256xf32> -> vector<72x256xf32>
    %c1_68 = arith.constant 1 : index
    %c0_69 = arith.constant 0 : index
    %c0_70 = arith.constant 0 : index
    %76 = vector.load %arg12[%c1_68, %c0_69, %c0_70] : memref<3x72x144xbf16, #tpu.memory_space<vmem>>, vector<1x72x144xbf16>
    %77 = vector.shape_cast %76 : vector<1x72x144xbf16> to vector<72x144xbf16>
    %cst_71 = arith.constant dense<0.000000e+00> : vector<72x256xf32>
    %78 = tpu.matmul %77, %72, %cst_71 {dimension_numbers = #tpu.dot_dimension_numbers<[1], [0], [0], [1], [0, 0, 1, 1], [], []>} : vector<72x144xbf16>, vector<144x256xbf16>, vector<72x256xf32> -> vector<72x256xf32>
    %79 = arith.maximumf %75, %78 : vector<72x256xf32>
    %c2_72 = arith.constant 2 : index
    %c0_73 = arith.constant 0 : index
    %c0_74 = arith.constant 0 : index
    %80 = vector.load %arg12[%c2_72, %c0_73, %c0_74] : memref<3x72x144xbf16, #tpu.memory_space<vmem>>, vector<1x72x144xbf16>
    %81 = vector.shape_cast %80 : vector<1x72x144xbf16> to vector<72x144xbf16>
    %cst_75 = arith.constant dense<0.000000e+00> : vector<72x256xf32>
    %82 = tpu.matmul %81, %72, %cst_75 {dimension_numbers = #tpu.dot_dimension_numbers<[1], [0], [0], [1], [0, 0, 1, 1], [], []>} : vector<72x144xbf16>, vector<144x256xbf16>, vector<72x256xf32> -> vector<72x256xf32>
    %83 = arith.maximumf %79, %82 : vector<72x256xf32>
    %84 = arith.truncf %83 : vector<72x256xf32> to vector<72x256xbf16>
    %c0_76 = arith.constant 0 : index
    %c0_77 = arith.constant 0 : index
    %c0_78 = arith.constant 0 : index
    %85 = vector.load %arg13[%c0_76, %c0_77, %c0_78] : memref<3x36x72xbf16, #tpu.memory_space<vmem>>, vector<1x36x72xbf16>
    %86 = vector.shape_cast %85 : vector<1x36x72xbf16> to vector<36x72xbf16>
    %cst_79 = arith.constant dense<0.000000e+00> : vector<36x256xf32>
    %87 = tpu.matmul %86, %84, %cst_79 {dimension_numbers = #tpu.dot_dimension_numbers<[1], [0], [0], [1], [0, 0, 1, 1], [], []>} : vector<36x72xbf16>, vector<72x256xbf16>, vector<36x256xf32> -> vector<36x256xf32>
    %c1_80 = arith.constant 1 : index
    %c0_81 = arith.constant 0 : index
    %c0_82 = arith.constant 0 : index
    %88 = vector.load %arg13[%c1_80, %c0_81, %c0_82] : memref<3x36x72xbf16, #tpu.memory_space<vmem>>, vector<1x36x72xbf16>
    %89 = vector.shape_cast %88 : vector<1x36x72xbf16> to vector<36x72xbf16>
    %cst_83 = arith.constant dense<0.000000e+00> : vector<36x256xf32>
    %90 = tpu.matmul %89, %84, %cst_83 {dimension_numbers = #tpu.dot_dimension_numbers<[1], [0], [0], [1], [0, 0, 1, 1], [], []>} : vector<36x72xbf16>, vector<72x256xbf16>, vector<36x256xf32> -> vector<36x256xf32>
    %91 = arith.maximumf %87, %90 : vector<36x256xf32>
    %c2_84 = arith.constant 2 : index
    %c0_85 = arith.constant 0 : index
    %c0_86 = arith.constant 0 : index
    %92 = vector.load %arg13[%c2_84, %c0_85, %c0_86] : memref<3x36x72xbf16, #tpu.memory_space<vmem>>, vector<1x36x72xbf16>
    %93 = vector.shape_cast %92 : vector<1x36x72xbf16> to vector<36x72xbf16>
    %cst_87 = arith.constant dense<0.000000e+00> : vector<36x256xf32>
    %94 = tpu.matmul %93, %84, %cst_87 {dimension_numbers = #tpu.dot_dimension_numbers<[1], [0], [0], [1], [0, 0, 1, 1], [], []>} : vector<36x72xbf16>, vector<72x256xbf16>, vector<36x256xf32> -> vector<36x256xf32>
    %95 = arith.maximumf %91, %94 : vector<36x256xf32>
    %c0_88 = arith.constant 0 : index
    %c0_89 = arith.constant 0 : index
    %96 = vector.load %arg14[%c0_88, %c0_89] : memref<4x36xbf16, #tpu.memory_space<vmem>>, vector<4x36xbf16>
    %97 = arith.truncf %95 : vector<36x256xf32> to vector<36x256xbf16>
    %cst_90 = arith.constant dense<0.000000e+00> : vector<4x256xf32>
    %98 = tpu.matmul %96, %97, %cst_90 {dimension_numbers = #tpu.dot_dimension_numbers<[1], [0], [0], [1], [0, 0, 1, 1], [], []>} : vector<4x36xbf16>, vector<36x256xbf16>, vector<4x256xf32> -> vector<4x256xf32>
    %c0_91 = arith.constant 0 : index
    %c0_92 = arith.constant 0 : index
    %99 = vector.load %arg15[%c0_91, %c0_92] : memref<4x1xf32, #tpu.memory_space<vmem>>, vector<4x1xf32>
    %100 = vector.broadcast %99 : vector<4x1xf32> to vector<4x256xf32>
    %101 = arith.addf %98, %100 : vector<4x256xf32>
    %c0_93 = arith.constant 0 : index
    %c0_94 = arith.constant 0 : index
    %102 = vector.load %arg16[%c0_93, %c0_94] : memref<4x256xf32, #tpu.memory_space<vmem>>, vector<4x256xf32>
    tpu.vector_store %arg16[%c0_93, %c0_94], %101 {strides = array<i32>} : memref<4x256xf32, #tpu.memory_space<vmem>>, vector<4x256xf32>,
    return
  }
  func.func @transform_0(%arg0: i32) -> (i32, i32) {
    %c0_i32 = arith.constant 0 : i32
    %c0_i32_0 = arith.constant 0 : i32
    return %c0_i32, %arg0 : i32, i32
  }
  func.func @transform_1(%arg0: i32) -> (i32, i32) {
    %c0_i32 = arith.constant 0 : i32
    %c0_i32_0 = arith.constant 0 : i32
    %c0_i32_1 = arith.constant 0 : i32
    return %c0_i32, %c0_i32_0 : i32, i32
  }
  func.func @transform_2(%arg0: i32) -> (i32, i32) {
    %c0_i32 = arith.constant 0 : i32
    %c0_i32_0 = arith.constant 0 : i32
    %c0_i32_1 = arith.constant 0 : i32
    return %c0_i32, %c0_i32_0 : i32, i32
  }
  func.func @transform_3(%arg0: i32) -> (i32, i32, i32) {
    %c0_i32 = arith.constant 0 : i32
    %c0_i32_0 = arith.constant 0 : i32
    %c0_i32_1 = arith.constant 0 : i32
    %c0_i32_2 = arith.constant 0 : i32
    return %c0_i32, %c0_i32_0, %c0_i32_1 : i32, i32, i32
  }
  func.func @transform_4(%arg0: i32) -> (i32, i32, i32) {
    %c0_i32 = arith.constant 0 : i32
    %c0_i32_0 = arith.constant 0 : i32
    %c0_i32_1 = arith.constant 0 : i32
    %c0_i32_2 = arith.constant 0 : i32
    return %c0_i32, %c0_i32_0, %c0_i32_1 : i32, i32, i32
  }
  func.func @transform_5(%arg0: i32) -> (i32, i32) {
    %c0_i32 = arith.constant 0 : i32
    %c0_i32_0 = arith.constant 0 : i32
    %c0_i32_1 = arith.constant 0 : i32
    return %c0_i32, %c0_i32_0 : i32, i32
  }
  func.func @transform_6(%arg0: i32) -> (i32, i32) {
    %c0_i32 = arith.constant 0 : i32
    %c0_i32_0 = arith.constant 0 : i32
    %c0_i32_1 = arith.constant 0 : i32
    return %c0_i32, %c0_i32_0 : i32, i32
  }
  func.func @transform_7(%arg0: i32) -> (i32, i32, i32) {
    %c0_i32 = arith.constant 0 : i32
    %c0_i32_0 = arith.constant 0 : i32
    %c0_i32_1 = arith.constant 0 : i32
    %c0_i32_2 = arith.constant 0 : i32
    return %c0_i32, %c0_i32_0, %c0_i32_1 : i32, i32, i32
  }
  func.func @transform_8(%arg0: i32) -> (i32, i32, i32) {
    %c0_i32 = arith.constant 0 : i32
    %c0_i32_0 = arith.constant 0 : i32
    %c0_i32_1 = arith.constant 0 : i32
    %c0_i32_2 = arith.constant 0 : i32
    return %c0_i32, %c0_i32_0, %c0_i32_1 : i32, i32, i32
  }
  func.func @transform_9(%arg0: i32) -> (i32, i32) {
    %c0_i32 = arith.constant 0 : i32
    %c0_i32_0 = arith.constant 0 : i32
    %c0_i32_1 = arith.constant 0 : i32
    return %c0_i32, %c0_i32_0 : i32, i32
  }
  func.func @transform_10(%arg0: i32) -> (i32, i32) {
    %c0_i32 = arith.constant 0 : i32
    %c0_i32_0 = arith.constant 0 : i32
    %c0_i32_1 = arith.constant 0 : i32
    return %c0_i32, %c0_i32_0 : i32, i32
  }
  func.func @transform_11(%arg0: i32) -> (i32, i32, i32) {
    %c0_i32 = arith.constant 0 : i32
    %c0_i32_0 = arith.constant 0 : i32
    %c0_i32_1 = arith.constant 0 : i32
    %c0_i32_2 = arith.constant 0 : i32
    return %c0_i32, %c0_i32_0, %c0_i32_1 : i32, i32, i32
  }
  func.func @transform_12(%arg0: i32) -> (i32, i32, i32) {
    %c0_i32 = arith.constant 0 : i32
    %c0_i32_0 = arith.constant 0 : i32
    %c0_i32_1 = arith.constant 0 : i32
    %c0_i32_2 = arith.constant 0 : i32
    return %c0_i32, %c0_i32_0, %c0_i32_1 : i32, i32, i32
  }
  func.func @transform_13(%arg0: i32) -> (i32, i32) {
    %c0_i32 = arith.constant 0 : i32
    %c0_i32_0 = arith.constant 0 : i32
    %c0_i32_1 = arith.constant 0 : i32
    return %c0_i32, %c0_i32_0 : i32, i32
  }
  func.func @transform_14(%arg0: i32) -> (i32, i32) {
    %c0_i32 = arith.constant 0 : i32
    %c0_i32_0 = arith.constant 0 : i32
    %c0_i32_1 = arith.constant 0 : i32
    return %c0_i32, %c0_i32_0 : i32, i32
  }
  func.func @transform_15(%arg0: i32) -> (i32, i32) {
    %c0_i32 = arith.constant 0 : i32
    %c0_i32_0 = arith.constant 0 : i32
    return %c0_i32, %arg0 : i32, i32
  }
}

</mosaic_0001>

<bundles_post_ra>
// kernel: qlearning_forward.1
= control target key start
LH: loop header
LB: loop body
LE: loop exit
PB: predicated region body
PF: predicated region fallthrough
CT: control target
= control target key end

     0   :  { %s6249_s18 = smov 0   ;;  %s6251_s19 = smov 0   ;;  %s8216_s0 = inlined_call_operand.vmem [shape: bf16[128,512], index: 0, kind: input, shape index: {}]   ;;  %s8217_s1 = inlined_call_operand.vmem [shape: bf16[243,128], index: 1, kind: input, shape index: {}]   ;;  %s8218_s2 = inlined_call_operand.vmem [shape: f32[243,1], index: 2, kind: input, shape index: {}]   ;;  %s8219_s3 = inlined_call_operand.vmem [shape: bf16[3,135,243], index: 3, kind: input, shape index: {}]   ;;  %s8220_s4 = inlined_call_operand.vmem [shape: bf16[3,75,135], index: 4, kind: input, shape index: {}]   ;;  %s8221_s5 = inlined_call_operand.vmem [shape: bf16[180,75], index: 5, kind: input, shape index: {}]   ;;  %s8222_s6 = inlined_call_operand.vmem [shape: f32[180,1], index: 6, kind: input, shape index: {}]   ;;  %s8223_s7 = inlined_call_operand.vmem [shape: bf16[3,90,180], index: 7, kind: input, shape index: {}]   ;;  %s8224_s8 = inlined_call_operand.vmem [shape: bf16[3,45,90], index: 8, kind: input, shape index: {}]   ;;  %s8225_s9 = inlined_call_operand.vmem [shape: bf16[144,45], index: 9, kind: input, shape index: {}]   ;;  %s8226_s10 = inlined_call_operand.vmem [shape: f32[144,1], index: 10, kind: input, shape index: {}]   ;;  %s8227_s11 = inlined_call_operand.vmem [shape: bf16[3,72,144], index: 11, kind: input, shape index: {}]   ;;  %s8228_s12 = inlined_call_operand.vmem [shape: bf16[3,36,72], index: 12, kind: input, shape index: {}]   ;;  %s8229_s13 = inlined_call_operand.vmem [shape: bf16[4,36], index: 13, kind: input, shape index: {}]   ;;  %s8230_s14 = inlined_call_operand.vmem [shape: f32[4,1], index: 14, kind: input, shape index: {}]   ;;  %s8231_s15 = inlined_call_operand.vmem [shape: f32[4,512], index: 15, kind: output, shape index: {}]  }
   0x1   :  { %s6253_s20 = smov 0  }
   0x2 LB: > { %s5339_s21 = sadd.s32 4294967295, %s6165_s20   ;;  %s6266_s22 = sadd.s32 1, %s6165_s20   ;;  %s6165_s20 = sphi %s6253_s20, %s8284_s20   ;;  %s6161_s19 = sphi %s6251_s19, %s8283_s19   ;;  %s6157_s18 = sphi %s6249_s18, %s8282_s18  }
   0x3   : > { %s29_s23 = ssub.s32 %s6165_s20, %s6266_s22  ;;  %s32_s24 = sadd.s32 1, %s6161_s19 }
   0x4   : > { %p30_p0 = scmp.eq.s32.totalorder %s29_s23, 0  ;;  %p39_p1 = scmp.ne.s32.totalorder %s6161_s19, %s6157_s18 }
   0x5   : > { %p40_p2 = scmp.eq.s32.totalorder %s6165_s20, 0  ;;  %p5342_p4 = scmp.ge.s32.totalorder %s6165_s20, 2 }
   0x6   : > { %s6275_s25 = scalar_select %p30_p0, %s6161_s19, %s32_s24  }
   0x7   : > { %p41_p3 = por %p40_p2, %p39_p1  ;;  %427 = sbr.rel (%p5342_p4) target bundleno = 26 (0x1a), region = 72 }
   0xe   : > { %430 = sbr.rel (!%p41_p3) target bundleno = 26 (0x1a), region = 76  ;;  %s432_s26 = sand.u32 (%p41_p3), 1, %s6161_s19  }
   0xf   : > { %s5816_s27 = sshll.u32 (%p41_p3), %s6165_s20, 3  ;;  %s5343_s28 = sshll.u32 (%p41_p3), %s432_s26, 7 }
  0x10   : > { %s6283_s16 = scalar_lea.vmem (%p41_p3), %s8216_s0, %s5816_s27  ;;  %s434_s17 = scalar_lea.vmem (%p41_p3), [#allocation2], %s5343_s28 }
  0x11   : > { %v495_v0 = vld [vmem:[%s6283_s16] sm:$0xff] (%p41_p3)  ;;  %v497_v1 = vld [vmem:[%s6283_s16 + $0x10] sm:$0xff] (%p41_p3) }
  0x12   : > { %v499_v2 = vld [vmem:[%s6283_s16 + $0x20] sm:$0xff] (%p41_p3)  ;;  %496 = vst [vmem:[%s434_s17] sm:$0xff] (%p41_p3), %v495_v0  ;;  %498 = vst [vmem:[%s434_s17 + $0x8] sm:$0xff] (%p41_p3), %v497_v1  ;;  %v501_v3 = vld [vmem:[%s6283_s16 + $0x30] sm:$0xff] (%p41_p3) }
  0x13   : > { %500 = vst [vmem:[%s434_s17 + $0x10] sm:$0xff] (%p41_p3), %v499_v2  ;;  %v503_v4 = vld [vmem:[%s6283_s16 + $0x40] sm:$0xff] (%p41_p3)  ;;  %v505_v5 = vld [vmem:[%s6283_s16 + $0x50] sm:$0xff] (%p41_p3)  ;;  %502 = vst [vmem:[%s434_s17 + $0x18] sm:$0xff] (%p41_p3), %v501_v3 }
  0x14   : > { %504 = vst [vmem:[%s434_s17 + $0x20] sm:$0xff] (%p41_p3), %v503_v4  ;;  %506 = vst [vmem:[%s434_s17 + $0x28] sm:$0xff] (%p41_p3), %v505_v5  ;;  %v507_v6 = vld [vmem:[%s6283_s16 + $0x60] sm:$0xff] (%p41_p3)  ;;  %v509_v7 = vld [vmem:[%s6283_s16 + $0x70] sm:$0xff] (%p41_p3) }
  0x15   : > { %v511_v8 = vld [vmem:[%s6283_s16 + $0x80] sm:$0xff]  ;;  %508 = vst [vmem:[%s434_s17 + $0x30] sm:$0xff] %v507_v6  ;;  %510 = vst [vmem:[%s434_s17 + $0x38] sm:$0xff] %v509_v7  ;;  %v513_v9 = vld [vmem:[%s6283_s16 + $0x90] sm:$0xff] }
  0x16   : > { %512 = vst [vmem:[%s434_s17 + $0x40] sm:$0xff] %v511_v8  ;;  %v515_v10 = vld [vmem:[%s6283_s16 + $0xa0] sm:$0xff]  ;;  %v517_v11 = vld [vmem:[%s6283_s16 + $0xb0] sm:$0xff]  ;;  %514 = vst [vmem:[%s434_s17 + $0x48] sm:$0xff] %v513_v9 }
  0x17   : > { %516 = vst [vmem:[%s434_s17 + $0x50] sm:$0xff] %v515_v10  ;;  %518 = vst [vmem:[%s434_s17 + $0x58] sm:$0xff] %v517_v11  ;;  %v519_v12 = vld [vmem:[%s6283_s16 + $0xc0] sm:$0xff]  ;;  %v521_v13 = vld [vmem:[%s6283_s16 + $0xd0] sm:$0xff] }
  0x18   : > { %v523_v14 = vld [vmem:[%s6283_s16 + $0xe0] sm:$0xff]  ;;  %520 = vst [vmem:[%s434_s17 + $0x60] sm:$0xff] %v519_v12  ;;  %522 = vst [vmem:[%s434_s17 + $0x68] sm:$0xff] %v521_v13  ;;  %v525_v15 = vld [vmem:[%s6283_s16 + $0xf0] sm:$0xff] }
  0x19   : > { %524 = vst [vmem:[%s434_s17 + $0x70] sm:$0xff] %v523_v14  ;;  %526 = vst [vmem:[%s434_s17 + $0x78] sm:$0xff] %v525_v15 }
  0x1a PF: > { %p5346_p5 = scmp.ge.s32.totalorder %s6165_s20, 1  ;;  %p531_p6 = scmp.lt.s32.totalorder %s6165_s20, 3 }
  0x1c   : > { %p532_p7 = pnand %p5346_p5, %p531_p6 }
  0x1e   : > { %535 = sbr.rel (%p532_p7) target bundleno = 3028 (0xbd4), region = 114 }
  0x25   : > { %s538_s23 = sand.u32 1, %s6157_s18   ;;  %v640_v16 = vld [vmem:[%s8218_s2] sm:$0xff]  ;;  %v8232_v17 = vmov 0   ;;  %v642_v18 = vld [vmem:[%s8218_s2 + $0x10] sm:$0xff]  ;;  %v641_v19 = vld [vmem:[%s8218_s2 + $0x8] sm:$0xff]  ;;  %vm1380_vm0 = vcmask 941056  }
  0x26   : > { %s5347_s27 = sshll.u32 %s538_s23, 7  ;;  %5843 = vset.pattern.permute.xlu0 %v8232_v17  ;;  %1032 = vmatprep.mubr.bf16.mxu0 %v8232_v17  ;;  %v644_v24 = vld [vmem:[%s8218_s2 + $0x20] sm:$0xff]  ;;  %v643_v29 = vld [vmem:[%s8218_s2 + $0x18] sm:$0xff]  ;;  %v646_v30 = vld [vmem:[%s8218_s2 + $0x30] sm:$0xff]  ;;  %vm1408_vm1 = vcmask 1040384   ;;  %vm1409_vm2 = vcmask 1041408  }
  0x27   : > { %673 = vperm.xlu0 %5843, %v640_v16   ;;  %5844 = vset.pattern.permute.xlu1 %v8232_v17  ;;  %s6316_s18 = scalar_lea.vmem [#allocation2], %s5347_s27  ;;  %v645_v32 = vld [vmem:[%s8218_s2 + $0x28] sm:$0xff]  ;;  %v648_v33 = vld [vmem:[%s8218_s2 + $0x40] sm:$0xff]  ;;  %v647_v36 = vld [vmem:[%s8218_s2 + $0x38] sm:$0xff]  ;;  %vm2168_vm3 = vcmask 56320   ;;  %vm2184_vm4 = vcmask 1042432  }
  0x28   : > { %v5845_v20 = vld [vmem:[%s6316_s18 + $0x4] ss:$8 sps:$4 sm:$0xff]   ;;  %683 = vperm.xlu1 %5844, %v642_v18   ;;  %v5847_v21 = vld [vmem:[%s6316_s18] ss:$8 sps:$4 sm:$0xff]   ;;  %v5848_v22 = vld [vmem:[%s6316_s18 + $0x14] ss:$8 sps:$4 sm:$0xff]  }
  0x29   : > { %1000 = vmatprep.subr.bf16.mxu0 %v5845_v20  ;;  %v5850_v23 = vld [vmem:[%s6316_s18 + $0x10] ss:$8 sps:$4 sm:$0xff]   ;;  %v5851_v25 = vld [vmem:[%s6316_s18 + $0x24] ss:$8 sps:$4 sm:$0xff]   ;;  %v5853_v26 = vld [vmem:[%s6316_s18 + $0x20] ss:$8 sps:$4 sm:$0xff]  }
  0x2a   : > { %1001 = vmatpush1.bf16.msra.mxu0 %v5847_v21  ;;  %v5854_v27 = vld [vmem:[%s6316_s18 + $0x34] ss:$8 sps:$4 sm:$0xff]   ;;  %v5856_v28 = vld [vmem:[%s6316_s18 + $0x30] ss:$8 sps:$4 sm:$0xff]   ;;  %v5857_v31 = vld [vmem:[%s6316_s18 + $0x44] ss:$8 sps:$4 sm:$0xff]  }
  0x2b   : > { %678 = vperm.xlu0 %5843, %v641_v19   ;;  %1002 = vmatprep.subr.bf16.mxu0 %v5848_v22  ;;  %v5859_v34 = vld [vmem:[%s6316_s18 + $0x40] ss:$8 sps:$4 sm:$0xff]   ;;  %v5860_v35 = vld [vmem:[%s6316_s18 + $0x54] ss:$8 sps:$4 sm:$0xff]   ;;  %v5862_v38 = vld [vmem:[%s6316_s18 + $0x50] ss:$8 sps:$4 sm:$0xff]  }
  0x2c   : > { %688 = vperm.xlu1 %5844, %v643_v29   ;;  %v650_v37 = vld [vmem:[%s8218_s2 + $0x50] sm:$0xff]  ;;  %v5863_v39 = vld [vmem:[%s6316_s18 + $0x64] ss:$8 sps:$4 sm:$0xff]   ;;  %v5865_v42 = vld [vmem:[%s6316_s18 + $0x60] ss:$8 sps:$4 sm:$0xff]   ;;  %vm2185_vm5 = vcmask 1043456  }
  0x2d   : > { %v649_v40 = vld [vmem:[%s8218_s2 + $0x48] sm:$0xff]  ;;  %v652_v41 = vld [vmem:[%s8218_s2 + $0x60] sm:$0xff]  ;;  %v5866_v43 = vld [vmem:[%s6316_s18 + $0x74] ss:$8 sps:$4 sm:$0xff]   ;;  %vm2891_vm6 = vcmask 1044480   ;;  %vm2892_vm7 = vcmask 1045504  }
  0x2e   : > { %1003 = vmatpush1.bf16.msra.mxu0 %v5850_v23  ;;  %v651_v44 = vld [vmem:[%s8218_s2 + $0x58] sm:$0xff]  ;;  %v654_v45 = vld [vmem:[%s8218_s2 + $0x70] sm:$0xff]  ;;  %v653_v47 = vld [vmem:[%s8218_s2 + $0x68] sm:$0xff]  ;;  %vm2854_vm8 = vcmask 613376   ;;  %vm3188_vm9 = vcmask 424960   ;;  %vm3743_vm10 = vcmask 736256  }
  0x2f   : > { %693 = vperm.xlu0 %5843, %v644_v24   ;;  %1004 = vmatprep.subr.bf16.mxu0 %v5851_v25  ;;  %v5868_v46 = vld [vmem:[%s6316_s18 + $0x70] ss:$8 sps:$4 sm:$0xff]   ;;  %v5869_v48 = vld [vmem:[%s8217_s1] sm:$0xff]   ;;  %v5870_v52 = vld [vmem:[%s8217_s1 + $0x8] sm:$0xff]   ;;  %vm4239_vm11 = vcmask 1046528   ;;  %vm4211_vm12 = vcmask 367616  }
  0x30   : > { %698 = vperm.xlu1 %5844, %v645_v32   ;;  %v656_v49 = vld [vmem:[%s8218_s2 + $0x80] sm:$0xff]  ;;  %v655_v50 = vld [vmem:[%s8218_s2 + $0x78] sm:$0xff]  ;;  %v658_v51 = vld [vmem:[%s8218_s2 + $0x90] sm:$0xff]  ;;  %vm4476_vm13 = vcmask 130048   ;;  %vm4933_vm14 = vcmask 588800   ;;  %vm5221_vm15 = vcmask 293888  }
  0x31   : > { %v657_v53 = vld [vmem:[%s8218_s2 + $0x88] sm:$0xff]  ;;  %v660_v54 = vld [vmem:[%s8218_s2 + $0xa0] sm:$0xff]  ;;  %v659_v55 = vld [vmem:[%s8218_s2 + $0x98] sm:$0xff]  ;;  %s5348_s24 = sshll.u32 %s5339_s21, 1 }
  0x32   : > { %1005 = vmatpush1.bf16.msra.mxu0 %v5853_v26  ;;  %v662_v56 = vld [vmem:[%s8218_s2 + $0xb0] sm:$0xff]  ;;  %v661_v57 = vld [vmem:[%s8218_s2 + $0xa8] sm:$0xff]  ;;  %v664_v59 = vld [vmem:[%s8218_s2 + $0xc0] sm:$0xff]  ;;  %p587_p8 = scmp.lt.s32.totalorder %s5348_s24, 3 }
  0x33   : > { %1006 = vmatprep.subr.bf16.mxu0 %v5854_v27  ;;  %703 = vperm.xlu0 %5843, %v646_v30   ;;  %v5871_v58 = vld [vmem:[%s8217_s1 + $0x10] sm:$0xff]   ;;  %v663_v60 = vld [vmem:[%s8218_s2 + $0xb8] sm:$0xff]  ;;  %v665_v62 = vld [vmem:[%s8218_s2 + $0xc8] sm:$0xff] }
  0x34   : > { %708 = vperm.xlu1 %5844, %v647_v36   ;;  %v666_v61 = vld [vmem:[%s8218_s2 + $0xd0] sm:$0xff]  ;;  %v5872_v63 = vld [vmem:[%s8217_s1 + $0x18] sm:$0xff]   ;;  %v668_v0 = vld [vmem:[%s8218_s2 + $0xe0] sm:$0xff]  ;;  %s8286_s24 = smov (!%p587_p8, %s5348_s24), 3 }
  0x35   : > { %v667_v1 = vld [vmem:[%s8218_s2 + $0xd8] sm:$0xff]  ;;  %v670_v2 = vld [vmem:[%s8218_s2 + $0xf0] sm:$0x7]  ;;  %v669_v3 = vld [vmem:[%s8218_s2 + $0xe8] sm:$0xff]  ;;  %s5349_s26 = sshll.u32 %s8286_s24, 2 }
  0x36   : > { %1007 = vmatpush1.bf16.msra.mxu0 %v5856_v28  ;;  %v5873_v4 = vld [vmem:[%s8217_s1 + $0x20] sm:$0xff]   ;;  %v2659_v5 = vld [vmem:[%s8222_s6 + $0x8] sm:$0xff]  ;;  %v2661_v7 = vld [vmem:[%s8222_s6 + $0x18] sm:$0xff]  ;;  %s590_s29 = scalar_lea.vmem %s8231_s15, %s5349_s26 }
  0x37   : > { %1008 = vmatprep.subr.bf16.mxu0 %v5857_v31  ;;  %713 = vperm.xlu0 %5843, %v648_v33   ;;  %v2658_v6 = vld [vmem:[%s8222_s6] sm:$0xff]  ;;  %v2660_v8 = vld [vmem:[%s8222_s6 + $0x10] sm:$0xff]  ;;  %v5874_v9 = vld [vmem:[%s8217_s1 + $0x28] sm:$0xff]  }
  0x38   : > { %718 = vperm.xlu1 %5844, %v649_v40   ;;  %v2663_v10 = vld [vmem:[%s8222_s6 + $0x28] sm:$0xff]  ;;  %v2662_v11 = vld [vmem:[%s8222_s6 + $0x20] sm:$0xff]  ;;  %v2665_v12 = vld [vmem:[%s8222_s6 + $0x38] sm:$0xff] }
  0x39   : > { %v2664_v13 = vld [vmem:[%s8222_s6 + $0x30] sm:$0xff]  ;;  %v2667_v15 = vld [vmem:[%s8222_s6 + $0x48] sm:$0xff]  ;;  %v2666_v16 = vld [vmem:[%s8222_s6 + $0x40] sm:$0xff] }
  0x3a   : > { %1009 = vmatpush1.bf16.msra.mxu0 %v5859_v34  ;;  %v5875_v14 = vld [vmem:[%s8217_s1 + $0x30] sm:$0xff]   ;;  %v2669_v18 = vld [vmem:[%s8222_s6 + $0x58] sm:$0xff]  ;;  %v2671_v21 = vld [vmem:[%s8222_s6 + $0x68] sm:$0xff] }
  0x3b   : > { %1010 = vmatprep.subr.bf16.mxu0 %v5860_v35  ;;  %723 = vperm.xlu0 %5843, %v650_v37   ;;  %v2668_v19 = vld [vmem:[%s8222_s6 + $0x50] sm:$0xff]  ;;  %v5876_v20 = vld [vmem:[%s8217_s1 + $0x38] sm:$0xff]   ;;  %v2670_v22 = vld [vmem:[%s8222_s6 + $0x60] sm:$0xff] }
  0x3c   : > { %728 = vperm.xlu1 %5844, %v651_v44   ;;  %v2673_v23 = vld [vmem:[%s8222_s6 + $0x78] sm:$0xff]  ;;  %v2672_v24 = vld [vmem:[%s8222_s6 + $0x70] sm:$0xff]  ;;  %v5877_v25 = vld [vmem:[%s8217_s1 + $0x40] sm:$0xff]  }
  0x3d   : > { %v2675_v26 = vld [vmem:[%s8222_s6 + $0x88] sm:$0xff]  ;;  %v2674_v27 = vld [vmem:[%s8222_s6 + $0x80] sm:$0xff]  ;;  %v2677_v28 = vld [vmem:[%s8222_s6 + $0x98] sm:$0xff] }
  0x3e   : > { %1011 = vmatpush1.bf16.msra.mxu0 %v5862_v38  ;;  %v2676_v29 = vld [vmem:[%s8222_s6 + $0x90] sm:$0xff]  ;;  %v5878_v30 = vld [vmem:[%s8217_s1 + $0x48] sm:$0xff]   ;;  %v2678_v32 = vld [vmem:[%s8222_s6 + $0xa0] sm:$0xff] }
  0x3f   : > { %1012 = vmatprep.subr.bf16.mxu0 %v5863_v39  ;;  %733 = vperm.xlu0 %5843, %v652_v41   ;;  %v2679_v31 = vld [vmem:[%s8222_s6 + $0xa8] sm:$0xff]  ;;  %v4058_v33 = vld [vmem:[%s8226_s10] sm:$0xff]  ;;  %v2680_v34 = vld [vmem:[%s8222_s6 + $0xb0] sm:$0xf] }
  0x40   : > { %738 = vperm.xlu1 %5844, %v653_v47   ;;  %v5879_v35 = vld [vmem:[%s8217_s1 + $0x50] sm:$0xff]   ;;  %v4059_v37 = vld [vmem:[%s8226_s10 + $0x8] sm:$0xff]  ;;  %v4062_v38 = vld [vmem:[%s8226_s10 + $0x20] sm:$0xff] }
  0x41   : > { %v4060_v36 = vld [vmem:[%s8226_s10 + $0x10] sm:$0xff]  ;;  %v4061_v39 = vld [vmem:[%s8226_s10 + $0x18] sm:$0xff]  ;;  %v4067_v47 = vld [vmem:[%s8226_s10 + $0x48] sm:$0xff] }
  0x42   : > { %1013 = vmatpush1.bf16.msra.mxu0 %v5865_v42  ;;  %v5880_v40 = vld [vmem:[%s8217_s1 + $0x58] sm:$0xff]   ;;  %v4064_v41 = vld [vmem:[%s8226_s10 + $0x30] sm:$0xff]  ;;  %v4063_v42 = vld [vmem:[%s8226_s10 + $0x28] sm:$0xff] }
  0x43   : > { %1014 = vmatprep.subr.bf16.mxu0 %v5866_v43  ;;  %743 = vperm.xlu0 %5843, %v654_v45   ;;  %v4066_v43 = vld [vmem:[%s8226_s10 + $0x40] sm:$0xff]  ;;  %v4065_v44 = vld [vmem:[%s8226_s10 + $0x38] sm:$0xff] }
  0x44   : > { %748 = vperm.xlu1 %5844, %v655_v50   ;;  %v5881_v45 = vld [vmem:[%s8217_s1 + $0x60] sm:$0xff]   ;;  %v5882_v50 = vld [vmem:[%s8217_s1 + $0x68] sm:$0xff]  }
  0x46   : > { %1015 = vmatpush1.bf16.msra.mxu0 %v5868_v46  ;;  %v4068_v46 = vld [vmem:[%s8226_s10 + $0x50] sm:$0xff] }
  0x47   : > { %753 = vperm.xlu0 %5843, %v656_v49   ;;  %v4069_v49 = vld [vmem:[%s8226_s10 + $0x58] sm:$0xff] }
  0x48   : > { %758 = vperm.xlu1 %5844, %v657_v53   ;;  %v4074_v53 = vld [vmem:[%s8226_s10 + $0x80] sm:$0xff] }
  0x49   : > { %1033 = vmatmul.mubr.bf16.vlgmr.msra.gmra.mrb[0].mxu0 %v5869_v48  ;;  %v4070_v48 = vld [vmem:[%s8226_s10 + $0x60] sm:$0xff] }
  0x4a   : > { %1042 = vmatprep.mubr.bf16.mxu0 %v8232_v17 }
  0x4b   : > { %763 = vperm.xlu0 %5843, %v658_v51   ;;  %v4072_v51 = vld [vmem:[%s8226_s10 + $0x70] sm:$0xff] }
  0x4c   : > { %768 = vperm.xlu1 %5844, %v659_v55   ;;  %v5883_v55 = vld [vmem:[%s8217_s1 + $0x70] sm:$0xff]  }
  0x4f   : > { %773 = vperm.xlu0 %5843, %v660_v54   ;;  %v4073_v54 = vld [vmem:[%s8226_s10 + $0x78] sm:$0xff] }
  0x50   : > { %778 = vperm.xlu1 %5844, %v661_v57   ;;  %v4075_v57 = vld [vmem:[%s8226_s10 + $0x88] sm:$0xff] }
  0x51   : > { %1043 = vmatmul.mubr.bf16.gmra.mrb[4].mxu0 %v5870_v52  ;;  %v4071_v52 = vld [vmem:[%s8226_s10 + $0x68] sm:$0xff] }
  0x52   : > { %1052 = vmatprep.mubr.bf16.mxu0 %v8232_v17 }
  0x53   : > { %783 = vperm.xlu0 %5843, %v662_v56   ;;  %v5215_v56 = vld [vmem:[%s8230_s14] sm:$0xf] }
  0x54   : > { %788 = vperm.xlu1 %5844, %v663_v60  }
  0x57   : > { %793 = vperm.xlu0 %5843, %v664_v59  }
  0x58   : > { %798 = vperm.xlu1 %5844, %v665_v62  }
  0x59   : > { %1053 = vmatmul.mubr.bf16.gmra.mrb[8].mxu0 %v5871_v58  ;;  %v5884_v58 = vld [vmem:[%s8217_s1 + $0x78] ss:$0 sps:$4 sm:$0x33]  }
  0x5a   : > { %1062 = vmatprep.mubr.bf16.mxu0 %v8232_v17 }
  0x5b   : > { %803 = vperm.xlu0 %5843, %v666_v61  }
  0x5c   : > { %808 = vperm.xlu1 %5844, %v667_v1  }
  0x5f   : > { %813 = vperm.xlu0 %5843, %v668_v0  }
  0x60   : > { %818 = vperm.xlu1 %5844, %v669_v3  }
  0x61   : > { %1063 = vmatmul.mubr.bf16.gmra.mrb[12].mxu0 %v5872_v63 }
  0x62   : > { %1072 = vmatprep.mubr.bf16.mxu0 %v8232_v17 }
  0x63   : > { %823 = vperm.xlu0 %5843, %v670_v2  }
  0x64   : > { %2683 = vperm.xlu1 %5844, %v2658_v6  }
  0x67   : > { %2688 = vperm.xlu0 %5843, %v2659_v5  }
  0x68   : > { %2693 = vperm.xlu1 %5844, %v2660_v8  }
  0x69   : > { %1073 = vmatmul.mubr.bf16.gmra.mrb[16].mxu0 %v5873_v4  ;;  %v5887_v4 = vld [vmem:[%s8219_s3 + $0x4] ss:$8 sps:$4 sm:$0xff]  }
  0x6a   : > { %1082 = vmatprep.mubr.bf16.mxu0 %v8232_v17  ;;  %5400 = vmatprep.mubr.msk.bf16.mxu1 %vm1380_vm0, %v5887_v4 }
  0x6b   : > { %2698 = vperm.xlu0 %5843, %v2661_v7  }
  0x6c   : > { %2703 = vperm.xlu1 %5844, %v2662_v11  }
  0x6f   : > { %2708 = vperm.xlu0 %5843, %v2663_v10  }
  0x70   : > { %2713 = vperm.xlu1 %5844, %v2664_v13  }
  0x71   : > { %1083 = vmatmul.mubr.bf16.gmra.mrb[20].mxu0 %v5874_v9 }
  0x72   : > { %1092 = vmatprep.mubr.bf16.mxu0 %v8232_v17 }
  0x73   : > { %2718 = vperm.xlu0 %5843, %v2665_v12  }
  0x74   : > { %2723 = vperm.xlu1 %5844, %v2666_v16  }
  0x77   : > { %2728 = vperm.xlu0 %5843, %v2667_v15  }
  0x78   : > { %2733 = vperm.xlu1 %5844, %v2668_v19  }
  0x79   : > { %1093 = vmatmul.mubr.bf16.gmra.mrb[24].mxu0 %v5875_v14 }
  0x7a   : > { %1102 = vmatprep.mubr.bf16.mxu0 %v8232_v17 }
  0x7b   : > { %2738 = vperm.xlu0 %5843, %v2669_v18  }
  0x7c   : > { %2743 = vperm.xlu1 %5844, %v2670_v22  }
  0x7f   : > { %2748 = vperm.xlu0 %5843, %v2671_v21  }
  0x80   : > { %2753 = vperm.xlu1 %5844, %v2672_v24  }
  0x81   : > { %1103 = vmatmul.mubr.bf16.gmra.mrb[28].mxu0 %v5876_v20 }
  0x82   : > { %1112 = vmatprep.mubr.bf16.mxu0 %v8232_v17 }
  0x83   : > { %2758 = vperm.xlu0 %5843, %v2673_v23  }
  0x84   : > { %2763 = vperm.xlu1 %5844, %v2674_v27  }
  0x87   : > { %2768 = vperm.xlu0 %5843, %v2675_v26  }
  0x88   : > { %2773 = vperm.xlu1 %5844, %v2676_v29  }
  0x89   : > { %1113 = vmatmul.mubr.bf16.gmra.mrb[32].mxu0 %v5877_v25 }
  0x8a   : > { %1122 = vmatprep.mubr.bf16.mxu0 %v8232_v17 }
  0x8b   : > { %2778 = vperm.xlu0 %5843, %v2677_v28  }
  0x8c   : > { %2783 = vperm.xlu1 %5844, %v2678_v32  }
  0x8f   : > { %2788 = vperm.xlu0 %5843, %v2679_v31  }
  0x90   : > { %2793 = vperm.xlu1 %5844, %v2680_v34  }
  0x91   : > { %1123 = vmatmul.mubr.bf16.gmra.mrb[36].mxu0 %v5878_v30 }
  0x92   : > { %1132 = vmatprep.mubr.bf16.mxu0 %v8232_v17 }
  0x93   : > { %4078 = vperm.xlu0 %5843, %v4058_v33  }
  0x94   : > { %4083 = vperm.xlu1 %5844, %v4059_v37  }
  0x97   : > { %4088 = vperm.xlu0 %5843, %v4060_v36  }
  0x98   : > { %4093 = vperm.xlu1 %5844, %v4061_v39  }
  0x99   : > { %1133 = vmatmul.mubr.bf16.gmra.mrb[40].mxu0 %v5879_v35 }
  0x9a   : > { %1142 = vmatprep.mubr.bf16.mxu0 %v8232_v17 }
  0x9b   : > { %4098 = vperm.xlu0 %5843, %v4062_v38  }
  0x9c   : > { %4103 = vperm.xlu1 %5844, %v4063_v42  }
  0x9f   : > { %4108 = vperm.xlu0 %5843, %v4064_v41  }
  0xa0   : > { %4113 = vperm.xlu1 %5844, %v4065_v44  }
  0xa1   : > { %1143 = vmatmul.mubr.bf16.gmra.mrb[44].mxu0 %v5880_v40 }
  0xa2   : > { %1152 = vmatprep.mubr.bf16.mxu0 %v8232_v17 }
  0xa3   : > { %4118 = vperm.xlu0 %5843, %v4066_v43  }
  0xa4   : > { %4123 = vperm.xlu1 %5844, %v4067_v47  }
  0xa6   : > { %v674_v59 = vpop.permute.xlu0 %673 }
  0xa7   : > { %4128 = vperm.xlu0 %5843, %v4068_v46   ;;  %v684_v5 = vpop.permute.xlu1 %683 }
  0xa8   : > { %4133 = vperm.xlu1 %5844, %v4069_v49  }
  0xa9   : > { %1153 = vmatmul.mubr.bf16.gmra.mrb[48].mxu0 %v5881_v45 }
  0xaa   : > { %1162 = vmatprep.mubr.bf16.mxu0 %v8232_v17  ;;  %v679_v63 = vpop.permute.xlu0 %678 }
  0xab   : > { %4138 = vperm.xlu0 %5843, %v4070_v48   ;;  %v689_v16 = vpop.permute.xlu1 %688 }
  0xac   : > { %4143 = vperm.xlu1 %5844, %v4071_v52  }
  0xae   : > { %v694_v28 = vpop.permute.xlu0 %693 }
  0xaf   : > { %4148 = vperm.xlu0 %5843, %v4072_v51   ;;  %v699_v33 = vpop.permute.xlu1 %698 }
  0xb0   : > { %4153 = vperm.xlu1 %5844, %v4073_v54  }
  0xb1   : > { %1163 = vmatmul.mubr.bf16.gmra.mrb[52].mxu0 %v5882_v50 }
  0xb2   : > { %1172 = vmatprep.mubr.bf16.mxu0 %v8232_v17  ;;  %v704_v44 = vpop.permute.xlu0 %703 }
  0xb3   : > { %4158 = vperm.xlu0 %5843, %v4074_v53   ;;  %v709_v49 = vpop.permute.xlu1 %708 }
  0xb4   : > { %4163 = vperm.xlu1 %5844, %v4075_v57  }
  0xb7   : > { %5218 = vperm.xlu0 %5843, %v5215_v56  }
  0xb9   : > { %1173 = vmatmul.mubr.bf16.gmra.mrb[56].mxu0 %v5883_v55 }
  0xba   : > { %1182 = vmatprep.mubr.bf16.mxu0 %v8232_v17 }
  0xc1   : > { %1183 = vmatmul.mubr.bf16.gmra.mrb[60].mxu0 %v5884_v58 }
 0x11c   : > { %v1034_v60 = vpop.f32.mrb[0].mxu0 }
 0x11d   : > { %v1035_v61 = vadd.f32 %v1034_v60, %v674_v59  ;;  %v1036_v62 = vpop.f32.mrb[1].mxu0  ;;  %v714_v60 = vpop.permute.xlu0 %713 }
 0x11e   : > { %v1037_v0 = vadd.f32 %v1036_v62, %v674_v59  ;;  %v1038_v1 = vpop.f32.mrb[2].mxu0 }
 0x11f   : > { %v1039_v2 = vadd.f32 %v1038_v1, %v679_v63  ;;  %v1040_v3 = vpop.f32.mrb[3].mxu0  ;;  %v1191_v7 = vmax.f32 %v1035_v61, 0.0  ;;  %v719_v1 = vpop.permute.xlu1 %718 }
 0x120   : > { %v1041_v6 = vadd.f32 %v1040_v3, %v679_v63  ;;  %v1192_v9 = vmax.f32 %v1037_v0, 0.0 }
 0x121   : > { %v1193_v8 = vmax.f32 %v1039_v2, 0.0 }
 0x122   : > { %v1194_v10 = vmax.f32 %v1041_v6, 0.0 }
 0x123   : > { %v6611_v11 = vpack.c.bf16 %v1193_v8, %v1191_v7 }
 0x124   : > { %v1044_v12 = vpop.f32.mrb[4].mxu0  ;;  %v6613_v13 = vpack.c.bf16 %v1194_v10, %v1192_v9 }
 0x125   : > { %v1045_v14 = vadd.f32 %v1044_v12, %v684_v5  ;;  %v1046_v15 = vpop.f32.mrb[5].mxu0 }
 0x126   : > { %v1047_v18 = vadd.f32 %v1046_v15, %v684_v5  ;;  %v1048_v19 = vpop.f32.mrb[6].mxu0  ;;  %1418 = vmatprep.subr.bf16.mxu1 %v6613_v13  ;;  %1940 = vmatprep.subr.bf16.mxu0 %v6613_v13 }
 0x127   : > { %v1049_v20 = vadd.f32 %v1048_v19, %v689_v16  ;;  %v1050_v21 = vpop.f32.mrb[7].mxu0  ;;  %1419 = vmatpush1.bf16.msra.mxu1 %v6611_v11  ;;  %1941 = vmatpush1.bf16.msra.mxu0 %v6611_v11  ;;  %v1195_v23 = vmax.f32 %v1045_v14, 0.0  ;;  %v724_v14 = vpop.permute.xlu0 %723 }
 0x128   : > { %v1051_v22 = vadd.f32 %v1050_v21, %v689_v16  ;;  %v1196_v25 = vmax.f32 %v1047_v18, 0.0 }
 0x129   : > { %v1197_v24 = vmax.f32 %v1049_v20, 0.0  ;;  %v729_v20 = vpop.permute.xlu1 %728 }
 0x12a   : > { %v1198_v26 = vmax.f32 %v1051_v22, 0.0 }
 0x12b   : > { %v6619_v27 = vpack.c.bf16 %v1197_v24, %v1195_v23 }
 0x12c   : > { %v1054_v29 = vpop.f32.mrb[8].mxu0  ;;  %v6621_v30 = vpack.c.bf16 %v1198_v26, %v1196_v25 }
 0x12d   : > { %v1055_v31 = vadd.f32 %v1054_v29, %v694_v28  ;;  %v1056_v32 = vpop.f32.mrb[9].mxu0 }
 0x12e   : > { %v1057_v34 = vadd.f32 %v1056_v32, %v694_v28  ;;  %v1058_v35 = vpop.f32.mrb[10].mxu0  ;;  %1420 = vmatprep.subr.bf16.mxu1 %v6621_v30  ;;  %1942 = vmatprep.subr.bf16.mxu0 %v6621_v30 }
 0x12f   : > { %v1059_v36 = vadd.f32 %v1058_v35, %v699_v33  ;;  %v1060_v37 = vpop.f32.mrb[11].mxu0  ;;  %1421 = vmatpush1.bf16.msra.mxu1 %v6619_v27  ;;  %1943 = vmatpush1.bf16.msra.mxu0 %v6619_v27  ;;  %v1199_v39 = vmax.f32 %v1055_v31, 0.0 }
 0x130   : > { %v1061_v38 = vadd.f32 %v1060_v37, %v699_v33  ;;  %v1200_v41 = vmax.f32 %v1057_v34, 0.0  ;;  %v734_v33 = vpop.permute.xlu0 %733 }
 0x131   : > { %v1201_v40 = vmax.f32 %v1059_v36, 0.0 }
 0x132   : > { %v1202_v42 = vmax.f32 %v1061_v38, 0.0  ;;  %v739_v38 = vpop.permute.xlu1 %738 }
 0x133   : > { %v6627_v43 = vpack.c.bf16 %v1201_v40, %v1199_v39 }
 0x134   : > { %v1064_v45 = vpop.f32.mrb[12].mxu0  ;;  %v6629_v46 = vpack.c.bf16 %v1202_v42, %v1200_v41 }
 0x135   : > { %v1065_v47 = vadd.f32 %v1064_v45, %v704_v44  ;;  %v1066_v48 = vpop.f32.mrb[13].mxu0 }
 0x136   : > { %v1067_v50 = vadd.f32 %v1066_v48, %v704_v44  ;;  %v1068_v51 = vpop.f32.mrb[14].mxu0  ;;  %1422 = vmatprep.subr.bf16.mxu1 %v6629_v46  ;;  %1944 = vmatprep.subr.bf16.mxu0 %v6629_v46 }
 0x137   : > { %v1069_v52 = vadd.f32 %v1068_v51, %v709_v49  ;;  %v1070_v53 = vpop.f32.mrb[15].mxu0  ;;  %1423 = vmatpush1.bf16.msra.mxu1 %v6627_v43  ;;  %1945 = vmatpush1.bf16.msra.mxu0 %v6627_v43  ;;  %v1203_v55 = vmax.f32 %v1065_v47, 0.0  ;;  %v744_v51 = vpop.permute.xlu0 %743 }
 0x138   : > { %v1071_v54 = vadd.f32 %v1070_v53, %v709_v49  ;;  %v1204_v57 = vmax.f32 %v1067_v50, 0.0 }
 0x139   : > { %v1205_v56 = vmax.f32 %v1069_v52, 0.0 }
 0x13a   : > { %v1206_v58 = vmax.f32 %v1071_v54, 0.0 }
 0x13b   : > { %v6635_v59 = vpack.c.bf16 %v1205_v56, %v1203_v55  ;;  %v749_v56 = vpop.permute.xlu1 %748 }
 0x13c   : > { %v1074_v61 = vpop.f32.mrb[16].mxu0  ;;  %v6637_v62 = vpack.c.bf16 %v1206_v58, %v1204_v57 }
 0x13d   : > { %v1075_v63 = vadd.f32 %v1074_v61, %v714_v60  ;;  %v1076_v0 = vpop.f32.mrb[17].mxu0 }
 0x13e   : > { %v1077_v2 = vadd.f32 %v1076_v0, %v714_v60  ;;  %v1078_v3 = vpop.f32.mrb[18].mxu0  ;;  %1424 = vmatprep.subr.bf16.mxu1 %v6637_v62  ;;  %1946 = vmatprep.subr.bf16.mxu0 %v6637_v62 }
 0x13f   : > { %v1079_v4 = vadd.f32 %v1078_v3, %v719_v1  ;;  %v1080_v5 = vpop.f32.mrb[19].mxu0  ;;  %1425 = vmatpush1.bf16.msra.mxu1 %v6635_v59  ;;  %1947 = vmatpush1.bf16.msra.mxu0 %v6635_v59  ;;  %v1207_v7 = vmax.f32 %v1075_v63, 0.0 }
 0x140   : > { %v1081_v6 = vadd.f32 %v1080_v5, %v719_v1  ;;  %v1208_v9 = vmax.f32 %v1077_v2, 0.0  ;;  %v754_v5 = vpop.permute.xlu0 %753 }
 0x141   : > { %v1209_v8 = vmax.f32 %v1079_v4, 0.0 }
 0x142   : > { %v1210_v10 = vmax.f32 %v1081_v6, 0.0 }
 0x143   : > { %v6643_v12 = vpack.c.bf16 %v1209_v8, %v1207_v7 }
 0x144   : > { %v1084_v15 = vpop.f32.mrb[20].mxu0  ;;  %v6645_v16 = vpack.c.bf16 %v1210_v10, %v1208_v9  ;;  %v759_v10 = vpop.permute.xlu1 %758 }
 0x145   : > { %v1085_v18 = vadd.f32 %v1084_v15, %v724_v14  ;;  %v1086_v19 = vpop.f32.mrb[21].mxu0 }
 0x146   : > { %v1087_v21 = vadd.f32 %v1086_v19, %v724_v14  ;;  %v1088_v22 = vpop.f32.mrb[22].mxu0  ;;  %1426 = vmatprep.subr.bf16.mxu1 %v6645_v16  ;;  %1948 = vmatprep.subr.bf16.mxu0 %v6645_v16 }
 0x147   : > { %v1089_v23 = vadd.f32 %v1088_v22, %v729_v20  ;;  %v1090_v24 = vpop.f32.mrb[23].mxu0  ;;  %1427 = vmatpush1.bf16.msra.mxu1 %v6643_v12  ;;  %1949 = vmatpush1.bf16.msra.mxu0 %v6643_v12  ;;  %v1211_v26 = vmax.f32 %v1085_v18, 0.0 }
 0x148   : > { %v1091_v25 = vadd.f32 %v1090_v24, %v729_v20  ;;  %v1212_v29 = vmax.f32 %v1087_v21, 0.0 }
 0x149   : > { %v1213_v28 = vmax.f32 %v1089_v23, 0.0 }
 0x14a   : > { %v1214_v31 = vmax.f32 %v1091_v25, 0.0  ;;  %v5913_v25 = vld [vmem:[%s8219_s3 + $0x114] ss:$8 sps:$4 sm:$0xff]  }
 0x14b   : > { %v6651_v32 = vpack.c.bf16 %v1213_v28, %v1211_v26  ;;  %v764_v28 = vpop.permute.xlu0 %763  ;;  %5488 = vmatprep.mubr.msk.bf16.mxu0 %vm1380_vm0, %v5913_v25 }
 0x14c   : > { %v6653_v34 = vpack.c.bf16 %v1214_v31, %v1212_v29  ;;  %v1094_v35 = vpop.f32.mrb[24].mxu0 }
 0x14d   : > { %v1095_v36 = vadd.f32 %v1094_v35, %v734_v33  ;;  %v1096_v37 = vpop.f32.mrb[25].mxu0 }
 0x14e   : > { %v1097_v39 = vadd.f32 %v1096_v37, %v734_v33  ;;  %v1098_v40 = vpop.f32.mrb[26].mxu0  ;;  %1428 = vmatprep.subr.bf16.mxu1 %v6653_v34  ;;  %1950 = vmatprep.subr.bf16.mxu0 %v6653_v34 }
 0x14f   : > { %v1099_v41 = vadd.f32 %v1098_v40, %v739_v38  ;;  %v1100_v42 = vpop.f32.mrb[27].mxu0  ;;  %1429 = vmatpush1.bf16.msra.mxu1 %v6651_v32  ;;  %1951 = vmatpush1.bf16.msra.mxu0 %v6651_v32  ;;  %v1215_v45 = vmax.f32 %v1095_v36, 0.0  ;;  %v769_v36 = vpop.permute.xlu1 %768 }
 0x150   : > { %v1101_v44 = vadd.f32 %v1100_v42, %v739_v38  ;;  %v1216_v48 = vmax.f32 %v1097_v39, 0.0 }
 0x151   : > { %v1217_v47 = vmax.f32 %v1099_v41, 0.0 }
 0x152   : > { %v1218_v49 = vmax.f32 %v1101_v44, 0.0 }
 0x153   : > { %v6659_v50 = vpack.c.bf16 %v1217_v47, %v1215_v45 }
 0x154   : > { %v6661_v52 = vpack.c.bf16 %v1218_v49, %v1216_v48  ;;  %v1104_v53 = vpop.f32.mrb[28].mxu0  ;;  %v774_v49 = vpop.permute.xlu0 %773 }
 0x155   : > { %v1105_v54 = vadd.f32 %v1104_v53, %v744_v51  ;;  %v1106_v55 = vpop.f32.mrb[29].mxu0 }
 0x156   : > { %v1107_v57 = vadd.f32 %v1106_v55, %v744_v51  ;;  %v1108_v58 = vpop.f32.mrb[30].mxu0  ;;  %1430 = vmatprep.subr.bf16.mxu1 %v6661_v52  ;;  %1952 = vmatprep.subr.bf16.mxu0 %v6661_v52 }
 0x157   : > { %v1109_v60 = vadd.f32 %v1108_v58, %v749_v56  ;;  %v1110_v61 = vpop.f32.mrb[31].mxu0  ;;  %1431 = vmatpush1.bf16.msra.mxu1 %v6659_v50  ;;  %1953 = vmatpush1.bf16.msra.mxu0 %v6659_v50  ;;  %v1219_v0 = vmax.f32 %v1105_v54, 0.0 }
 0x158   : > { %v1111_v63 = vadd.f32 %v1110_v61, %v749_v56  ;;  %v1220_v2 = vmax.f32 %v1107_v57, 0.0  ;;  %v779_v56 = vpop.permute.xlu1 %778 }
 0x159   : > { %v1221_v1 = vmax.f32 %v1109_v60, 0.0 }
 0x15a   : > { %v1222_v3 = vmax.f32 %v1111_v63, 0.0 }
 0x15b   : > { %v6667_v4 = vpack.c.bf16 %v1221_v1, %v1219_v0 }
 0x15c   : > { %v6669_v6 = vpack.c.bf16 %v1222_v3, %v1220_v2  ;;  %v1114_v7 = vpop.f32.mrb[32].mxu0 }
 0x15d   : > { %v1115_v8 = vadd.f32 %v1114_v7, %v754_v5  ;;  %v1116_v9 = vpop.f32.mrb[33].mxu0  ;;  %v784_v7 = vpop.permute.xlu0 %783 }
 0x15e   : > { %v1117_v14 = vadd.f32 %v1116_v9, %v754_v5  ;;  %v1118_v15 = vpop.f32.mrb[34].mxu0  ;;  %1432 = vmatprep.subr.bf16.mxu1 %v6669_v6  ;;  %1954 = vmatprep.subr.bf16.mxu0 %v6669_v6 }
 0x15f   : > { %v1119_v18 = vadd.f32 %v1118_v15, %v759_v10  ;;  %v1120_v19 = vpop.f32.mrb[35].mxu0  ;;  %1433 = vmatpush1.bf16.msra.mxu1 %v6667_v4  ;;  %1955 = vmatpush1.bf16.msra.mxu0 %v6667_v4  ;;  %v1223_v21 = vmax.f32 %v1115_v8, 0.0  ;;  %v789_v15 = vpop.permute.xlu1 %788 }
 0x160   : > { %v1121_v20 = vadd.f32 %v1120_v19, %v759_v10  ;;  %v1224_v23 = vmax.f32 %v1117_v14, 0.0 }
 0x161   : > { %v1225_v22 = vmax.f32 %v1119_v18, 0.0 }
 0x162   : > { %v1226_v24 = vmax.f32 %v1121_v20, 0.0 }
 0x163   : > { %v6678_v26 = vpack.c.bf16 %v1225_v22, %v1223_v21 }
 0x164   : > { %v6680_v29 = vpack.c.bf16 %v1226_v24, %v1224_v23  ;;  %v1124_v31 = vpop.f32.mrb[36].mxu0 }
 0x165   : > { %v1125_v33 = vadd.f32 %v1124_v31, %v764_v28  ;;  %v1126_v35 = vpop.f32.mrb[37].mxu0 }
 0x166   : > { %v1127_v37 = vadd.f32 %v1126_v35, %v764_v28  ;;  %v1128_v38 = vpop.f32.mrb[38].mxu0  ;;  %1434 = vmatprep.subr.bf16.mxu1 %v6680_v29  ;;  %1956 = vmatprep.subr.bf16.mxu0 %v6680_v29 }
 0x167   : > { %v1129_v39 = vadd.f32 %v1128_v38, %v769_v36  ;;  %v1130_v40 = vpop.f32.mrb[39].mxu0  ;;  %1435 = vmatpush1.bf16.msra.mxu1 %v6678_v26  ;;  %1957 = vmatpush1.bf16.msra.mxu0 %v6678_v26  ;;  %v1227_v42 = vmax.f32 %v1125_v33, 0.0  ;;  %v794_v33 = vpop.permute.xlu0 %793 }
 0x168   : > { %v1131_v41 = vadd.f32 %v1130_v40, %v769_v36  ;;  %v1228_v45 = vmax.f32 %v1127_v37, 0.0 }
 0x169   : > { %v1229_v44 = vmax.f32 %v1129_v39, 0.0  ;;  %v799_v39 = vpop.permute.xlu1 %798 }
 0x16a   : > { %v1230_v47 = vmax.f32 %v1131_v41, 0.0 }
 0x16b   : > { %v6687_v48 = vpack.c.bf16 %v1229_v44, %v1227_v42 }
 0x16c   : > { %v6689_v51 = vpack.c.bf16 %v1230_v47, %v1228_v45  ;;  %v1134_v53 = vpop.f32.mrb[40].mxu0 }
 0x16d   : > { %v1135_v54 = vadd.f32 %v1134_v53, %v774_v49  ;;  %v1136_v55 = vpop.f32.mrb[41].mxu0 }
 0x16e   : > { %v1137_v57 = vadd.f32 %v1136_v55, %v774_v49  ;;  %v1138_v58 = vpop.f32.mrb[42].mxu0  ;;  %1436 = vmatprep.subr.bf16.mxu1 %v6689_v51  ;;  %1958 = vmatprep.subr.bf16.mxu0 %v6689_v51 }
 0x16f   : > { %v1139_v60 = vadd.f32 %v1138_v58, %v779_v56  ;;  %v1140_v61 = vpop.f32.mrb[43].mxu0  ;;  %1437 = vmatpush1.bf16.msra.mxu1 %v6687_v48  ;;  %1959 = vmatpush1.bf16.msra.mxu0 %v6687_v48  ;;  %v1231_v0 = vmax.f32 %v1135_v54, 0.0 }
 0x170   : > { %v1141_v63 = vadd.f32 %v1140_v61, %v779_v56  ;;  %v1232_v2 = vmax.f32 %v1137_v57, 0.0  ;;  %v804_v56 = vpop.permute.xlu0 %803 }
 0x171   : > { %v1233_v1 = vmax.f32 %v1139_v60, 0.0 }
 0x172   : > { %v1234_v3 = vmax.f32 %v1141_v63, 0.0  ;;  %v809_v63 = vpop.permute.xlu1 %808 }
 0x173   : > { %v6695_v5 = vpack.c.bf16 %v1233_v1, %v1231_v0 }
 0x174   : > { %v6697_v8 = vpack.c.bf16 %v1234_v3, %v1232_v2  ;;  %v1144_v9 = vpop.f32.mrb[44].mxu0 }
 0x175   : > { %v1145_v10 = vadd.f32 %v1144_v9, %v784_v7  ;;  %v1146_v14 = vpop.f32.mrb[45].mxu0 }
 0x176   : > { %v1147_v18 = vadd.f32 %v1146_v14, %v784_v7  ;;  %v1148_v19 = vpop.f32.mrb[46].mxu0  ;;  %1438 = vmatprep.subr.bf16.mxu1 %v6697_v8  ;;  %1960 = vmatprep.subr.bf16.mxu0 %v6697_v8 }
 0x177   : > { %v1149_v20 = vadd.f32 %v1148_v19, %v789_v15  ;;  %v1150_v21 = vpop.f32.mrb[47].mxu0  ;;  %1439 = vmatpush1.bf16.msra.mxu1 %v6695_v5  ;;  %1961 = vmatpush1.bf16.msra.mxu0 %v6695_v5  ;;  %v1235_v23 = vmax.f32 %v1145_v10, 0.0  ;;  %v814_v19 = vpop.permute.xlu0 %813 }
 0x178   : > { %v1151_v22 = vadd.f32 %v1150_v21, %v789_v15  ;;  %v1236_v25 = vmax.f32 %v1147_v18, 0.0 }
 0x179   : > { %v1237_v24 = vmax.f32 %v1149_v20, 0.0 }
 0x17a   : > { %v1238_v28 = vmax.f32 %v1151_v22, 0.0 }
 0x17b   : > { %v6703_v31 = vpack.c.bf16 %v1237_v24, %v1235_v23  ;;  %v819_v24 = vpop.permute.xlu1 %818 }
 0x17c   : > { %v6705_v35 = vpack.c.bf16 %v1238_v28, %v1236_v25  ;;  %v1154_v36 = vpop.f32.mrb[48].mxu0 }
 0x17d   : > { %v1155_v37 = vadd.f32 %v1154_v36, %v794_v33  ;;  %v1156_v38 = vpop.f32.mrb[49].mxu0 }
 0x17e   : > { %v1157_v40 = vadd.f32 %v1156_v38, %v794_v33  ;;  %v1158_v41 = vpop.f32.mrb[50].mxu0  ;;  %1440 = vmatprep.subr.bf16.mxu1 %v6705_v35  ;;  %1962 = vmatprep.subr.bf16.mxu0 %v6705_v35 }
 0x17f   : > { %v1159_v42 = vadd.f32 %v1158_v41, %v799_v39  ;;  %v1160_v44 = vpop.f32.mrb[51].mxu0  ;;  %1441 = vmatpush1.bf16.msra.mxu1 %v6703_v31  ;;  %1963 = vmatpush1.bf16.msra.mxu0 %v6703_v31  ;;  %v1239_v47 = vmax.f32 %v1155_v37, 0.0 }
 0x180   : > { %v1161_v45 = vadd.f32 %v1160_v44, %v799_v39  ;;  %v1240_v53 = vmax.f32 %v1157_v40, 0.0  ;;  %v824_v44 = vpop.permute.xlu0 %823 }
 0x181   : > { %v1241_v49 = vmax.f32 %v1159_v42, 0.0 }
 0x182   : > { %v1242_v54 = vmax.f32 %v1161_v45, 0.0 }
 0x183   : > { %v6711_v55 = vpack.c.bf16 %v1241_v49, %v1239_v47 }
 0x184   : > { %v6713_v57 = vpack.c.bf16 %v1242_v54, %v1240_v53  ;;  %v1164_v58 = vpop.f32.mrb[52].mxu0  ;;  %v8234_v54 = vmov 65535  }
 0x185   : > { %v1165_v60 = vadd.f32 %v1164_v58, %v804_v56  ;;  %v1166_v61 = vpop.f32.mrb[53].mxu0 }
 0x186   : > { %v1167_v0 = vadd.f32 %v1166_v61, %v804_v56  ;;  %v1168_v1 = vpop.f32.mrb[54].mxu0  ;;  %1442 = vmatprep.subr.bf16.mxu1 %v6713_v57  ;;  %1964 = vmatprep.subr.bf16.mxu0 %v6713_v57  ;;  %v1410_v56 = vsel %vm1408_vm1, 4294967295, %v8234_v54 }
 0x187   : > { %v1169_v2 = vadd.f32 %v1168_v1, %v809_v63  ;;  %v1170_v3 = vpop.f32.mrb[55].mxu0  ;;  %1443 = vmatpush1.bf16.msra.mxu1 %v6711_v55  ;;  %1965 = vmatpush1.bf16.msra.mxu0 %v6711_v55  ;;  %v1243_v9 = vmax.f32 %v1165_v60, 0.0 }
 0x188   : > { %v1171_v7 = vadd.f32 %v1170_v3, %v809_v63  ;;  %v1244_v14 = vmax.f32 %v1167_v0, 0.0 }
 0x189   : > { %v1245_v10 = vmax.f32 %v1169_v2, 0.0  ;;  %v1411_v2 = vsel %vm1409_vm2, %v1410_v56, 0  ;;  %v5425_v56 = vld [vmem:[%s8219_s3 + $0x108] sm:$0xff] }
 0x18a   : > { %v1246_v15 = vmax.f32 %v1171_v7, 0.0 }
 0x18b   : > { %v6719_v18 = vpack.c.bf16 %v1245_v10, %v1243_v9  ;;  %v5885_v10 = vld [vmem:[%s8219_s3] ss:$8 sps:$4 sm:$0xff]  }
 0x18c   : > { %v6721_v20 = vpack.c.bf16 %v1246_v15, %v1244_v14  ;;  %v1174_v21 = vpop.f32.mrb[56].mxu0  ;;  %v5911_v14 = vld [vmem:[%s8219_s3 + $0x110] ss:$8 sps:$4 sm:$0xff]   ;;  %v5888_v15 = vld [vmem:[%s8219_s3 + $0x14] ss:$8 sps:$4 sm:$0xff]  }
 0x18d   : > { %v1175_v22 = vadd.f32 %v1174_v21, %v814_v19  ;;  %v1176_v23 = vpop.f32.mrb[57].mxu0  ;;  %v5890_v21 = vld [vmem:[%s8219_s3 + $0x10] ss:$8 sps:$4 sm:$0xff]  }
 0x18e   : > { %v1177_v25 = vadd.f32 %v1176_v23, %v814_v19  ;;  %v1178_v28 = vpop.f32.mrb[58].mxu0  ;;  %1444 = vmatprep.subr.bf16.mxu1 %v6721_v20  ;;  %1966 = vmatprep.subr.bf16.mxu0 %v6721_v20  ;;  %v5917_v19 = vld [vmem:[%s8219_s3 + $0x124] ss:$8 sps:$4 sm:$0xff]  }
 0x18f   : > { %v1179_v33 = vadd.f32 %v1178_v28, %v819_v24  ;;  %v1180_v36 = vpop.f32.mrb[59].mxu0  ;;  %1445 = vmatpush1.bf16.msra.mxu1 %v6719_v18  ;;  %1967 = vmatpush1.bf16.msra.mxu0 %v6719_v18  ;;  %v1247_v38 = vmax.f32 %v1175_v22, 0.0  ;;  %v5908_v22 = vld [vmem:[%s8219_s3 + $0x70] ss:$8 sps:$4 sm:$0xff]  }
 0x190   : > { %v1181_v37 = vadd.f32 %v1180_v36, %v819_v24  ;;  %v1248_v40 = vmax.f32 %v1177_v25, 0.0  ;;  %v5914_v28 = vld [vmem:[%s8219_s3 + $0x88] ss:$8 sps:$4 sm:$0xff]   ;;  %v5922_v36 = vld [vmem:[%s8219_s3 + $0x98] ss:$8 sps:$4 sm:$0xff]  }
 0x191   : > { %v1249_v39 = vmax.f32 %v1179_v33, 0.0  ;;  %v5919_v33 = vld [vmem:[%s8219_s3 + $0x9c] ss:$8 sps:$4 sm:$0xff]  }
 0x192   : > { %v1250_v41 = vmax.f32 %v1181_v37, 0.0  ;;  %v5925_v37 = vld [vmem:[%s8219_s3 + $0xac] ss:$8 sps:$4 sm:$0xff]  }
 0x193   : > { %v6727_v42 = vpack.c.bf16 %v1249_v39, %v1247_v38  ;;  %v5928_v38 = vld [vmem:[%s8219_s3 + $0xa8] ss:$8 sps:$4 sm:$0xff]   ;;  %v5931_v39 = vld [vmem:[%s8219_s3 + $0xbc] ss:$8 sps:$4 sm:$0xff]  }
 0x194   : > { %v6729_v45 = vpack.c.bf16 %v1250_v41, %v1248_v40  ;;  %v1184_v47 = vpop.f32.mrb[60].mxu0  ;;  %v5934_v40 = vld [vmem:[%s8219_s3 + $0xb8] ss:$8 sps:$4 sm:$0xff]   ;;  %v5937_v41 = vld [vmem:[%s8219_s3 + $0xcc] ss:$8 sps:$4 sm:$0xff]  }
 0x195   : > { %v1185_v49 = vadd.f32 %v1184_v47, %v824_v44  ;;  %v1186_v53 = vpop.f32.mrb[61].mxu0  ;;  %v5949_v47 = vld [vmem:[%s8219_s3 + $0xec] ss:$8 sps:$4 sm:$0xff]  }
 0x196   : > { %v1187_v58 = vadd.f32 %v1186_v53, %v824_v44  ;;  %v1188_v60 = vpop.f32.mrb[62].mxu0  ;;  %1446 = vmatprep.subr.bf16.mxu1 %v6729_v45  ;;  %1968 = vmatprep.subr.bf16.mxu0 %v6729_v45  ;;  %v5943_v44 = vld [vmem:[%s8219_s3 + $0xdc] ss:$8 sps:$4 sm:$0xff]  }
 0x197   : > { %v1251_v61 = vmax.f32 %v1185_v49, 0.0  ;;  %v1189_v63 = vpop.f32.mrb[63].mxu0  ;;  %1447 = vmatpush1.bf16.msra.mxu1 %v6727_v42  ;;  %1969 = vmatpush1.bf16.msra.mxu0 %v6727_v42  ;;  %v5952_v49 = vld [vmem:[%s8219_s3 + $0xe8] ss:$8 sps:$4 sm:$0xff]   ;;  %v5955_v53 = vld [vmem:[%s8219_s3 + $0xfc] ss:$8 sps:$4 sm:$0xff]   ;;  %v5443_v60 = vcombine.high %v5425_v56, %v5425_v56 }
 0x198   : > { %v1252_v0 = vmax.f32 %v1187_v58, 0.0  ;;  %v5958_v58 = vld [vmem:[%s8219_s3 + $0xf8] ss:$8 sps:$4 sm:$0xff]  }
 0x199   : > { %v1283_v1 = vpack.c.bf16 %v1251_v61, %v1251_v61  ;;  %v5442_v61 = vcombine.low %v5425_v56, %v5425_v56 }
 0x19a   : > { %v1284_v3 = vpack.c.bf16 %v1252_v0, %v1252_v0 }
 0x19b   : > { %v6739_v9 = vand.u32 %v1411_v2, %v1283_v1 }
 0x19c   : > { %v6737_v7 = vand.u32 %v1411_v2, %v1284_v3 }
 0x19e   : > { %1448 = vmatprep.subr.bf16.mxu1 %v6737_v7  ;;  %1970 = vmatprep.subr.bf16.mxu0 %v6737_v7 }
 0x19f   : > { %1449 = vmatpush1.bf16.msra.mxu1 %v6739_v9  ;;  %1971 = vmatpush1.bf16.msra.mxu0 %v6739_v9 }
 0x1a0   : > { %1662 = vmatprep.subr.bf16.mxu1 %v6613_v13  ;;  %v5921_v13 = vld [vmem:[%s8219_s3 + $0x120] ss:$8 sps:$4 sm:$0xff]  }
 0x1a2   : > { %1451 = vmatmul.mubr.bf16.vlgmr.msra.gmra.mrb[0].mxu1 %v5885_v10  ;;  %1973 = vmatmul.mubr.bf16.vlgmr.msra.gmra.mrb[64].mxu0 %v5911_v14 }
 0x1a3   : > { %1663 = vmatpush1.bf16.msra.mxu1 %v6611_v11  ;;  %5401 = vmatprep.mubr.msk.bf16.mxu1 %vm1380_vm0, %v5888_v15  ;;  %v5891_v11 = vld [vmem:[%s8219_s3 + $0x24] ss:$8 sps:$4 sm:$0xff]  }
 0x1a4   : > { %1664 = vmatprep.subr.bf16.mxu1 %v6621_v30  ;;  %5489 = vmatprep.mubr.msk.bf16.mxu0 %vm1380_vm0, %v5917_v19  ;;  %v5923_v30 = vld [vmem:[%s8219_s3 + $0x134] ss:$8 sps:$4 sm:$0xff]  }
 0x1a7   : > { %1665 = vmatpush1.bf16.msra.mxu1 %v6619_v27  ;;  %v5893_v27 = vld [vmem:[%s8219_s3 + $0x20] ss:$8 sps:$4 sm:$0xff]  }
 0x1a8   : > { %1666 = vmatprep.subr.bf16.mxu1 %v6629_v46  ;;  %v5927_v46 = vld [vmem:[%s8219_s3 + $0x130] ss:$8 sps:$4 sm:$0xff]  }
 0x1aa   : > { %1461 = vmatmul.mubr.bf16.gmra.mrb[4].mxu1 %v5890_v21  ;;  %1983 = vmatmul.mubr.bf16.gmra.mrb[68].mxu0 %v5921_v13 }
 0x1ab   : > { %1667 = vmatpush1.bf16.msra.mxu1 %v6627_v43  ;;  %5402 = vmatprep.mubr.msk.bf16.mxu1 %vm1380_vm0, %v5891_v11  ;;  %v5894_v43 = vld [vmem:[%s8219_s3 + $0x34] ss:$8 sps:$4 sm:$0xff]  }
 0x1ac   : > { %1668 = vmatprep.subr.bf16.mxu1 %v6637_v62  ;;  %5490 = vmatprep.mubr.msk.bf16.mxu0 %vm1380_vm0, %v5923_v30  ;;  %v5929_v62 = vld [vmem:[%s8219_s3 + $0x144] ss:$8 sps:$4 sm:$0xff]  }
 0x1af   : > { %1669 = vmatpush1.bf16.msra.mxu1 %v6635_v59  ;;  %v5896_v59 = vld [vmem:[%s8219_s3 + $0x30] ss:$8 sps:$4 sm:$0xff]  }
 0x1b0   : > { %1670 = vmatprep.subr.bf16.mxu1 %v6645_v16  ;;  %v5933_v16 = vld [vmem:[%s8219_s3 + $0x140] ss:$8 sps:$4 sm:$0xff]  }
 0x1b2   : > { %1471 = vmatmul.mubr.bf16.gmra.mrb[8].mxu1 %v5893_v27  ;;  %1993 = vmatmul.mubr.bf16.gmra.mrb[72].mxu0 %v5927_v46 }
 0x1b3   : > { %1671 = vmatpush1.bf16.msra.mxu1 %v6643_v12  ;;  %5403 = vmatprep.mubr.msk.bf16.mxu1 %vm1380_vm0, %v5894_v43  ;;  %v5897_v12 = vld [vmem:[%s8219_s3 + $0x44] ss:$8 sps:$4 sm:$0xff]  }
 0x1b4   : > { %1672 = vmatprep.subr.bf16.mxu1 %v6653_v34  ;;  %5491 = vmatprep.mubr.msk.bf16.mxu0 %vm1380_vm0, %v5929_v62  ;;  %v5935_v34 = vld [vmem:[%s8219_s3 + $0x154] ss:$8 sps:$4 sm:$0xff]  }
 0x1b7   : > { %1673 = vmatpush1.bf16.msra.mxu1 %v6651_v32  ;;  %v5899_v32 = vld [vmem:[%s8219_s3 + $0x40] ss:$8 sps:$4 sm:$0xff]  }
 0x1b8   : > { %1674 = vmatprep.subr.bf16.mxu1 %v6661_v52  ;;  %v5939_v52 = vld [vmem:[%s8219_s3 + $0x150] ss:$8 sps:$4 sm:$0xff]  }
 0x1ba   : > { %1481 = vmatmul.mubr.bf16.gmra.mrb[12].mxu1 %v5896_v59  ;;  %2003 = vmatmul.mubr.bf16.gmra.mrb[76].mxu0 %v5933_v16 }
 0x1bb   : > { %1675 = vmatpush1.bf16.msra.mxu1 %v6659_v50  ;;  %5404 = vmatprep.mubr.msk.bf16.mxu1 %vm1380_vm0, %v5897_v12  ;;  %v5900_v50 = vld [vmem:[%s8219_s3 + $0x54] ss:$8 sps:$4 sm:$0xff]  }
 0x1bc   : > { %1676 = vmatprep.subr.bf16.mxu1 %v6669_v6  ;;  %5492 = vmatprep.mubr.msk.bf16.mxu0 %vm1380_vm0, %v5935_v34  ;;  %v5941_v6 = vld [vmem:[%s8219_s3 + $0x164] ss:$8 sps:$4 sm:$0xff]  }
 0x1bf   : > { %1677 = vmatpush1.bf16.msra.mxu1 %v6667_v4  ;;  %v5902_v4 = vld [vmem:[%s8219_s3 + $0x50] ss:$8 sps:$4 sm:$0xff]  }
 0x1c0   : > { %1678 = vmatprep.subr.bf16.mxu1 %v6680_v29  ;;  %v5945_v29 = vld [vmem:[%s8219_s3 + $0x160] ss:$8 sps:$4 sm:$0xff]  }
 0x1c2   : > { %1491 = vmatmul.mubr.bf16.gmra.mrb[16].mxu1 %v5899_v32  ;;  %2013 = vmatmul.mubr.bf16.gmra.mrb[80].mxu0 %v5939_v52  ;;  %v5965_v52 = vld [vmem:[%s8220_s4 + $0x4] ss:$8 sps:$4 sm:$0xff]  }
 0x1c3   : > { %1679 = vmatpush1.bf16.msra.mxu1 %v6678_v26  ;;  %5405 = vmatprep.mubr.msk.bf16.mxu1 %vm1380_vm0, %v5900_v50  ;;  %v5903_v26 = vld [vmem:[%s8219_s3 + $0x64] ss:$8 sps:$4 sm:$0xff]   ;;  %v5968_v50 = vld [vmem:[%s8220_s4 + $0x54] ss:$8 sps:$4 sm:$0xff]  }
 0x1c4   : > { %1680 = vmatprep.subr.bf16.mxu1 %v6689_v51  ;;  %5493 = vmatprep.mubr.msk.bf16.mxu0 %vm1380_vm0, %v5941_v6  ;;  %v5947_v51 = vld [vmem:[%s8219_s3 + $0x174] ss:$8 sps:$4 sm:$0xff]  }
 0x1c7   : > { %1681 = vmatpush1.bf16.msra.mxu1 %v6687_v48  ;;  %v5905_v48 = vld [vmem:[%s8219_s3 + $0x60] ss:$8 sps:$4 sm:$0xff]  }
 0x1c8   : > { %1682 = vmatprep.subr.bf16.mxu1 %v6697_v8  ;;  %v5951_v8 = vld [vmem:[%s8219_s3 + $0x170] ss:$8 sps:$4 sm:$0xff]  }
 0x1ca   : > { %1501 = vmatmul.mubr.bf16.gmra.mrb[20].mxu1 %v5902_v4  ;;  %2023 = vmatmul.mubr.bf16.gmra.mrb[84].mxu0 %v5945_v29 }
 0x1cb   : > { %1683 = vmatpush1.bf16.msra.mxu1 %v6695_v5  ;;  %5406 = vmatprep.mubr.msk.bf16.mxu1 %vm1380_vm0, %v5903_v26  ;;  %v5906_v5 = vld [vmem:[%s8219_s3 + $0x74] ss:$8 sps:$4 sm:$0xff]  }
 0x1cc   : > { %1684 = vmatprep.subr.bf16.mxu1 %v6705_v35  ;;  %5494 = vmatprep.mubr.msk.bf16.mxu0 %vm1380_vm0, %v5947_v51  ;;  %v5953_v35 = vld [vmem:[%s8219_s3 + $0x184] ss:$8 sps:$4 sm:$0xff]  }
 0x1cf   : > { %1685 = vmatpush1.bf16.msra.mxu1 %v6703_v31  ;;  %v1301_v31 = vld [vmem:[%s8219_s3 + $0x80] sm:$0xff] }
 0x1d0   : > { %1686 = vmatprep.subr.bf16.mxu1 %v6713_v57  ;;  %v5469_v57 = vld [vmem:[%s8219_s3 + $0x190] sm:$0xff]  ;;  %v5398_v24 = vcombine.low %v1301_v31, %v1301_v31 }
 0x1d1   : > { %v5487_v23 = vcombine.high %v5469_v57, %v5469_v57  ;;  %v5486_v25 = vcombine.low %v5469_v57, %v5469_v57 }
 0x1d2   : > { %1511 = vmatmul.mubr.bf16.gmra.mrb[24].mxu1 %v5905_v48  ;;  %2033 = vmatmul.mubr.bf16.gmra.mrb[88].mxu0 %v5951_v8 }
 0x1d3   : > { %1687 = vmatpush1.bf16.msra.mxu1 %v6711_v55  ;;  %5407 = vmatprep.mubr.msk.bf16.mxu1 %vm1380_vm0, %v5906_v5  ;;  %v5957_v55 = vld [vmem:[%s8219_s3 + $0x180] ss:$8 sps:$4 sm:$0xff]  }
 0x1d4   : > { %1688 = vmatprep.subr.bf16.mxu1 %v6721_v20  ;;  %5495 = vmatprep.mubr.msk.bf16.mxu0 %vm1380_vm0, %v5953_v35  ;;  %v5399_v20 = vcombine.high %v1301_v31, %v1301_v31 }
 0x1d7   : > { %1689 = vmatpush1.bf16.msra.mxu1 %v6719_v18  ;;  %v5916_v18 = vld [vmem:[%s8219_s3 + $0x8c] ss:$8 sps:$4 sm:$0xff]  }
 0x1d8   : > { %1690 = vmatprep.subr.bf16.mxu1 %v6729_v45  ;;  %v5946_v45 = vld [vmem:[%s8219_s3 + $0xd8] ss:$8 sps:$4 sm:$0xff]  }
 0x1da   : > { %1521 = vmatmul.mubr.bf16.gmra.mrb[28].mxu1 %v5908_v22  ;;  %2043 = vmatmul.mubr.bf16.gmra.mrb[92].mxu0 %v5957_v55 }
 0x1db   : > { %1691 = vmatpush1.bf16.msra.mxu1 %v6727_v42  ;;  %5408 = vmatprep.mubr.msk.bf16.mxu1 %vm1380_vm0, %v5399_v20  ;;  %v5940_v42 = vld [vmem:[%s8219_s3 + $0xc8] ss:$8 sps:$4 sm:$0xff]  }
 0x1dc   : > { %1692 = vmatprep.subr.bf16.mxu1 %v6737_v7  ;;  %5496 = vmatprep.mubr.msk.bf16.mxu0 %vm1380_vm0, %v5487_v23 }
 0x1df   : > { %1693 = vmatpush1.bf16.msra.mxu1 %v6739_v9 }
 0x1e2   : > { %1531 = vmatmul.mubr.bf16.gmra.mrb[32].mxu1 %v5398_v24  ;;  %2053 = vmatmul.mubr.bf16.gmra.mrb[96].mxu0 %v5486_v25 }
 0x1e3   : > { %5444 = vmatprep.mubr.msk.bf16.mxu1 %vm1380_vm0, %v5916_v18  ;;  %5532 = vmatprep.mubr.msk.bf16.mxu0 %vm2168_vm3, %v5968_v50 }
 0x1ea   : > { %1695 = vmatmul.mubr.bf16.vlgmr.msra.gmra.mrb[36].mxu1 %v5914_v28 }
 0x1eb   : > { %5445 = vmatprep.mubr.msk.bf16.mxu1 %vm1380_vm0, %v5919_v33 }
 0x1f2   : > { %1705 = vmatmul.mubr.bf16.gmra.mrb[40].mxu1 %v5922_v36 }
 0x1f3   : > { %5446 = vmatprep.mubr.msk.bf16.mxu1 %vm1380_vm0, %v5925_v37 }
 0x1fa   : > { %1715 = vmatmul.mubr.bf16.gmra.mrb[44].mxu1 %v5928_v38 }
 0x1fb   : > { %5447 = vmatprep.mubr.msk.bf16.mxu1 %vm1380_vm0, %v5931_v39 }
 0x202   : > { %1725 = vmatmul.mubr.bf16.gmra.mrb[48].mxu1 %v5934_v40 }
 0x203   : > { %5448 = vmatprep.mubr.msk.bf16.mxu1 %vm1380_vm0, %v5937_v41 }
 0x20a   : > { %1735 = vmatmul.mubr.bf16.gmra.mrb[52].mxu1 %v5940_v42 }
 0x20b   : > { %5449 = vmatprep.mubr.msk.bf16.mxu1 %vm1380_vm0, %v5943_v44 }
 0x212   : > { %1745 = vmatmul.mubr.bf16.gmra.mrb[56].mxu1 %v5946_v45 }
 0x213   : > { %5450 = vmatprep.mubr.msk.bf16.mxu1 %vm1380_vm0, %v5949_v47 }
 0x21a   : > { %1755 = vmatmul.mubr.bf16.gmra.mrb[60].mxu1 %v5952_v49 }
 0x21b   : > { %5451 = vmatprep.mubr.msk.bf16.mxu1 %vm1380_vm0, %v5955_v53 }
 0x222   : > { %1765 = vmatmul.mubr.bf16.gmra.mrb[64].mxu1 %v5958_v58 }
 0x223   : > { %5452 = vmatprep.mubr.msk.bf16.mxu1 %vm1380_vm0, %v5443_v60 }
 0x22a   : > { %1775 = vmatmul.mubr.bf16.gmra.mrb[68].mxu1 %v5442_v61 }
 0x22b   : > { %5507 = vmatprep.mubr.msk.bf16.mxu1 %vm2168_vm3, %v5965_v52 }
 0x275   : > { %v6949_v63 = vpop.f32.mrb[0].mxu1  ;;  %v6951_v0 = vpop.f32.mrb[64].mxu0 }
 0x276   : > { %v6953_v1 = vpop.f32.mrb[1].mxu1  ;;  %v6955_v2 = vpop.f32.mrb[65].mxu0 }
 0x277   : > { %v6957_v3 = vpop.f32.mrb[2].mxu1  ;;  %v6959_v7 = vpop.f32.mrb[66].mxu0 }
 0x278   : > { %v6961_v9 = vpop.f32.mrb[3].mxu1  ;;  %v6963_v10 = vpop.f32.mrb[67].mxu0 }
 0x27d   : > { %v6965_v14 = vpop.f32.mrb[4].mxu1  ;;  %v6967_v15 = vpop.f32.mrb[68].mxu0 }
 0x27e   : > { %v6969_v19 = vpop.f32.mrb[5].mxu1  ;;  %v6971_v21 = vpop.f32.mrb[69].mxu0 }
 0x27f   : > { %v6973_v13 = vpop.f32.mrb[6].mxu1  ;;  %v6975_v11 = vpop.f32.mrb[70].mxu0 }
 0x280   : > { %v6977_v30 = vpop.f32.mrb[7].mxu1  ;;  %v6979_v27 = vpop.f32.mrb[71].mxu0 }
 0x285   : > { %v6981_v46 = vpop.f32.mrb[8].mxu1  ;;  %v6983_v43 = vpop.f32.mrb[72].mxu0 }
 0x286   : > { %v6985_v62 = vpop.f32.mrb[9].mxu1  ;;  %v6987_v59 = vpop.f32.mrb[73].mxu0 }
 0x287   : > { %v6989_v16 = vpop.f32.mrb[10].mxu1  ;;  %v6991_v12 = vpop.f32.mrb[74].mxu0 }
 0x288   : > { %v6993_v34 = vpop.f32.mrb[11].mxu1  ;;  %v6995_v32 = vpop.f32.mrb[75].mxu0 }
 0x28d   : > { %v7005_v6 = vpop.f32.mrb[12].mxu1  ;;  %v7007_v4 = vpop.f32.mrb[76].mxu0 }
 0x28e   : > { %v7009_v29 = vpop.f32.mrb[13].mxu1  ;;  %v7011_v26 = vpop.f32.mrb[77].mxu0 }
 0x28f   : > { %v7013_v51 = vpop.f32.mrb[14].mxu1  ;;  %v7015_v48 = vpop.f32.mrb[78].mxu0 }
 0x290   : > { %v7017_v8 = vpop.f32.mrb[15].mxu1  ;;  %v7019_v5 = vpop.f32.mrb[79].mxu0 }
 0x295   : > { %v7021_v35 = vpop.f32.mrb[16].mxu1  ;;  %v7023_v31 = vpop.f32.mrb[80].mxu0 }
 0x296   : > { %v7025_v57 = vpop.f32.mrb[17].mxu1  ;;  %v7027_v22 = vpop.f32.mrb[81].mxu0 }
 0x297   : > { %v7029_v55 = vpop.f32.mrb[18].mxu1  ;;  %v7031_v20 = vpop.f32.mrb[82].mxu0 }
 0x298   : > { %v7033_v23 = vpop.f32.mrb[19].mxu1  ;;  %v7035_v24 = vpop.f32.mrb[83].mxu0 }
 0x29d   : > { %v7037_v25 = vpop.f32.mrb[20].mxu1  ;;  %v7039_v18 = vpop.f32.mrb[84].mxu0 }
 0x29e   : > { %v7041_v28 = vpop.f32.mrb[21].mxu1  ;;  %v7043_v33 = vpop.f32.mrb[85].mxu0 }
 0x29f   : > { %v7045_v36 = vpop.f32.mrb[22].mxu1  ;;  %v7047_v37 = vpop.f32.mrb[86].mxu0 }
 0x2a0   : > { %v7049_v38 = vpop.f32.mrb[23].mxu1  ;;  %v7051_v39 = vpop.f32.mrb[87].mxu0 }
 0x2a5   : > { %v7053_v40 = vpop.f32.mrb[24].mxu1  ;;  %v7055_v41 = vpop.f32.mrb[88].mxu0 }
 0x2a6   : > { %8238 = vst [vmem:[#allocation3_spill] sm:$0xff] %v7055_v41  ;;  %v7057_v42 = vpop.f32.mrb[25].mxu1  ;;  %v7059_v44 = vpop.f32.mrb[89].mxu0 }
 0x2a7   : > { %8239 = vst [vmem:[#allocation4_spill] sm:$0xff] %v7059_v44  ;;  %v7061_v45 = vpop.f32.mrb[26].mxu1  ;;  %v7063_v47 = vpop.f32.mrb[90].mxu0 }
 0x2a8   : > { %8240 = vst [vmem:[#allocation5_spill] sm:$0xff] %v7061_v45  ;;  %8241 = vst [vmem:[#allocation6_spill] sm:$0xff] %v7063_v47  ;;  %v7065_v49 = vpop.f32.mrb[27].mxu1  ;;  %v7067_v53 = vpop.f32.mrb[91].mxu0 }
 0x2a9   : > { %8242 = vst [vmem:[#allocation7_spill] sm:$0xff] %v7065_v49  ;;  %8243 = vst [vmem:[#allocation8_spill] sm:$0xff] %v7067_v53 }
 0x2ad   : > { %v7069_v56 = vpop.f32.mrb[28].mxu1  ;;  %v7071_v58 = vpop.f32.mrb[92].mxu0 }
 0x2ae   : > { %8244 = vst [vmem:[#allocation9_spill] sm:$0xff] %v7069_v56  ;;  %8245 = vst [vmem:[#allocation10_spill] sm:$0xff] %v7071_v58  ;;  %v7073_v60 = vpop.f32.mrb[29].mxu1  ;;  %v7075_v61 = vpop.f32.mrb[93].mxu0 }
 0x2af   : > { %8246 = vst [vmem:[#allocation11_spill] sm:$0xff] %v7073_v60  ;;  %8247 = vst [vmem:[#allocation12_spill] sm:$0xff] %v7075_v61  ;;  %v7077_v52 = vpop.f32.mrb[30].mxu1  ;;  %v7079_v50 = vpop.f32.mrb[94].mxu0 }
 0x2b0   : > { %8248 = vst [vmem:[#allocation13_spill] sm:$0xff] %v7077_v52  ;;  %8249 = vst [vmem:[#allocation14_spill] sm:$0xff] %v7079_v50  ;;  %v7081_v17 = vpop.f32.mrb[31].mxu1  ;;  %v7083_v54 = vpop.f32.mrb[95].mxu0 }
 0x2b1   : > { %8250 = vst [vmem:[#allocation15_spill] sm:$0xff] %v7081_v17  ;;  %8251 = vst [vmem:[#allocation16_spill] sm:$0xff] %v7083_v54 }
 0x2b5   : > { %v7085_v47 = vpop.f32.mrb[32].mxu1  ;;  %v7087_v49 = vpop.f32.mrb[96].mxu0 }
 0x2b6   : > { %8252 = vst [vmem:[#allocation17_spill] sm:$0xff] %v7085_v47  ;;  %8253 = vst [vmem:[#allocation18_spill] sm:$0xff] %v7087_v49  ;;  %v7089_v53 = vpop.f32.mrb[33].mxu1  ;;  %v7091_v56 = vpop.f32.mrb[97].mxu0 }
 0x2b7   : > { %8254 = vst [vmem:[#allocation19_spill] sm:$0xff] %v7089_v53  ;;  %8255 = vst [vmem:[#allocation20_spill] sm:$0xff] %v7091_v56  ;;  %v1536_v58 = vpop.f32.mrb[34].mxu1  ;;  %v2058_v60 = vpop.f32.mrb[98].mxu0 }
 0x2b8   : > { %v1537_v44 = vpop.f32.mrb[35].mxu1  ;;  %v2059_v61 = vpop.f32.mrb[99].mxu0 }
 0x2bd   : > { %v1696_v45 = vpop.f32.mrb[36].mxu1 }
 0x2be   : > { %v1783_v52 = vmax.f32 %v6949_v63, %v1696_v45  ;;  %v1698_v50 = vpop.f32.mrb[37].mxu1 }
 0x2bf   : > { %v1784_v17 = vmax.f32 %v6953_v1, %v1698_v50  ;;  %v1700_v41 = vpop.f32.mrb[38].mxu1 }
 0x2c0   : > { %v2061_v54 = vmax.f32 %v1783_v52, %v6951_v0  ;;  %v1785_v47 = vmax.f32 %v6957_v3, %v1700_v41  ;;  %v1702_v49 = vpop.f32.mrb[39].mxu1 }
 0x2c1   : > { %v2062_v53 = vmax.f32 %v1784_v17, %v6955_v2  ;;  %v1786_v56 = vmax.f32 %v6961_v9, %v1702_v49 }
 0x2c2   : > { %v2063_v58 = vmax.f32 %v1785_v47, %v6959_v7 }
 0x2c3   : > { %v2064_v44 = vmax.f32 %v1786_v56, %v6963_v10 }
 0x2c4   : > { %v7101_v60 = vpack.c.bf16 %v2063_v58, %v2061_v54 }
 0x2c5   : > { %v1706_v63 = vpop.f32.mrb[40].mxu1  ;;  %v7103_v45 = vpack.c.bf16 %v2064_v44, %v2062_v53 }
 0x2c6   : > { %v1787_v1 = vmax.f32 %v6965_v14, %v1706_v63  ;;  %v1708_v61 = vpop.f32.mrb[41].mxu1 }
 0x2c7   : > { %v1788_v0 = vmax.f32 %v6969_v19, %v1708_v61  ;;  %v1710_v3 = vpop.f32.mrb[42].mxu1  ;;  %2194 = vmatprep.subr.bf16.mxu1 %v7103_v45  ;;  %2348 = vmatprep.subr.bf16.mxu0 %v7103_v45 }
 0x2c8   : > { %v2065_v17 = vmax.f32 %v1787_v1, %v6967_v15  ;;  %v1789_v2 = vmax.f32 %v6973_v13, %v1710_v3  ;;  %v1712_v7 = vpop.f32.mrb[43].mxu1  ;;  %2195 = vmatpush1.bf16.msra.mxu1 %v7101_v60  ;;  %2349 = vmatpush1.bf16.msra.mxu0 %v7101_v60 }
 0x2c9   : > { %v2066_v54 = vmax.f32 %v1788_v0, %v6971_v21  ;;  %v1790_v9 = vmax.f32 %v6977_v30, %v1712_v7 }
 0x2ca   : > { %v2067_v10 = vmax.f32 %v1789_v2, %v6975_v11 }
 0x2cb   : > { %v2068_v14 = vmax.f32 %v1790_v9, %v6979_v27 }
 0x2cc   : > { %v7117_v19 = vpack.c.bf16 %v2067_v10, %v2065_v17 }
 0x2cd   : > { %v1716_v41 = vpop.f32.mrb[44].mxu1  ;;  %v7119_v47 = vpack.c.bf16 %v2068_v14, %v2066_v54 }
 0x2ce   : > { %v1791_v15 = vmax.f32 %v6981_v46, %v1716_v41  ;;  %v1718_v13 = vpop.f32.mrb[45].mxu1 }
 0x2cf   : > { %v1792_v49 = vmax.f32 %v6985_v62, %v1718_v13  ;;  %v1720_v53 = vpop.f32.mrb[46].mxu1  ;;  %2196 = vmatprep.subr.bf16.mxu1 %v7119_v47  ;;  %2350 = vmatprep.subr.bf16.mxu0 %v7119_v47 }
 0x2d0   : > { %v2069_v21 = vmax.f32 %v1791_v15, %v6983_v43  ;;  %v1793_v11 = vmax.f32 %v6989_v16, %v1720_v53  ;;  %v1722_v30 = vpop.f32.mrb[47].mxu1  ;;  %2197 = vmatpush1.bf16.msra.mxu1 %v7117_v19  ;;  %2351 = vmatpush1.bf16.msra.mxu0 %v7117_v19 }
 0x2d1   : > { %v2070_v27 = vmax.f32 %v1792_v49, %v6987_v59  ;;  %v1794_v46 = vmax.f32 %v6993_v34, %v1722_v30 }
 0x2d2   : > { %v2071_v62 = vmax.f32 %v1793_v11, %v6991_v12 }
 0x2d3   : > { %v2072_v56 = vmax.f32 %v1794_v46, %v6995_v32 }
 0x2d4   : > { %v7133_v52 = vpack.c.bf16 %v2071_v62, %v2069_v21 }
 0x2d5   : > { %v1726_v50 = vpop.f32.mrb[48].mxu1  ;;  %v7135_v58 = vpack.c.bf16 %v2072_v56, %v2070_v27  ;;  %v8258_v27 = vld [vmem:[#allocation4_spill] sm:$0xff]  ;;  %v8260_v56 = vld [vmem:[#allocation6_spill] sm:$0xff] }
 0x2d6   : > { %v1795_v43 = vmax.f32 %v7005_v6, %v1726_v50  ;;  %v1728_v16 = vpop.f32.mrb[49].mxu1  ;;  %v8261_v50 = vld [vmem:[#allocation8_spill] sm:$0xff] }
 0x2d7   : > { %v1796_v44 = vmax.f32 %v7009_v29, %v1728_v16  ;;  %v1730_v63 = vpop.f32.mrb[50].mxu1  ;;  %2198 = vmatprep.subr.bf16.mxu1 %v7135_v58  ;;  %2352 = vmatprep.subr.bf16.mxu0 %v7135_v58 }
 0x2d8   : > { %v2073_v59 = vmax.f32 %v1795_v43, %v7007_v4  ;;  %v1797_v12 = vmax.f32 %v7013_v51, %v1730_v63  ;;  %v1732_v34 = vpop.f32.mrb[51].mxu1  ;;  %2199 = vmatpush1.bf16.msra.mxu1 %v7133_v52  ;;  %2353 = vmatpush1.bf16.msra.mxu0 %v7133_v52 }
 0x2d9   : > { %v2074_v32 = vmax.f32 %v1796_v44, %v7011_v26  ;;  %v1798_v6 = vmax.f32 %v7017_v8, %v1732_v34 }
 0x2da   : > { %v2075_v29 = vmax.f32 %v1797_v12, %v7015_v48 }
 0x2db   : > { %v2076_v1 = vmax.f32 %v1798_v6, %v7019_v5 }
 0x2dc   : > { %v7149_v61 = vpack.c.bf16 %v2075_v29, %v2073_v59  ;;  %v8262_v59 = vld [vmem:[#allocation9_spill] sm:$0xff] }
 0x2dd   : > { %v1736_v0 = vpop.f32.mrb[52].mxu1  ;;  %v7151_v3 = vpack.c.bf16 %v2076_v1, %v2074_v32  ;;  %v8263_v32 = vld [vmem:[#allocation11_spill] sm:$0xff]  ;;  %v8264_v1 = vld [vmem:[#allocation10_spill] sm:$0xff] }
 0x2de   : > { %v1799_v4 = vmax.f32 %v7021_v35, %v1736_v0  ;;  %v1738_v51 = vpop.f32.mrb[53].mxu1 }
 0x2df   : > { %v1800_v17 = vmax.f32 %v7025_v57, %v1738_v51  ;;  %v1740_v2 = vpop.f32.mrb[54].mxu1  ;;  %2200 = vmatprep.subr.bf16.mxu1 %v7151_v3  ;;  %2354 = vmatprep.subr.bf16.mxu0 %v7151_v3 }
 0x2e0   : > { %v2077_v26 = vmax.f32 %v1799_v4, %v7023_v31  ;;  %v1801_v48 = vmax.f32 %v7029_v55, %v1740_v2  ;;  %v1742_v8 = vpop.f32.mrb[55].mxu1  ;;  %2201 = vmatpush1.bf16.msra.mxu1 %v7149_v61  ;;  %2355 = vmatpush1.bf16.msra.mxu0 %v7149_v61  ;;  %v8265_v4 = vld [vmem:[#allocation13_spill] sm:$0xff]  ;;  %v8266_v2 = vld [vmem:[#allocation12_spill] sm:$0xff] }
 0x2e1   : > { %v2078_v5 = vmax.f32 %v1800_v17, %v7027_v22  ;;  %v1802_v35 = vmax.f32 %v7033_v23, %v1742_v8 }
 0x2e2   : > { %v2079_v57 = vmax.f32 %v1801_v48, %v7031_v20  ;;  %v8267_v48 = vld [vmem:[#allocation15_spill] sm:$0xff] }
 0x2e3   : > { %v2080_v7 = vmax.f32 %v1802_v35, %v7035_v24 }
 0x2e4   : > { %v7165_v54 = vpack.c.bf16 %v2079_v57, %v2077_v26  ;;  %v8269_v57 = vld [vmem:[#allocation16_spill] sm:$0xff] }
 0x2e5   : > { %v1746_v9 = vpop.f32.mrb[56].mxu1  ;;  %v7167_v10 = vpack.c.bf16 %v2080_v7, %v2078_v5  ;;  %v8268_v5 = vld [vmem:[#allocation14_spill] sm:$0xff] }
 0x2e6   : > { %v1803_v31 = vmax.f32 %v7037_v25, %v1746_v9  ;;  %v1748_v55 = vpop.f32.mrb[57].mxu1 }
 0x2e7   : > { %v1804_v14 = vmax.f32 %v7041_v28, %v1748_v55  ;;  %v1750_v41 = vpop.f32.mrb[58].mxu1  ;;  %2202 = vmatprep.subr.bf16.mxu1 %v7167_v10  ;;  %2356 = vmatprep.subr.bf16.mxu0 %v7167_v10 }
 0x2e8   : > { %v2081_v22 = vmax.f32 %v1803_v31, %v7039_v18  ;;  %v1805_v20 = vmax.f32 %v7045_v36, %v1750_v41  ;;  %v1752_v23 = vpop.f32.mrb[59].mxu1  ;;  %2203 = vmatpush1.bf16.msra.mxu1 %v7165_v54  ;;  %2357 = vmatpush1.bf16.msra.mxu0 %v7165_v54 }
 0x2e9   : > { %v2082_v24 = vmax.f32 %v1804_v14, %v7043_v33  ;;  %v1806_v25 = vmax.f32 %v7049_v38, %v1752_v23  ;;  %v8256_v33 = vld [vmem:[#allocation3_spill] sm:$0xff]  ;;  %v8270_v14 = vld [vmem:[#allocation17_spill] sm:$0xff] }
 0x2ea   : > { %v2083_v28 = vmax.f32 %v1805_v20, %v7047_v37  ;;  %v8257_v37 = vld [vmem:[#allocation5_spill] sm:$0xff]  ;;  %v8271_v20 = vmov 65535  }
 0x2eb   : > { %v2084_v15 = vmax.f32 %v1806_v25, %v7051_v39  ;;  %v2186_v23 = vsel %vm2184_vm4, 4294967295, %v8271_v20 }
 0x2ec   : > { %v7181_v13 = vpack.c.bf16 %v2083_v28, %v2081_v22 }
 0x2ed   : > { %v1756_v49 = vpop.f32.mrb[60].mxu1  ;;  %v7183_v53 = vpack.c.bf16 %v2084_v15, %v2082_v24  ;;  %v8272_v24 = vld [vmem:[#allocation19_spill] sm:$0xff]  ;;  %v8273_v15 = vld [vmem:[#allocation18_spill] sm:$0xff] }
 0x2ee   : > { %v1807_v18 = vmax.f32 %v7053_v40, %v1756_v49  ;;  %v1758_v36 = vpop.f32.mrb[61].mxu1  ;;  %v8259_v40 = vld [vmem:[#allocation7_spill] sm:$0xff] }
 0x2ef   : > { %v1808_v21 = vmax.f32 %v7057_v42, %v1758_v36  ;;  %v1760_v11 = vpop.f32.mrb[62].mxu1  ;;  %2204 = vmatprep.subr.bf16.mxu1 %v7183_v53  ;;  %2358 = vmatprep.subr.bf16.mxu0 %v7183_v53  ;;  %v8274_v36 = vld [vmem:[#allocation20_spill] sm:$0xff] }
 0x2f0   : > { %v2085_v38 = vmax.f32 %v1807_v18, %v8256_v33  ;;  %v1809_v30 = vmax.f32 %v8257_v37, %v1760_v11  ;;  %v1762_v39 = vpop.f32.mrb[63].mxu1  ;;  %2205 = vmatpush1.bf16.msra.mxu1 %v7181_v13  ;;  %2359 = vmatpush1.bf16.msra.mxu0 %v7181_v13  ;;  %v2187_v33 = vsel %vm2185_vm5, %v2186_v23, 0 }
 0x2f1   : > { %v2086_v46 = vmax.f32 %v1808_v21, %v8258_v27  ;;  %v1810_v62 = vmax.f32 %v8259_v40, %v1762_v39  ;;  %v5963_v39 = vld [vmem:[%s8220_s4] ss:$8 sps:$4 sm:$0xff]   ;;  %v5966_v27 = vld [vmem:[%s8220_s4 + $0x50] ss:$8 sps:$4 sm:$0xff]   ;;  %v5971_v40 = vld [vmem:[%s8220_s4 + $0x64] ss:$8 sps:$4 sm:$0xff]  }
 0x2f2   : > { %v2087_v42 = vmax.f32 %v1809_v30, %v8260_v56  ;;  %v5992_v56 = vld [vmem:[%s8220_s4 + $0x90] ss:$8 sps:$4 sm:$0x3f]  }
 0x2f3   : > { %v2088_v43 = vmax.f32 %v1810_v62, %v8261_v50  ;;  %v5973_v62 = vld [vmem:[%s8220_s4 + $0x10] ss:$8 sps:$4 sm:$0xff]   ;;  %v8275_v50 = vmov 0  }
 0x2f4   : > { %v7197_v16 = vpack.c.bf16 %v2087_v42, %v2085_v38  ;;  %v5995_v42 = vld [vmem:[%s8220_s4 + $0xa4] ss:$8 sps:$4 sm:$0xff]  }
 0x2f5   : > { %v1766_v44 = vpop.f32.mrb[64].mxu1  ;;  %v7199_v63 = vpack.c.bf16 %v2088_v43, %v2086_v46  ;;  %v5969_v46 = vld [vmem:[%s8220_s4 + $0x14] ss:$8 sps:$4 sm:$0xff]   ;;  %v5993_v43 = vld [vmem:[%s8220_s4 + $0xa0] ss:$8 sps:$4 sm:$0xff]  }
 0x2f6   : > { %v1811_v12 = vmax.f32 %v8262_v59, %v1766_v44  ;;  %v1768_v34 = vpop.f32.mrb[65].mxu1  ;;  %v5998_v44 = vld [vmem:[%s8220_s4 + $0xb0] ss:$8 sps:$4 sm:$0xff]   ;;  %v6001_v59 = vld [vmem:[%s8220_s4 + $0xc0] ss:$8 sps:$4 sm:$0xff]  }
 0x2f7   : > { %v1812_v6 = vmax.f32 %v8263_v32, %v1768_v34  ;;  %v1770_v29 = vpop.f32.mrb[66].mxu1  ;;  %2206 = vmatprep.subr.bf16.mxu1 %v7199_v63  ;;  %2360 = vmatprep.subr.bf16.mxu0 %v7199_v63  ;;  %v6004_v34 = vld [vmem:[%s8220_s4 + $0xd0] ss:$8 sps:$4 sm:$0xff]   ;;  %v6005_v32 = vld [vmem:[%s8220_s4 + $0xe4] ss:$8 sps:$4 sm:$0x3f]  }
 0x2f8   : > { %v2089_v0 = vmax.f32 %v1811_v12, %v8264_v1  ;;  %v1813_v51 = vmax.f32 %v8265_v4, %v1770_v29  ;;  %v1772_v17 = vpop.f32.mrb[67].mxu1  ;;  %2207 = vmatpush1.bf16.msra.mxu1 %v7197_v16  ;;  %2361 = vmatpush1.bf16.msra.mxu0 %v7197_v16  ;;  %v6002_v12 = vld [vmem:[%s8220_s4 + $0xd4] ss:$8 sps:$4 sm:$0xff]  }
 0x2f9   : > { %v2090_v26 = vmax.f32 %v1812_v6, %v8266_v2  ;;  %v1814_v8 = vmax.f32 %v8267_v48, %v1772_v17  ;;  %v6007_v6 = vld [vmem:[%s8220_s4 + $0xe0] ss:$8 sps:$4 sm:$0x3f]  }
 0x2fa   : > { %v2091_v35 = vmax.f32 %v1813_v51, %v8268_v5 }
 0x2fb   : > { %v2092_v7 = vmax.f32 %v1814_v8, %v8269_v57 }
 0x2fc   : > { %v7213_v9 = vpack.c.bf16 %v2091_v35, %v2089_v0 }
 0x2fd   : > { %v1776_v31 = vpop.f32.mrb[68].mxu1  ;;  %v7215_v55 = vpack.c.bf16 %v2092_v7, %v2090_v26 }
 0x2fe   : > { %v1815_v41 = vmax.f32 %v8270_v14, %v1776_v31  ;;  %v1778_v22 = vpop.f32.mrb[69].mxu1 }
 0x2ff   : > { %v1816_v25 = vmax.f32 %v8272_v24, %v1778_v22  ;;  %v1780_v28 = vpop.f32.mrb[70].mxu1  ;;  %2208 = vmatprep.subr.bf16.mxu1 %v7215_v55  ;;  %2362 = vmatprep.subr.bf16.mxu0 %v7215_v55 }
 0x300   : > { %v2093_v49 = vmax.f32 %v1815_v41, %v8273_v15  ;;  %v1781_v18 = vpop.f32.mrb[71].mxu1  ;;  %2209 = vmatpush1.bf16.msra.mxu1 %v7213_v9  ;;  %2363 = vmatpush1.bf16.msra.mxu0 %v7213_v9 }
 0x301   : > { %v2094_v21 = vmax.f32 %v1816_v25, %v8274_v36 }
 0x302   : > { %v2111_v11 = vpack.c.bf16 %v2093_v49, %v2093_v49 }
 0x303   : > { %v2112_v38 = vpack.c.bf16 %v2094_v21, %v2094_v21 }
 0x304   : > { %v2189_v30 = vand.u32 %v2187_v33, %v2111_v11 }
 0x305   : > { %v2192_v37 = vand.u32 %v2187_v33, %v2112_v38 }
 0x307   : > { %2210 = vmatprep.subr.bf16.mxu1 %v2192_v37  ;;  %2364 = vmatprep.subr.bf16.mxu0 %v2192_v37 }
 0x308   : > { %2211 = vmatpush1.bf16.msra.mxu1 %v2189_v30  ;;  %2365 = vmatpush1.bf16.msra.mxu0 %v2189_v30 }
 0x309   : > { %2522 = vmatprep.subr.bf16.mxu1 %v7103_v45  ;;  %v5974_v45 = vld [vmem:[%s8220_s4 + $0x60] ss:$8 sps:$4 sm:$0xff]  }
 0x30b   : > { %2227 = vmatmul.mubr.bf16.vlgmr.msra.gmra.mrb[72].mxu1 %v5963_v39  ;;  %2381 = vmatmul.mubr.bf16.vlgmr.msra.gmra.mrb[100].mxu0 %v5966_v27 }
 0x30c   : > { %2523 = vmatpush1.bf16.msra.mxu1 %v7101_v60  ;;  %5508 = vmatprep.mubr.msk.bf16.mxu1 %vm2168_vm3, %v5969_v46  ;;  %v5975_v60 = vld [vmem:[%s8220_s4 + $0x24] ss:$8 sps:$4 sm:$0xff]  }
 0x30d   : > { %2524 = vmatprep.subr.bf16.mxu1 %v7119_v47  ;;  %5533 = vmatprep.mubr.msk.bf16.mxu0 %vm2168_vm3, %v5971_v40  ;;  %v5977_v47 = vld [vmem:[%s8220_s4 + $0x74] ss:$8 sps:$4 sm:$0xff]  }
 0x310   : > { %2525 = vmatpush1.bf16.msra.mxu1 %v7117_v19  ;;  %v5979_v19 = vld [vmem:[%s8220_s4 + $0x20] ss:$8 sps:$4 sm:$0xff]  }
 0x311   : > { %2526 = vmatprep.subr.bf16.mxu1 %v7135_v58  ;;  %v5980_v58 = vld [vmem:[%s8220_s4 + $0x70] ss:$8 sps:$4 sm:$0xff]  }
 0x313   : > { %2237 = vmatmul.mubr.bf16.gmra.mrb[76].mxu1 %v5973_v62  ;;  %2391 = vmatmul.mubr.bf16.gmra.mrb[104].mxu0 %v5974_v45 }
 0x314   : > { %2527 = vmatpush1.bf16.msra.mxu1 %v7133_v52  ;;  %5509 = vmatprep.mubr.msk.bf16.mxu1 %vm2168_vm3, %v5975_v60  ;;  %v5981_v52 = vld [vmem:[%s8220_s4 + $0x34] ss:$8 sps:$4 sm:$0xff]  }
 0x315   : > { %2528 = vmatprep.subr.bf16.mxu1 %v7151_v3  ;;  %5534 = vmatprep.mubr.msk.bf16.mxu0 %vm2168_vm3, %v5977_v47  ;;  %v5983_v3 = vld [vmem:[%s8220_s4 + $0x84] ss:$8 sps:$4 sm:$0xff]  }
 0x318   : > { %2529 = vmatpush1.bf16.msra.mxu1 %v7149_v61  ;;  %v5985_v61 = vld [vmem:[%s8220_s4 + $0x30] ss:$8 sps:$4 sm:$0xff]  }
 0x319   : > { %2530 = vmatprep.subr.bf16.mxu1 %v7167_v10  ;;  %v5986_v10 = vld [vmem:[%s8220_s4 + $0x80] ss:$8 sps:$4 sm:$0xff]  }
 0x31b   : > { %2247 = vmatmul.mubr.bf16.gmra.mrb[80].mxu1 %v5979_v19  ;;  %2401 = vmatmul.mubr.bf16.gmra.mrb[108].mxu0 %v5980_v58 }
 0x31c   : > { %2531 = vmatpush1.bf16.msra.mxu1 %v7165_v54  ;;  %5510 = vmatprep.mubr.msk.bf16.mxu1 %vm2168_vm3, %v5981_v52  ;;  %v5987_v54 = vld [vmem:[%s8220_s4 + $0x44] ss:$8 sps:$4 sm:$0x3f]  }
 0x31d   : > { %2532 = vmatprep.subr.bf16.mxu1 %v7183_v53  ;;  %5535 = vmatprep.mubr.msk.bf16.mxu0 %vm2168_vm3, %v5983_v3  ;;  %v5989_v53 = vld [vmem:[%s8220_s4 + $0x94] ss:$8 sps:$4 sm:$0x3f]  }
 0x320   : > { %2533 = vmatpush1.bf16.msra.mxu1 %v7181_v13  ;;  %v5991_v13 = vld [vmem:[%s8220_s4 + $0x40] ss:$8 sps:$4 sm:$0x3f]  }
 0x321   : > { %2534 = vmatprep.subr.bf16.mxu1 %v7199_v63  ;;  %v5999_v63 = vld [vmem:[%s8220_s4 + $0xc4] ss:$8 sps:$4 sm:$0xff]  }
 0x323   : > { %2257 = vmatmul.mubr.bf16.gmra.mrb[84].mxu1 %v5985_v61  ;;  %2411 = vmatmul.mubr.bf16.gmra.mrb[112].mxu0 %v5986_v10 }
 0x324   : > { %2535 = vmatpush1.bf16.msra.mxu1 %v7197_v16  ;;  %5511 = vmatprep.mubr.msk.bf16.mxu1 %vm2168_vm3, %v5987_v54  ;;  %v5996_v16 = vld [vmem:[%s8220_s4 + $0xb4] ss:$8 sps:$4 sm:$0xff]  }
 0x325   : > { %2536 = vmatprep.subr.bf16.mxu1 %v7215_v55  ;;  %5536 = vmatprep.mubr.msk.bf16.mxu0 %vm2168_vm3, %v5989_v53 }
 0x328   : > { %2537 = vmatpush1.bf16.msra.mxu1 %v7213_v9 }
 0x329   : > { %2538 = vmatprep.subr.bf16.mxu1 %v2192_v37 }
 0x32b   : > { %2267 = vmatmul.mubr.bf16.gmra.mrb[88].mxu1 %v5991_v13  ;;  %2421 = vmatmul.mubr.bf16.gmra.mrb[116].mxu0 %v5992_v56 }
 0x32c   : > { %2539 = vmatpush1.bf16.msra.mxu1 %v2189_v30  ;;  %5557 = vmatprep.mubr.msk.bf16.mxu1 %vm2168_vm3, %v5995_v42 }
 0x32d   : > { %2933 = vmatprep.mubr.bf16.mxu0 %v8275_v50 }
 0x333   : > { %2555 = vmatmul.mubr.bf16.vlgmr.msra.gmra.mrb[92].mxu1 %v5993_v43 }
 0x334   : > { %5558 = vmatprep.mubr.msk.bf16.mxu1 %vm2168_vm3, %v5996_v16 }
 0x33b   : > { %2565 = vmatmul.mubr.bf16.gmra.mrb[96].mxu1 %v5998_v44 }
 0x33c   : > { %5559 = vmatprep.mubr.msk.bf16.mxu1 %vm2168_vm3, %v5999_v63 }
 0x343   : > { %2575 = vmatmul.mubr.bf16.gmra.mrb[100].mxu1 %v6001_v59 }
 0x344   : > { %5560 = vmatprep.mubr.msk.bf16.mxu1 %vm2168_vm3, %v6002_v12 }
 0x34b   : > { %2585 = vmatmul.mubr.bf16.gmra.mrb[104].mxu1 %v6004_v34 }
 0x34c   : > { %5561 = vmatprep.mubr.msk.bf16.mxu1 %vm2168_vm3, %v6005_v32 }
 0x353   : > { %2595 = vmatmul.mubr.bf16.gmra.mrb[108].mxu1 %v6007_v6 }
 0x3de   : > { %v2228_v29 = vpop.f32.mrb[72].mxu1  ;;  %v2382_v1 = vpop.f32.mrb[100].mxu0 }
 0x3df   : > { %v2431_v0 = vmax.f32 %v2228_v29, %v2382_v1  ;;  %v2230_v4 = vpop.f32.mrb[73].mxu1  ;;  %v2384_v51 = vpop.f32.mrb[101].mxu0 }
 0x3e0   : > { %v2432_v17 = vmax.f32 %v2230_v4, %v2384_v51  ;;  %v2232_v2 = vpop.f32.mrb[74].mxu1  ;;  %v2386_v26 = vpop.f32.mrb[102].mxu0 }
 0x3e1   : > { %v2433_v48 = vmax.f32 %v2232_v2, %v2386_v26  ;;  %v2234_v8 = vpop.f32.mrb[75].mxu1  ;;  %v2388_v5 = vpop.f32.mrb[103].mxu0 }
 0x3e2   : > { %v2434_v35 = vmax.f32 %v2234_v8, %v2388_v5 }
 0x3e6   : > { %v2238_v57 = vpop.f32.mrb[76].mxu1  ;;  %v2392_v7 = vpop.f32.mrb[104].mxu0 }
 0x3e7   : > { %v2435_v9 = vmax.f32 %v2238_v57, %v2392_v7  ;;  %v2240_v31 = vpop.f32.mrb[77].mxu1  ;;  %v2394_v55 = vpop.f32.mrb[105].mxu0 }
 0x3e8   : > { %v2436_v14 = vmax.f32 %v2240_v31, %v2394_v55  ;;  %v2242_v41 = vpop.f32.mrb[78].mxu1  ;;  %v2396_v22 = vpop.f32.mrb[106].mxu0 }
 0x3e9   : > { %v2437_v23 = vmax.f32 %v2242_v41, %v2396_v22  ;;  %v2244_v24 = vpop.f32.mrb[79].mxu1  ;;  %v2398_v25 = vpop.f32.mrb[107].mxu0 }
 0x3ea   : > { %v2438_v28 = vmax.f32 %v2244_v24, %v2398_v25 }
 0x3ee   : > { %v2248_v15 = vpop.f32.mrb[80].mxu1  ;;  %v2402_v49 = vpop.f32.mrb[108].mxu0 }
 0x3ef   : > { %v2439_v18 = vmax.f32 %v2248_v15, %v2402_v49  ;;  %v2250_v36 = vpop.f32.mrb[81].mxu1  ;;  %v2404_v21 = vpop.f32.mrb[109].mxu0 }
 0x3f0   : > { %v2440_v11 = vmax.f32 %v2250_v36, %v2404_v21  ;;  %v2252_v33 = vpop.f32.mrb[82].mxu1  ;;  %v2406_v38 = vpop.f32.mrb[110].mxu0 }
 0x3f1   : > { %v2441_v37 = vmax.f32 %v2252_v33, %v2406_v38  ;;  %v2254_v30 = vpop.f32.mrb[83].mxu1  ;;  %v2408_v39 = vpop.f32.mrb[111].mxu0 }
 0x3f2   : > { %v2442_v27 = vmax.f32 %v2254_v30, %v2408_v39 }
 0x3f6   : > { %v2258_v46 = vpop.f32.mrb[84].mxu1  ;;  %v2412_v40 = vpop.f32.mrb[112].mxu0 }
 0x3f7   : > { %v2443_v62 = vmax.f32 %v2258_v46, %v2412_v40  ;;  %v2260_v45 = vpop.f32.mrb[85].mxu1  ;;  %v2414_v60 = vpop.f32.mrb[113].mxu0 }
 0x3f8   : > { %v2444_v47 = vmax.f32 %v2260_v45, %v2414_v60  ;;  %v2262_v19 = vpop.f32.mrb[86].mxu1  ;;  %v2416_v58 = vpop.f32.mrb[114].mxu0 }
 0x3f9   : > { %v2445_v52 = vmax.f32 %v2262_v19, %v2416_v58  ;;  %v2264_v3 = vpop.f32.mrb[87].mxu1  ;;  %v2418_v61 = vpop.f32.mrb[115].mxu0 }
 0x3fa   : > { %v2446_v10 = vmax.f32 %v2264_v3, %v2418_v61 }
 0x3fe   : > { %v2268_v54 = vpop.f32.mrb[88].mxu1  ;;  %v2422_v53 = vpop.f32.mrb[116].mxu0 }
 0x3ff   : > { %v2447_v13 = vmax.f32 %v2268_v54, %v2422_v53  ;;  %v2270_v56 = vpop.f32.mrb[89].mxu1  ;;  %v2424_v42 = vpop.f32.mrb[117].mxu0 }
 0x400   : > { %v2448_v43 = vmax.f32 %v2270_v56, %v2424_v42  ;;  %v7341_v16 = vpop.f32.mrb[90].mxu1  ;;  %v2426_v44 = vpop.f32.mrb[118].mxu0 }
 0x401   : > { %v2449_v63 = vmax.f32 %v7341_v16, %v2426_v44  ;;  %v2274_v59 = vpop.f32.mrb[91].mxu1  ;;  %v2428_v12 = vpop.f32.mrb[119].mxu0  ;;  %v6010_v16 = vld [vmem:[%s8221_s5 + $0x10] sm:$0xff]   ;;  %v6011_v44 = vld [vmem:[%s8221_s5 + $0x18] sm:$0xff]  }
 0x402   : > { %v2450_v34 = vmax.f32 %v2274_v59, %v2428_v12  ;;  %v6013_v59 = vld [vmem:[%s8221_s5 + $0x28] sm:$0xff]   ;;  %v6014_v12 = vld [vmem:[%s8221_s5 + $0x30] sm:$0xff]  }
 0x406   : > { %v2556_v32 = vpop.f32.mrb[92].mxu1 }
 0x407   : > { %v2605_v6 = vmax.f32 %v2431_v0, %v2556_v32  ;;  %v2558_v29 = vpop.f32.mrb[93].mxu1  ;;  %v6016_v32 = vld [vmem:[%s8221_s5 + $0x40] sm:$0xff]  }
 0x408   : > { %v2606_v1 = vmax.f32 %v2432_v17, %v2558_v29  ;;  %v2560_v4 = vpop.f32.mrb[94].mxu1  ;;  %v6018_v29 = vld [vmem:[%s8221_s5 + $0x50] sm:$0xff]  }
 0x409   : > { %v2607_v51 = vmax.f32 %v2433_v48, %v2560_v4  ;;  %v2562_v2 = vpop.f32.mrb[95].mxu1  ;;  %v6022_v4 = vld [vmem:[%s8223_s7 + $0x4] ss:$8 sps:$4 sm:$0xff]  }
 0x40a   : > { %v2608_v26 = vmax.f32 %v2434_v35, %v2562_v2  ;;  %5599 = vmatprep.mubr.msk.bf16.mxu1 %vm3188_vm9, %v6022_v4 }
 0x40b   : > { %v2625_v8 = vpack.c.bf16 %v2607_v51, %v2605_v6  ;;  %v6017_v6 = vld [vmem:[%s8221_s5 + $0x48] sm:$0xff]   ;;  %v2684_v51 = vpop.permute.xlu1 %2683 }
 0x40c   : > { %v2626_v5 = vpack.c.bf16 %v2608_v26, %v2606_v1  ;;  %v6019_v1 = vld [vmem:[%s8221_s5 + $0x58] ss:$0 sps:$4 sm:$0x33]  }
 0x40e   : > { %v2566_v57 = vpop.f32.mrb[96].mxu1  ;;  %2901 = vmatprep.subr.bf16.mxu0 %v2626_v5  ;;  %v2689_v5 = vpop.permute.xlu0 %2688 }
 0x40f   : > { %v2609_v7 = vmax.f32 %v2435_v9, %v2566_v57  ;;  %v2568_v31 = vpop.f32.mrb[97].mxu1  ;;  %2902 = vmatpush1.bf16.msra.mxu0 %v2625_v8 }
 0x410   : > { %v2610_v55 = vmax.f32 %v2436_v14, %v2568_v31  ;;  %v2570_v41 = vpop.f32.mrb[98].mxu1 }
 0x411   : > { %v2611_v22 = vmax.f32 %v2437_v23, %v2570_v41  ;;  %v2572_v24 = vpop.f32.mrb[99].mxu1 }
 0x412   : > { %v2612_v25 = vmax.f32 %v2438_v28, %v2572_v24 }
 0x413   : > { %v2627_v15 = vpack.c.bf16 %v2611_v22, %v2609_v7 }
 0x414   : > { %v2628_v0 = vpack.c.bf16 %v2612_v25, %v2610_v55 }
 0x416   : > { %v2576_v49 = vpop.f32.mrb[100].mxu1  ;;  %2903 = vmatprep.subr.bf16.mxu0 %v2628_v0 }
 0x417   : > { %v2613_v17 = vmax.f32 %v2439_v18, %v2576_v49  ;;  %v2578_v48 = vpop.f32.mrb[101].mxu1  ;;  %2904 = vmatpush1.bf16.msra.mxu0 %v2627_v15  ;;  %v2694_v49 = vpop.permute.xlu1 %2693 }
 0x418   : > { %v2614_v35 = vmax.f32 %v2440_v11, %v2578_v48  ;;  %v2580_v36 = vpop.f32.mrb[102].mxu1 }
 0x419   : > { %v2615_v21 = vmax.f32 %v2441_v37, %v2580_v36  ;;  %v2582_v33 = vpop.f32.mrb[103].mxu1 }
 0x41a   : > { %v2616_v38 = vmax.f32 %v2442_v27, %v2582_v33 }
 0x41b   : > { %v2629_v9 = vpack.c.bf16 %v2615_v21, %v2613_v17  ;;  %v2699_v21 = vpop.permute.xlu0 %2698 }
 0x41c   : > { %v2630_v30 = vpack.c.bf16 %v2616_v38, %v2614_v35 }
 0x41e   : > { %v2586_v39 = vpop.f32.mrb[104].mxu1  ;;  %2905 = vmatprep.subr.bf16.mxu0 %v2630_v30 }
 0x41f   : > { %v2617_v14 = vmax.f32 %v2443_v62, %v2586_v39  ;;  %v2588_v23 = vpop.f32.mrb[105].mxu1  ;;  %2906 = vmatpush1.bf16.msra.mxu0 %v2629_v9  ;;  %v2893_v62 = vsel %vm2891_vm6, 4294967295, %v8271_v20 }
 0x420   : > { %v2618_v28 = vmax.f32 %v2444_v47, %v2588_v23  ;;  %v2590_v46 = vpop.f32.mrb[106].mxu1 }
 0x421   : > { %v2619_v40 = vmax.f32 %v2445_v52, %v2590_v46  ;;  %v2592_v45 = vpop.f32.mrb[107].mxu1 }
 0x422   : > { %v2620_v60 = vmax.f32 %v2446_v10, %v2592_v45  ;;  %v2894_v10 = vsel %vm2892_vm7, %v2893_v62, 0  ;;  %v2704_v45 = vpop.permute.xlu1 %2703 }
 0x423   : > { %v2631_v18 = vpack.c.bf16 %v2619_v40, %v2617_v14 }
 0x424   : > { %v2632_v19 = vpack.c.bf16 %v2620_v60, %v2618_v28 }
 0x426   : > { %v2596_v11 = vpop.f32.mrb[108].mxu1  ;;  %2907 = vmatprep.subr.bf16.mxu0 %v2632_v19  ;;  %v6040_v19 = vld [vmem:[%s8223_s7 + $0xc4] ss:$8 sps:$4 sm:$0xff]  }
 0x427   : > { %v2621_v37 = vmax.f32 %v2447_v13, %v2596_v11  ;;  %v2598_v58 = vpop.f32.mrb[109].mxu1  ;;  %2908 = vmatpush1.bf16.msra.mxu0 %v2631_v18  ;;  %v6008_v13 = vld [vmem:[%s8221_s5] sm:$0xff]  }
 0x428   : > { %v2622_v27 = vmax.f32 %v2448_v43, %v2598_v58  ;;  %v2600_v3 = vpop.f32.mrb[110].mxu1  ;;  %v6009_v43 = vld [vmem:[%s8221_s5 + $0x8] sm:$0xff]   ;;  %v2709_v58 = vpop.permute.xlu0 %2708 }
 0x429   : > { %v2623_v61 = vmax.f32 %v2449_v63, %v2600_v3  ;;  %v2602_v47 = vpop.f32.mrb[111].mxu1  ;;  %v6012_v63 = vld [vmem:[%s8221_s5 + $0x20] sm:$0xff]  }
 0x42a   : > { %v2624_v54 = vmax.f32 %v2450_v34, %v2602_v47  ;;  %v6015_v34 = vld [vmem:[%s8221_s5 + $0x38] sm:$0xff]  }
 0x42b   : > { %v2633_v52 = vpack.c.bf16 %v2623_v61, %v2621_v37 }
 0x42c   : > { %v2634_v53 = vpack.c.bf16 %v2624_v54, %v2622_v27 }
 0x42d   : > { %v2896_v42 = vand.u32 %v2894_v10, %v2633_v52 }
 0x42e   : > { %v2899_v56 = vand.u32 %v2894_v10, %v2634_v53 }
 0x430   : > { %2909 = vmatprep.subr.bf16.mxu0 %v2899_v56 }
 0x431   : > { %2910 = vmatpush1.bf16.msra.mxu0 %v2896_v42  ;;  %v2714_v42 = vpop.permute.xlu1 %2713 }
 0x434   : > { %5574 = vmatmul.mubr.msk.bf16.vlgmr.msra.gmra.mrb[120].mxu0 %vm2854_vm8, %v6008_v13 }
 0x435   : > { %2943 = vmatprep.mubr.bf16.mxu0 %v8275_v50 }
 0x43c   : > { %5575 = vmatmul.mubr.msk.bf16.gmra.mrb[124].mxu0 %vm2854_vm8, %v6009_v43 }
 0x43d   : > { %2953 = vmatprep.mubr.bf16.mxu0 %v8275_v50 }
 0x444   : > { %5576 = vmatmul.mubr.msk.bf16.gmra.mrb[128].mxu0 %vm2854_vm8, %v6010_v16 }
 0x445   : > { %2963 = vmatprep.mubr.bf16.mxu0 %v8275_v50 }
 0x44c   : > { %5577 = vmatmul.mubr.msk.bf16.gmra.mrb[132].mxu0 %vm2854_vm8, %v6011_v44 }
 0x44d   : > { %2973 = vmatprep.mubr.bf16.mxu0 %v8275_v50 }
 0x454   : > { %5578 = vmatmul.mubr.msk.bf16.gmra.mrb[136].mxu0 %vm2854_vm8, %v6012_v63  ;;  %v2719_v63 = vpop.permute.xlu0 %2718 }
 0x455   : > { %2983 = vmatprep.mubr.bf16.mxu0 %v8275_v50 }
 0x45c   : > { %5579 = vmatmul.mubr.msk.bf16.gmra.mrb[140].mxu0 %vm2854_vm8, %v6013_v59 }
 0x45d   : > { %2993 = vmatprep.mubr.bf16.mxu0 %v8275_v50 }
 0x464   : > { %5580 = vmatmul.mubr.msk.bf16.gmra.mrb[144].mxu0 %vm2854_vm8, %v6014_v12 }
 0x465   : > { %3003 = vmatprep.mubr.bf16.mxu0 %v8275_v50 }
 0x46c   : > { %5581 = vmatmul.mubr.msk.bf16.gmra.mrb[148].mxu0 %vm2854_vm8, %v6015_v34 }
 0x46d   : > { %3013 = vmatprep.mubr.bf16.mxu0 %v8275_v50 }
 0x474   : > { %5582 = vmatmul.mubr.msk.bf16.gmra.mrb[152].mxu0 %vm2854_vm8, %v6016_v32 }
 0x475   : > { %3023 = vmatprep.mubr.bf16.mxu0 %v8275_v50 }
 0x47c   : > { %5583 = vmatmul.mubr.msk.bf16.gmra.mrb[156].mxu0 %vm2854_vm8, %v6017_v6 }
 0x47d   : > { %3033 = vmatprep.mubr.bf16.mxu0 %v8275_v50 }
 0x484   : > { %5584 = vmatmul.mubr.msk.bf16.gmra.mrb[160].mxu0 %vm2854_vm8, %v6018_v29 }
 0x485   : > { %3043 = vmatprep.mubr.bf16.mxu0 %v8275_v50 }
 0x48c   : > { %5585 = vmatmul.mubr.msk.bf16.gmra.mrb[164].mxu0 %vm2854_vm8, %v6019_v1 }
 0x48d   : > { %5661 = vmatprep.mubr.msk.bf16.mxu0 %vm3188_vm9, %v6040_v19 }
 0x507   : > { %v2935_v2 = vpop.f32.mrb[120].mxu0 }
 0x508   : > { %v2936_v26 = vadd.f32 %v2935_v2, %v2684_v51  ;;  %v2937_v8 = vpop.f32.mrb[121].mxu0 }
 0x509   : > { %v2938_v57 = vadd.f32 %v2937_v8, %v2684_v51  ;;  %v2939_v7 = vpop.f32.mrb[122].mxu0 }
 0x50a   : > { %v2940_v31 = vadd.f32 %v2939_v7, %v2689_v5  ;;  %v2941_v55 = vpop.f32.mrb[123].mxu0  ;;  %v3052_v22 = vmax.f32 %v2936_v26, 0.0  ;;  %v2724_v26 = vpop.permute.xlu1 %2723 }
 0x50b   : > { %v2942_v41 = vadd.f32 %v2941_v55, %v2689_v5  ;;  %v3053_v25 = vmax.f32 %v2938_v57, 0.0 }
 0x50c   : > { %v3054_v24 = vmax.f32 %v2940_v31, 0.0  ;;  %v2729_v31 = vpop.permute.xlu0 %2728 }
 0x50d   : > { %v3055_v15 = vmax.f32 %v2942_v41, 0.0 }
 0x50e   : > { %v7410_v0 = vpack.c.bf16 %v3054_v24, %v3052_v22 }
 0x50f   : > { %v7412_v17 = vpack.c.bf16 %v3055_v15, %v3053_v25  ;;  %v2945_v48 = vpop.f32.mrb[124].mxu0 }
 0x510   : > { %v2946_v35 = vadd.f32 %v2945_v48, %v2694_v49  ;;  %v2947_v36 = vpop.f32.mrb[125].mxu0 }
 0x511   : > { %v2948_v33 = vadd.f32 %v2947_v36, %v2694_v49  ;;  %v2949_v38 = vpop.f32.mrb[126].mxu0  ;;  %3213 = vmatprep.subr.bf16.mxu1 %v7412_v17  ;;  %3593 = vmatprep.subr.bf16.mxu0 %v7412_v17 }
 0x512   : > { %v2950_v9 = vadd.f32 %v2949_v38, %v2699_v21  ;;  %v2951_v30 = vpop.f32.mrb[127].mxu0  ;;  %3214 = vmatpush1.bf16.msra.mxu1 %v7410_v0  ;;  %3594 = vmatpush1.bf16.msra.mxu0 %v7410_v0  ;;  %v3056_v14 = vmax.f32 %v2946_v35, 0.0 }
 0x513   : > { %v2952_v39 = vadd.f32 %v2951_v30, %v2699_v21  ;;  %v3057_v28 = vmax.f32 %v2948_v33, 0.0  ;;  %v2734_v21 = vpop.permute.xlu1 %2733 }
 0x514   : > { %v3058_v23 = vmax.f32 %v2950_v9, 0.0 }
 0x515   : > { %v3059_v46 = vmax.f32 %v2952_v39, 0.0  ;;  %v2739_v39 = vpop.permute.xlu0 %2738 }
 0x516   : > { %v7418_v40 = vpack.c.bf16 %v3058_v23, %v3056_v14 }
 0x517   : > { %v7420_v60 = vpack.c.bf16 %v3059_v46, %v3057_v28  ;;  %v2955_v18 = vpop.f32.mrb[128].mxu0 }
 0x518   : > { %v2956_v11 = vadd.f32 %v2955_v18, %v2704_v45  ;;  %v2957_v37 = vpop.f32.mrb[129].mxu0 }
 0x519   : > { %v2958_v27 = vadd.f32 %v2957_v37, %v2704_v45  ;;  %v2959_v3 = vpop.f32.mrb[130].mxu0  ;;  %3215 = vmatprep.subr.bf16.mxu1 %v7420_v60  ;;  %3595 = vmatprep.subr.bf16.mxu0 %v7420_v60 }
 0x51a   : > { %v2960_v62 = vadd.f32 %v2959_v3, %v2709_v58  ;;  %v2961_v61 = vpop.f32.mrb[131].mxu0  ;;  %3216 = vmatpush1.bf16.msra.mxu1 %v7418_v40  ;;  %3596 = vmatpush1.bf16.msra.mxu0 %v7418_v40  ;;  %v3060_v54 = vmax.f32 %v2956_v11, 0.0 }
 0x51b   : > { %v2962_v47 = vadd.f32 %v2961_v61, %v2709_v58  ;;  %v3061_v10 = vmax.f32 %v2958_v27, 0.0  ;;  %v2744_v27 = vpop.permute.xlu1 %2743 }
 0x51c   : > { %v3062_v52 = vmax.f32 %v2960_v62, 0.0 }
 0x51d   : > { %v3063_v53 = vmax.f32 %v2962_v47, 0.0 }
 0x51e   : > { %v7430_v56 = vpack.c.bf16 %v3062_v52, %v3060_v54  ;;  %v2749_v54 = vpop.permute.xlu0 %2748 }
 0x51f   : > { %v7432_v13 = vpack.c.bf16 %v3063_v53, %v3061_v10  ;;  %v2965_v43 = vpop.f32.mrb[132].mxu0 }
 0x520   : > { %v2966_v16 = vadd.f32 %v2965_v43, %v2714_v42  ;;  %v2967_v44 = vpop.f32.mrb[133].mxu0 }
 0x521   : > { %v2968_v59 = vadd.f32 %v2967_v44, %v2714_v42  ;;  %v2969_v12 = vpop.f32.mrb[134].mxu0  ;;  %3217 = vmatprep.subr.bf16.mxu1 %v7432_v13  ;;  %3597 = vmatprep.subr.bf16.mxu0 %v7432_v13 }
 0x522   : > { %v2970_v34 = vadd.f32 %v2969_v12, %v2719_v63  ;;  %v2971_v32 = vpop.f32.mrb[135].mxu0  ;;  %3218 = vmatpush1.bf16.msra.mxu1 %v7430_v56  ;;  %3598 = vmatpush1.bf16.msra.mxu0 %v7430_v56  ;;  %v3064_v29 = vmax.f32 %v2966_v16, 0.0 }
 0x523   : > { %v2972_v6 = vadd.f32 %v2971_v32, %v2719_v63  ;;  %v3065_v4 = vmax.f32 %v2968_v59, 0.0 }
 0x524   : > { %v3066_v1 = vmax.f32 %v2970_v34, 0.0  ;;  %v2754_v34 = vpop.permute.xlu1 %2753 }
 0x525   : > { %v3067_v51 = vmax.f32 %v2972_v6, 0.0 }
 0x526   : > { %v7438_v2 = vpack.c.bf16 %v3066_v1, %v3064_v29 }
 0x527   : > { %v7440_v8 = vpack.c.bf16 %v3067_v51, %v3065_v4  ;;  %v2975_v5 = vpop.f32.mrb[136].mxu0  ;;  %v2759_v4 = vpop.permute.xlu0 %2758 }
 0x528   : > { %v2976_v57 = vadd.f32 %v2975_v5, %v2724_v26  ;;  %v2977_v7 = vpop.f32.mrb[137].mxu0 }
 0x529   : > { %v2978_v55 = vadd.f32 %v2977_v7, %v2724_v26  ;;  %v2979_v41 = vpop.f32.mrb[138].mxu0  ;;  %3219 = vmatprep.subr.bf16.mxu1 %v7440_v8  ;;  %3599 = vmatprep.subr.bf16.mxu0 %v7440_v8 }
 0x52a   : > { %v2980_v22 = vadd.f32 %v2979_v41, %v2729_v31  ;;  %v2981_v24 = vpop.f32.mrb[139].mxu0  ;;  %3220 = vmatpush1.bf16.msra.mxu1 %v7438_v2  ;;  %3600 = vmatpush1.bf16.msra.mxu0 %v7438_v2  ;;  %v3068_v15 = vmax.f32 %v2976_v57, 0.0 }
 0x52b   : > { %v2982_v25 = vadd.f32 %v2981_v24, %v2729_v31  ;;  %v3069_v48 = vmax.f32 %v2978_v55, 0.0 }
 0x52c   : > { %v3070_v49 = vmax.f32 %v2980_v22, 0.0 }
 0x52d   : > { %v3071_v35 = vmax.f32 %v2982_v25, 0.0  ;;  %v2764_v25 = vpop.permute.xlu1 %2763 }
 0x52e   : > { %v7446_v36 = vpack.c.bf16 %v3070_v49, %v3068_v15 }
 0x52f   : > { %v7448_v33 = vpack.c.bf16 %v3071_v35, %v3069_v48  ;;  %v2985_v38 = vpop.f32.mrb[140].mxu0 }
 0x530   : > { %v2986_v9 = vadd.f32 %v2985_v38, %v2734_v21  ;;  %v2987_v30 = vpop.f32.mrb[141].mxu0 }
 0x531   : > { %v2988_v14 = vadd.f32 %v2987_v30, %v2734_v21  ;;  %v2989_v23 = vpop.f32.mrb[142].mxu0  ;;  %3221 = vmatprep.subr.bf16.mxu1 %v7448_v33  ;;  %3601 = vmatprep.subr.bf16.mxu0 %v7448_v33  ;;  %v2769_v21 = vpop.permute.xlu0 %2768 }
 0x532   : > { %v2990_v28 = vadd.f32 %v2989_v23, %v2739_v39  ;;  %v2991_v46 = vpop.f32.mrb[143].mxu0  ;;  %3222 = vmatpush1.bf16.msra.mxu1 %v7446_v36  ;;  %3602 = vmatpush1.bf16.msra.mxu0 %v7446_v36  ;;  %v3072_v18 = vmax.f32 %v2986_v9, 0.0 }
 0x533   : > { %v2992_v45 = vadd.f32 %v2991_v46, %v2739_v39  ;;  %v3073_v11 = vmax.f32 %v2988_v14, 0.0 }
 0x534   : > { %v3074_v19 = vmax.f32 %v2990_v28, 0.0 }
 0x535   : > { %v3075_v37 = vmax.f32 %v2992_v45, 0.0 }
 0x536   : > { %v7454_v58 = vpack.c.bf16 %v3074_v19, %v3072_v18  ;;  %v2774_v19 = vpop.permute.xlu1 %2773 }
 0x537   : > { %v7456_v3 = vpack.c.bf16 %v3075_v37, %v3073_v11  ;;  %v2995_v62 = vpop.f32.mrb[144].mxu0 }
 0x538   : > { %v2996_v61 = vadd.f32 %v2995_v62, %v2744_v27  ;;  %v2997_v47 = vpop.f32.mrb[145].mxu0 }
 0x539   : > { %v2998_v52 = vadd.f32 %v2997_v47, %v2744_v27  ;;  %v2999_v10 = vpop.f32.mrb[146].mxu0  ;;  %3223 = vmatprep.subr.bf16.mxu1 %v7456_v3  ;;  %3603 = vmatprep.subr.bf16.mxu0 %v7456_v3 }
 0x53a   : > { %v3000_v53 = vadd.f32 %v2999_v10, %v2749_v54  ;;  %v3001_v42 = vpop.f32.mrb[147].mxu0  ;;  %3224 = vmatpush1.bf16.msra.mxu1 %v7454_v58  ;;  %3604 = vmatpush1.bf16.msra.mxu0 %v7454_v58  ;;  %v3076_v16 = vmax.f32 %v2996_v61, 0.0  ;;  %v2779_v61 = vpop.permute.xlu0 %2778 }
 0x53b   : > { %v3002_v43 = vadd.f32 %v3001_v42, %v2749_v54  ;;  %v3077_v63 = vmax.f32 %v2998_v52, 0.0 }
 0x53c   : > { %v3078_v44 = vmax.f32 %v3000_v53, 0.0 }
 0x53d   : > { %v3079_v59 = vmax.f32 %v3002_v43, 0.0 }
 0x53e   : > { %v7462_v12 = vpack.c.bf16 %v3078_v44, %v3076_v16 }
 0x53f   : > { %v7464_v32 = vpack.c.bf16 %v3079_v59, %v3077_v63  ;;  %v3005_v6 = vpop.f32.mrb[148].mxu0  ;;  %v2784_v59 = vpop.permute.xlu1 %2783 }
 0x540   : > { %v3006_v29 = vadd.f32 %v3005_v6, %v2754_v34  ;;  %v3007_v1 = vpop.f32.mrb[149].mxu0 }
 0x541   : > { %v3008_v51 = vadd.f32 %v3007_v1, %v2754_v34  ;;  %v3009_v26 = vpop.f32.mrb[150].mxu0  ;;  %3225 = vmatprep.subr.bf16.mxu1 %v7464_v32  ;;  %3605 = vmatprep.subr.bf16.mxu0 %v7464_v32 }
 0x542   : > { %v3010_v5 = vadd.f32 %v3009_v26, %v2759_v4  ;;  %v3011_v57 = vpop.f32.mrb[151].mxu0  ;;  %3226 = vmatpush1.bf16.msra.mxu1 %v7462_v12  ;;  %3606 = vmatpush1.bf16.msra.mxu0 %v7462_v12  ;;  %v3080_v31 = vmax.f32 %v3006_v29, 0.0 }
 0x543   : > { %v3012_v7 = vadd.f32 %v3011_v57, %v2759_v4  ;;  %v3081_v41 = vmax.f32 %v3008_v51, 0.0  ;;  %v2789_v4 = vpop.permute.xlu0 %2788 }
 0x544   : > { %v3082_v55 = vmax.f32 %v3010_v5, 0.0 }
 0x545   : > { %v3083_v22 = vmax.f32 %v3012_v7, 0.0 }
 0x546   : > { %v7470_v24 = vpack.c.bf16 %v3082_v55, %v3080_v31 }
 0x547   : > { %v7472_v15 = vpack.c.bf16 %v3083_v22, %v3081_v41  ;;  %v3015_v49 = vpop.f32.mrb[152].mxu0 }
 0x548   : > { %v3016_v48 = vadd.f32 %v3015_v49, %v2764_v25  ;;  %v3017_v35 = vpop.f32.mrb[153].mxu0  ;;  %v2794_v49 = vpop.permute.xlu1 %2793 }
 0x549   : > { %v3018_v38 = vadd.f32 %v3017_v35, %v2764_v25  ;;  %v3019_v9 = vpop.f32.mrb[154].mxu0  ;;  %3227 = vmatprep.subr.bf16.mxu1 %v7472_v15  ;;  %3607 = vmatprep.subr.bf16.mxu0 %v7472_v15 }
 0x54a   : > { %v3020_v30 = vadd.f32 %v3019_v9, %v2769_v21  ;;  %v3021_v39 = vpop.f32.mrb[155].mxu0  ;;  %3228 = vmatpush1.bf16.msra.mxu1 %v7470_v24  ;;  %3608 = vmatpush1.bf16.msra.mxu0 %v7470_v24  ;;  %v3084_v23 = vmax.f32 %v3016_v48, 0.0 }
 0x54b   : > { %v3022_v14 = vadd.f32 %v3021_v39, %v2769_v21  ;;  %v3085_v46 = vmax.f32 %v3018_v38, 0.0 }
 0x54c   : > { %v3086_v28 = vmax.f32 %v3020_v30, 0.0 }
 0x54d   : > { %v3087_v45 = vmax.f32 %v3022_v14, 0.0 }
 0x54e   : > { %v7478_v18 = vpack.c.bf16 %v3086_v28, %v3084_v23 }
 0x54f   : > { %v7480_v11 = vpack.c.bf16 %v3087_v45, %v3085_v46  ;;  %v3025_v37 = vpop.f32.mrb[156].mxu0 }
 0x550   : > { %v3026_v27 = vadd.f32 %v3025_v37, %v2774_v19  ;;  %v3027_v62 = vpop.f32.mrb[157].mxu0  ;;  %v6038_v37 = vld [vmem:[%s8223_s7 + $0xc0] ss:$8 sps:$4 sm:$0xff]  }
 0x551   : > { %v3028_v47 = vadd.f32 %v3027_v62, %v2774_v19  ;;  %v3029_v54 = vpop.f32.mrb[158].mxu0  ;;  %3229 = vmatprep.subr.bf16.mxu1 %v7480_v11  ;;  %3609 = vmatprep.subr.bf16.mxu0 %v7480_v11  ;;  %v6020_v19 = vld [vmem:[%s8223_s7] ss:$8 sps:$4 sm:$0xff]   ;;  %v6044_v62 = vld [vmem:[%s8223_s7 + $0xd4] ss:$8 sps:$4 sm:$0xff]  }
 0x552   : > { %v3030_v52 = vadd.f32 %v3029_v54, %v2779_v61  ;;  %v3031_v10 = vpop.f32.mrb[159].mxu0  ;;  %3230 = vmatpush1.bf16.msra.mxu1 %v7478_v18  ;;  %3610 = vmatpush1.bf16.msra.mxu0 %v7478_v18  ;;  %v3088_v42 = vmax.f32 %v3026_v27, 0.0  ;;  %v6023_v27 = vld [vmem:[%s8223_s7 + $0x14] ss:$8 sps:$4 sm:$0xff]  }
 0x553   : > { %v3032_v53 = vadd.f32 %v3031_v10, %v2779_v61  ;;  %v3089_v16 = vmax.f32 %v3028_v47, 0.0  ;;  %v6025_v61 = vld [vmem:[%s8223_s7 + $0x10] ss:$8 sps:$4 sm:$0xff]   ;;  %v6041_v47 = vld [vmem:[%s8223_s7 + $0x60] ss:$8 sps:$4 sm:$0xff]  }
 0x554   : > { %v3090_v43 = vmax.f32 %v3030_v52, 0.0  ;;  %v6046_v54 = vld [vmem:[%s8223_s7 + $0x74] ss:$8 sps:$4 sm:$0xff]   ;;  %v6049_v52 = vld [vmem:[%s8223_s7 + $0x70] ss:$8 sps:$4 sm:$0xff]  }
 0x555   : > { %v3091_v44 = vmax.f32 %v3032_v53, 0.0  ;;  %v6052_v10 = vld [vmem:[%s8223_s7 + $0x84] ss:$8 sps:$4 sm:$0xff]   ;;  %v6055_v53 = vld [vmem:[%s8223_s7 + $0x80] ss:$8 sps:$4 sm:$0xff]  }
 0x556   : > { %v7486_v63 = vpack.c.bf16 %v3090_v43, %v3088_v42  ;;  %v6058_v42 = vld [vmem:[%s8223_s7 + $0x94] ss:$8 sps:$4 sm:$0xff]   ;;  %v6061_v43 = vld [vmem:[%s8223_s7 + $0x90] ss:$8 sps:$4 sm:$0xff]  }
 0x557   : > { %v7488_v34 = vpack.c.bf16 %v3091_v44, %v3089_v16  ;;  %v3035_v6 = vpop.f32.mrb[160].mxu0  ;;  %v6064_v16 = vld [vmem:[%s8223_s7 + $0xa4] ss:$8 sps:$4 sm:$0xff]   ;;  %v6067_v44 = vld [vmem:[%s8223_s7 + $0xa0] ss:$8 sps:$4 sm:$0xff]  }
 0x558   : > { %v3036_v29 = vadd.f32 %v3035_v6, %v2784_v59  ;;  %v3037_v1 = vpop.f32.mrb[161].mxu0 }
 0x559   : > { %v3038_v51 = vadd.f32 %v3037_v1, %v2784_v59  ;;  %v3039_v26 = vpop.f32.mrb[162].mxu0  ;;  %3231 = vmatprep.subr.bf16.mxu1 %v7488_v34  ;;  %3611 = vmatprep.subr.bf16.mxu0 %v7488_v34  ;;  %v6073_v59 = vld [vmem:[%s8223_s7 + $0xb0] ss:$8 sps:$4 sm:$0x1f]  }
 0x55a   : > { %v3040_v5 = vadd.f32 %v3039_v26, %v2789_v4  ;;  %v3041_v57 = vpop.f32.mrb[163].mxu0  ;;  %3232 = vmatpush1.bf16.msra.mxu1 %v7486_v63  ;;  %3612 = vmatpush1.bf16.msra.mxu0 %v7486_v63  ;;  %v3092_v31 = vmax.f32 %v3036_v29, 0.0 }
 0x55b   : > { %v3042_v7 = vadd.f32 %v3041_v57, %v2789_v4  ;;  %v3093_v41 = vmax.f32 %v3038_v51, 0.0 }
 0x55c   : > { %v3094_v55 = vmax.f32 %v3040_v5, 0.0 }
 0x55d   : > { %v3095_v22 = vmax.f32 %v3042_v7, 0.0 }
 0x55e   : > { %v7494_v25 = vpack.c.bf16 %v3094_v55, %v3092_v31 }
 0x55f   : > { %v7496_v48 = vpack.c.bf16 %v3095_v22, %v3093_v41  ;;  %v3045_v35 = vpop.f32.mrb[164].mxu0 }
 0x560   : > { %v3046_v21 = vadd.f32 %v3045_v35, %v2794_v49  ;;  %v3047_v38 = vpop.f32.mrb[165].mxu0 }
 0x561   : > { %v3048_v9 = vadd.f32 %v3047_v38, %v2794_v49  ;;  %v3049_v30 = vpop.f32.mrb[166].mxu0  ;;  %3233 = vmatprep.subr.bf16.mxu1 %v7496_v48  ;;  %3613 = vmatprep.subr.bf16.mxu0 %v7496_v48 }
 0x562   : > { %v3096_v39 = vmax.f32 %v3046_v21, 0.0  ;;  %v3050_v14 = vpop.f32.mrb[167].mxu0  ;;  %3234 = vmatpush1.bf16.msra.mxu1 %v7494_v25  ;;  %3614 = vmatpush1.bf16.msra.mxu0 %v7494_v25 }
 0x563   : > { %v3097_v23 = vmax.f32 %v3048_v9, 0.0 }
 0x564   : > { %v3120_v28 = vpack.c.bf16 %v3096_v39, %v3096_v39 }
 0x565   : > { %v7502_v46 = vpack.c.bf16 %v3097_v23, %v3097_v23 }
 0x566   : > { %v7505_v45 = vsel %vm1409_vm2, %v3120_v28, 0 }
 0x567   : > { %5598 = vmatprep.subr.msk.bf16.mxu1 %vm1409_vm2, %v7502_v46  ;;  %5660 = vmatprep.subr.msk.bf16.mxu0 %vm1409_vm2, %v7502_v46 }
 0x568   : > { %3236 = vmatpush1.bf16.msra.mxu1 %v7505_v45  ;;  %3616 = vmatpush1.bf16.msra.mxu0 %v7505_v45 }
 0x569   : > { %3391 = vmatprep.subr.bf16.mxu1 %v7412_v17  ;;  %v6048_v17 = vld [vmem:[%s8223_s7 + $0xd0] ss:$8 sps:$4 sm:$0xff]  }
 0x56b   : > { %3246 = vmatmul.mubr.bf16.vlgmr.msra.gmra.mrb[112].mxu1 %v6020_v19  ;;  %3626 = vmatmul.mubr.bf16.vlgmr.msra.gmra.mrb[168].mxu0 %v6038_v37 }
 0x56c   : > { %3392 = vmatpush1.bf16.msra.mxu1 %v7410_v0  ;;  %5600 = vmatprep.mubr.msk.bf16.mxu1 %vm3188_vm9, %v6023_v27  ;;  %v6026_v0 = vld [vmem:[%s8223_s7 + $0x24] ss:$8 sps:$4 sm:$0xff]  }
 0x56d   : > { %3393 = vmatprep.subr.bf16.mxu1 %v7420_v60  ;;  %5662 = vmatprep.mubr.msk.bf16.mxu0 %vm3188_vm9, %v6044_v62  ;;  %v6050_v60 = vld [vmem:[%s8223_s7 + $0xe4] ss:$8 sps:$4 sm:$0xff]  }
 0x570   : > { %3394 = vmatpush1.bf16.msra.mxu1 %v7418_v40  ;;  %v6028_v40 = vld [vmem:[%s8223_s7 + $0x20] ss:$8 sps:$4 sm:$0xff]  }
 0x571   : > { %3395 = vmatprep.subr.bf16.mxu1 %v7432_v13  ;;  %v6054_v13 = vld [vmem:[%s8223_s7 + $0xe0] ss:$8 sps:$4 sm:$0xff]  }
 0x573   : > { %3256 = vmatmul.mubr.bf16.gmra.mrb[116].mxu1 %v6025_v61  ;;  %3636 = vmatmul.mubr.bf16.gmra.mrb[172].mxu0 %v6048_v17 }
 0x574   : > { %3396 = vmatpush1.bf16.msra.mxu1 %v7430_v56  ;;  %5601 = vmatprep.mubr.msk.bf16.mxu1 %vm3188_vm9, %v6026_v0  ;;  %v6029_v56 = vld [vmem:[%s8223_s7 + $0x34] ss:$8 sps:$4 sm:$0xff]  }
 0x575   : > { %3397 = vmatprep.subr.bf16.mxu1 %v7440_v8  ;;  %5663 = vmatprep.mubr.msk.bf16.mxu0 %vm3188_vm9, %v6050_v60  ;;  %v6056_v8 = vld [vmem:[%s8223_s7 + $0xf4] ss:$8 sps:$4 sm:$0xff]  }
 0x578   : > { %3398 = vmatpush1.bf16.msra.mxu1 %v7438_v2  ;;  %v6031_v2 = vld [vmem:[%s8223_s7 + $0x30] ss:$8 sps:$4 sm:$0xff]  }
 0x579   : > { %3399 = vmatprep.subr.bf16.mxu1 %v7448_v33  ;;  %v6060_v33 = vld [vmem:[%s8223_s7 + $0xf0] ss:$8 sps:$4 sm:$0xff]  }
 0x57b   : > { %3266 = vmatmul.mubr.bf16.gmra.mrb[120].mxu1 %v6028_v40  ;;  %3646 = vmatmul.mubr.bf16.gmra.mrb[176].mxu0 %v6054_v13 }
 0x57c   : > { %3400 = vmatpush1.bf16.msra.mxu1 %v7446_v36  ;;  %5602 = vmatprep.mubr.msk.bf16.mxu1 %vm3188_vm9, %v6029_v56  ;;  %v6032_v36 = vld [vmem:[%s8223_s7 + $0x44] ss:$8 sps:$4 sm:$0xff]  }
 0x57d   : > { %3401 = vmatprep.subr.bf16.mxu1 %v7456_v3  ;;  %5664 = vmatprep.mubr.msk.bf16.mxu0 %vm3188_vm9, %v6056_v8  ;;  %v6062_v3 = vld [vmem:[%s8223_s7 + $0x104] ss:$8 sps:$4 sm:$0xff]  }
 0x580   : > { %3402 = vmatpush1.bf16.msra.mxu1 %v7454_v58  ;;  %v6034_v58 = vld [vmem:[%s8223_s7 + $0x40] ss:$8 sps:$4 sm:$0xff]  }
 0x581   : > { %3403 = vmatprep.subr.bf16.mxu1 %v7464_v32  ;;  %v6066_v32 = vld [vmem:[%s8223_s7 + $0x100] ss:$8 sps:$4 sm:$0xff]  }
 0x583   : > { %3276 = vmatmul.mubr.bf16.gmra.mrb[124].mxu1 %v6031_v2  ;;  %3656 = vmatmul.mubr.bf16.gmra.mrb[180].mxu0 %v6060_v33 }
 0x584   : > { %3404 = vmatpush1.bf16.msra.mxu1 %v7462_v12  ;;  %5603 = vmatprep.mubr.msk.bf16.mxu1 %vm3188_vm9, %v6032_v36  ;;  %v6035_v12 = vld [vmem:[%s8223_s7 + $0x54] ss:$8 sps:$4 sm:$0x1f]  }
 0x585   : > { %3405 = vmatprep.subr.bf16.mxu1 %v7472_v15  ;;  %5665 = vmatprep.mubr.msk.bf16.mxu0 %vm3188_vm9, %v6062_v3  ;;  %v6068_v15 = vld [vmem:[%s8223_s7 + $0x114] ss:$8 sps:$4 sm:$0x1f]  }
 0x588   : > { %3406 = vmatpush1.bf16.msra.mxu1 %v7470_v24  ;;  %v6037_v24 = vld [vmem:[%s8223_s7 + $0x50] ss:$8 sps:$4 sm:$0x1f]  }
 0x589   : > { %3407 = vmatprep.subr.bf16.mxu1 %v7480_v11  ;;  %v6072_v11 = vld [vmem:[%s8223_s7 + $0x110] ss:$8 sps:$4 sm:$0x1f]  }
 0x58b   : > { %3286 = vmatmul.mubr.bf16.gmra.mrb[128].mxu1 %v6034_v58  ;;  %3666 = vmatmul.mubr.bf16.gmra.mrb[184].mxu0 %v6066_v32 }
 0x58c   : > { %3408 = vmatpush1.bf16.msra.mxu1 %v7478_v18  ;;  %5604 = vmatprep.mubr.msk.bf16.mxu1 %vm3188_vm9, %v6035_v12  ;;  %v6043_v18 = vld [vmem:[%s8223_s7 + $0x64] ss:$8 sps:$4 sm:$0xff]  }
 0x58d   : > { %3409 = vmatprep.subr.bf16.mxu1 %v7488_v34  ;;  %5666 = vmatprep.mubr.msk.bf16.mxu0 %vm3188_vm9, %v6068_v15 }
 0x590   : > { %3410 = vmatpush1.bf16.msra.mxu1 %v7486_v63  ;;  %v6070_v63 = vld [vmem:[%s8223_s7 + $0xb4] ss:$8 sps:$4 sm:$0x1f]  }
 0x591   : > { %3411 = vmatprep.subr.bf16.mxu1 %v7496_v48 }
 0x593   : > { %3296 = vmatmul.mubr.bf16.gmra.mrb[132].mxu1 %v6037_v24  ;;  %3676 = vmatmul.mubr.bf16.gmra.mrb[188].mxu0 %v6072_v11 }
 0x594   : > { %3412 = vmatpush1.bf16.msra.mxu1 %v7494_v25  ;;  %5630 = vmatprep.mubr.msk.bf16.mxu1 %vm3188_vm9, %v6043_v18 }
 0x595   : > { %5629 = vmatprep.subr.msk.bf16.mxu1 %vm1409_vm2, %v7502_v46  ;;  %3885 = vmatprep.mubr.bf16.mxu0 %v8275_v50 }
 0x598   : > { %3414 = vmatpush1.bf16.msra.mxu1 %v7505_v45 }
 0x59b   : > { %3424 = vmatmul.mubr.bf16.vlgmr.msra.gmra.mrb[136].mxu1 %v6041_v47 }
 0x59c   : > { %5631 = vmatprep.mubr.msk.bf16.mxu1 %vm3188_vm9, %v6046_v54 }
 0x5a3   : > { %3434 = vmatmul.mubr.bf16.gmra.mrb[140].mxu1 %v6049_v52 }
 0x5a4   : > { %5632 = vmatprep.mubr.msk.bf16.mxu1 %vm3188_vm9, %v6052_v10 }
 0x5ab   : > { %3444 = vmatmul.mubr.bf16.gmra.mrb[144].mxu1 %v6055_v53 }
 0x5ac   : > { %5633 = vmatprep.mubr.msk.bf16.mxu1 %vm3188_vm9, %v6058_v42 }
 0x5b3   : > { %3454 = vmatmul.mubr.bf16.gmra.mrb[148].mxu1 %v6061_v43 }
 0x5b4   : > { %5634 = vmatprep.mubr.msk.bf16.mxu1 %vm3188_vm9, %v6064_v16 }
 0x5bb   : > { %3464 = vmatmul.mubr.bf16.gmra.mrb[152].mxu1 %v6067_v44 }
 0x5bc   : > { %5635 = vmatprep.mubr.msk.bf16.mxu1 %vm3188_vm9, %v6070_v63 }
 0x5c3   : > { %3474 = vmatmul.mubr.bf16.gmra.mrb[156].mxu1 %v6073_v59 }
 0x5c4   : > { %3791 = vmatprep.mubr.bf16.mxu1 %v8275_v50 }
 0x63e   : > { %v3247_v34 = vpop.f32.mrb[112].mxu1  ;;  %v3627_v6 = vpop.f32.mrb[168].mxu0 }
 0x63f   : > { %v3249_v29 = vpop.f32.mrb[113].mxu1  ;;  %v3629_v1 = vpop.f32.mrb[169].mxu0 }
 0x640   : > { %v3251_v4 = vpop.f32.mrb[114].mxu1  ;;  %v3631_v51 = vpop.f32.mrb[170].mxu0 }
 0x641   : > { %v3253_v26 = vpop.f32.mrb[115].mxu1  ;;  %v3633_v5 = vpop.f32.mrb[171].mxu0 }
 0x646   : > { %v3257_v57 = vpop.f32.mrb[116].mxu1  ;;  %v3637_v7 = vpop.f32.mrb[172].mxu0 }
 0x647   : > { %v7658_v31 = vpop.f32.mrb[117].mxu1  ;;  %v7660_v55 = vpop.f32.mrb[173].mxu0 }
 0x648   : > { %v7662_v41 = vpop.f32.mrb[118].mxu1  ;;  %v7664_v22 = vpop.f32.mrb[174].mxu0 }
 0x649   : > { %v7666_v25 = vpop.f32.mrb[119].mxu1  ;;  %v3643_v49 = vpop.f32.mrb[175].mxu0 }
 0x64e   : > { %v7668_v48 = vpop.f32.mrb[120].mxu1  ;;  %v7670_v35 = vpop.f32.mrb[176].mxu0 }
 0x64f   : > { %v7672_v21 = vpop.f32.mrb[121].mxu1  ;;  %v7674_v38 = vpop.f32.mrb[177].mxu0 }
 0x650   : > { %v7676_v9 = vpop.f32.mrb[122].mxu1  ;;  %v7678_v30 = vpop.f32.mrb[178].mxu0 }
 0x651   : > { %v7680_v39 = vpop.f32.mrb[123].mxu1  ;;  %v7682_v14 = vpop.f32.mrb[179].mxu0 }
 0x656   : > { %v7684_v23 = vpop.f32.mrb[124].mxu1  ;;  %v7686_v28 = vpop.f32.mrb[180].mxu0 }
 0x657   : > { %v7688_v46 = vpop.f32.mrb[125].mxu1  ;;  %v7690_v45 = vpop.f32.mrb[181].mxu0 }
 0x658   : > { %v7692_v19 = vpop.f32.mrb[126].mxu1  ;;  %v7694_v37 = vpop.f32.mrb[182].mxu0 }
 0x659   : > { %v7696_v27 = vpop.f32.mrb[127].mxu1  ;;  %v7698_v62 = vpop.f32.mrb[183].mxu0 }
 0x65e   : > { %v7700_v61 = vpop.f32.mrb[128].mxu1  ;;  %v7702_v17 = vpop.f32.mrb[184].mxu0 }
 0x65f   : > { %v7704_v0 = vpop.f32.mrb[129].mxu1  ;;  %v7706_v60 = vpop.f32.mrb[185].mxu0 }
 0x660   : > { %v7708_v40 = vpop.f32.mrb[130].mxu1  ;;  %v7710_v13 = vpop.f32.mrb[186].mxu0 }
 0x661   : > { %v7712_v56 = vpop.f32.mrb[131].mxu1  ;;  %v7714_v8 = vpop.f32.mrb[187].mxu0 }
 0x666   : > { %v7716_v2 = vpop.f32.mrb[132].mxu1  ;;  %v7718_v33 = vpop.f32.mrb[188].mxu0 }
 0x667   : > { %v7720_v36 = vpop.f32.mrb[133].mxu1  ;;  %v7722_v3 = vpop.f32.mrb[189].mxu0 }
 0x668   : > { %v7724_v58 = vpop.f32.mrb[134].mxu1  ;;  %v7726_v32 = vpop.f32.mrb[190].mxu0 }
 0x669   : > { %8276 = vst [vmem:[#allocation3_spill] sm:$0xff] %v7726_v32  ;;  %v7728_v12 = vpop.f32.mrb[135].mxu1  ;;  %v7730_v15 = vpop.f32.mrb[191].mxu0 }
 0x66a   : > { %8277 = vst [vmem:[#allocation5_spill] sm:$0xff] %v7730_v15 }
 0x66e   : > { %v3425_v24 = vpop.f32.mrb[136].mxu1 }
 0x66f   : > { %v3484_v11 = vmax.f32 %v3247_v34, %v3425_v24  ;;  %v3427_v18 = vpop.f32.mrb[137].mxu1 }
 0x670   : > { %v3485_v47 = vmax.f32 %v3249_v29, %v3427_v18  ;;  %v3429_v54 = vpop.f32.mrb[138].mxu1 }
 0x671   : > { %v3686_v52 = vmax.f32 %v3484_v11, %v3627_v6  ;;  %v3486_v10 = vmax.f32 %v3251_v4, %v3429_v54  ;;  %v3431_v53 = vpop.f32.mrb[139].mxu1 }
 0x672   : > { %v3687_v42 = vmax.f32 %v3485_v47, %v3629_v1  ;;  %v3487_v43 = vmax.f32 %v3253_v26, %v3431_v53 }
 0x673   : > { %v3688_v16 = vmax.f32 %v3486_v10, %v3631_v51 }
 0x674   : > { %v3689_v44 = vmax.f32 %v3487_v43, %v3633_v5 }
 0x675   : > { %v7732_v63 = vpack.c.bf16 %v3688_v16, %v3686_v52 }
 0x676   : > { %v3435_v59 = vpop.f32.mrb[140].mxu1  ;;  %v7734_v20 = vpack.c.bf16 %v3689_v44, %v3687_v42 }
 0x677   : > { %v3488_v50 = vmax.f32 %v3257_v57, %v3435_v59  ;;  %v3437_v32 = vpop.f32.mrb[141].mxu1 }
 0x678   : > { %v3489_v15 = vmax.f32 %v7658_v31, %v3437_v32  ;;  %v3439_v34 = vpop.f32.mrb[142].mxu1  ;;  %3759 = vmatprep.subr.bf16.mxu1 %v7734_v20  ;;  %3853 = vmatprep.subr.bf16.mxu0 %v7734_v20 }
 0x679   : > { %v3690_v6 = vmax.f32 %v3488_v50, %v3637_v7  ;;  %v3490_v29 = vmax.f32 %v7662_v41, %v3439_v34  ;;  %v3441_v1 = vpop.f32.mrb[143].mxu1  ;;  %3760 = vmatpush1.bf16.msra.mxu1 %v7732_v63  ;;  %3854 = vmatpush1.bf16.msra.mxu0 %v7732_v63 }
 0x67a   : > { %v3691_v4 = vmax.f32 %v3489_v15, %v7660_v55  ;;  %v3491_v51 = vmax.f32 %v7666_v25, %v3441_v1 }
 0x67b   : > { %v3692_v26 = vmax.f32 %v3490_v29, %v7664_v22 }
 0x67c   : > { %v3693_v5 = vmax.f32 %v3491_v51, %v3643_v49 }
 0x67d   : > { %v7745_v57 = vpack.c.bf16 %v3692_v26, %v3690_v6  ;;  %v8278_v26 = vld [vmem:[#allocation3_spill] sm:$0xff] }
 0x67e   : > { %v3445_v31 = vpop.f32.mrb[144].mxu1  ;;  %v7747_v32 = vpack.c.bf16 %v3693_v5, %v3691_v4 }
 0x67f   : > { %v3492_v50 = vmax.f32 %v7668_v48, %v3445_v31  ;;  %v3447_v7 = vpop.f32.mrb[145].mxu1 }
 0x680   : > { %v3493_v41 = vmax.f32 %v7672_v21, %v3447_v7  ;;  %v3449_v24 = vpop.f32.mrb[146].mxu1  ;;  %3761 = vmatprep.subr.bf16.mxu1 %v7747_v32  ;;  %3855 = vmatprep.subr.bf16.mxu0 %v7747_v32 }
 0x681   : > { %v3694_v55 = vmax.f32 %v3492_v50, %v7670_v35  ;;  %v3494_v22 = vmax.f32 %v7676_v9, %v3449_v24  ;;  %v3451_v25 = vpop.f32.mrb[147].mxu1  ;;  %3762 = vmatpush1.bf16.msra.mxu1 %v7745_v57  ;;  %3856 = vmatpush1.bf16.msra.mxu0 %v7745_v57  ;;  %v6082_v24 = vld [vmem:[%s8224_s8 + $0x40] sm:$0x7f]  }
 0x682   : > { %v3695_v49 = vmax.f32 %v3493_v41, %v7674_v38  ;;  %v3495_v48 = vmax.f32 %v7680_v39, %v3451_v25  ;;  %v6081_v41 = vld [vmem:[%s8224_s8 + $0x38] sm:$0xff]  }
 0x683   : > { %v3696_v21 = vmax.f32 %v3494_v22, %v7678_v30 }
 0x684   : > { %v3697_v15 = vmax.f32 %v3495_v48, %v7682_v14 }
 0x685   : > { %v7761_v11 = vpack.c.bf16 %v3696_v21, %v3694_v55 }
 0x686   : > { %v3455_v18 = vpop.f32.mrb[148].mxu1  ;;  %v7763_v47 = vpack.c.bf16 %v3697_v15, %v3695_v49 }
 0x687   : > { %v3496_v35 = vmax.f32 %v7684_v23, %v3455_v18  ;;  %v3457_v9 = vpop.f32.mrb[149].mxu1 }
 0x688   : > { %v3497_v54 = vmax.f32 %v7688_v46, %v3457_v9  ;;  %v3459_v52 = vpop.f32.mrb[150].mxu1  ;;  %3763 = vmatprep.subr.bf16.mxu1 %v7763_v47  ;;  %3857 = vmatprep.subr.bf16.mxu0 %v7763_v47 }
 0x689   : > { %v3698_v38 = vmax.f32 %v3496_v35, %v7686_v28  ;;  %v3498_v30 = vmax.f32 %v7692_v19, %v3459_v52  ;;  %v3461_v39 = vpop.f32.mrb[151].mxu1  ;;  %3764 = vmatpush1.bf16.msra.mxu1 %v7761_v11  ;;  %3858 = vmatpush1.bf16.msra.mxu0 %v7761_v11 }
 0x68a   : > { %v3699_v14 = vmax.f32 %v3497_v54, %v7690_v45  ;;  %v3499_v23 = vmax.f32 %v7696_v27, %v3461_v39 }
 0x68b   : > { %v3700_v46 = vmax.f32 %v3498_v30, %v7694_v37 }
 0x68c   : > { %v3701_v10 = vmax.f32 %v3499_v23, %v7698_v62 }
 0x68d   : > { %v7777_v53 = vpack.c.bf16 %v3700_v46, %v3698_v38 }
 0x68e   : > { %v3465_v42 = vpop.f32.mrb[152].mxu1  ;;  %v3717_v43 = vpack.c.bf16 %v3701_v10, %v3699_v14 }
 0x68f   : > { %v3500_v28 = vmax.f32 %v7700_v61, %v3465_v42  ;;  %v3467_v19 = vpop.f32.mrb[153].mxu1 }
 0x690   : > { %v3501_v16 = vmax.f32 %v7704_v0, %v3467_v19  ;;  %v3469_v44 = vpop.f32.mrb[154].mxu1  ;;  %3765 = vmatprep.subr.bf16.mxu1 %v3717_v43  ;;  %3859 = vmatprep.subr.bf16.mxu0 %v3717_v43 }
 0x691   : > { %v3702_v45 = vmax.f32 %v3500_v28, %v7702_v17  ;;  %v3502_v27 = vmax.f32 %v7708_v40, %v3469_v44  ;;  %v3471_v59 = vpop.f32.mrb[155].mxu1  ;;  %3766 = vmatpush1.bf16.msra.mxu1 %v7777_v53  ;;  %3860 = vmatpush1.bf16.msra.mxu0 %v7777_v53 }
 0x692   : > { %v3703_v37 = vmax.f32 %v3501_v16, %v7706_v60  ;;  %v3503_v62 = vmax.f32 %v7712_v56, %v3471_v59 }
 0x693   : > { %v3704_v61 = vmax.f32 %v3502_v27, %v7710_v13 }
 0x694   : > { %v3705_v0 = vmax.f32 %v3503_v62, %v7714_v8 }
 0x695   : > { %v3718_v34 = vpack.c.bf16 %v3704_v61, %v3702_v45 }
 0x696   : > { %v3475_v6 = vpop.f32.mrb[156].mxu1  ;;  %v3719_v29 = vpack.c.bf16 %v3705_v0, %v3703_v37 }
 0x697   : > { %v3504_v17 = vmax.f32 %v7716_v2, %v3475_v6  ;;  %v3477_v1 = vpop.f32.mrb[157].mxu1  ;;  %v8279_v2 = vld [vmem:[#allocation5_spill] sm:$0xff] }
 0x698   : > { %v3505_v40 = vmax.f32 %v7720_v36, %v3477_v1  ;;  %v3479_v4 = vpop.f32.mrb[158].mxu1  ;;  %3767 = vmatprep.subr.bf16.mxu1 %v3719_v29  ;;  %3861 = vmatprep.subr.bf16.mxu0 %v3719_v29 }
 0x699   : > { %v3706_v51 = vmax.f32 %v3504_v17, %v7718_v33  ;;  %v3506_v60 = vmax.f32 %v7724_v58, %v3479_v4  ;;  %v3481_v56 = vpop.f32.mrb[159].mxu1  ;;  %3768 = vmatpush1.bf16.msra.mxu1 %v3718_v34  ;;  %3862 = vmatpush1.bf16.msra.mxu0 %v3718_v34  ;;  %v6074_v33 = vld [vmem:[%s8224_s8] sm:$0xff]   ;;  %v8280_v58 = vmov 0  }
 0x69a   : > { %v3707_v13 = vmax.f32 %v3505_v40, %v7722_v3  ;;  %v3507_v8 = vmax.f32 %v7728_v12, %v3481_v56  ;;  %v6075_v3 = vld [vmem:[%s8224_s8 + $0x18] sm:$0xff]   ;;  %v6076_v12 = vld [vmem:[%s8224_s8 + $0x8] sm:$0xff]  }
 0x69b   : > { %v3708_v5 = vmax.f32 %v3506_v60, %v8278_v26 }
 0x69c   : > { %v3709_v31 = vmax.f32 %v3507_v8, %v8279_v2 }
 0x69d   : > { %v3720_v50 = vpack.c.bf16 %v3708_v5, %v3706_v51 }
 0x69e   : > { %v3721_v36 = vpack.c.bf16 %v3709_v31, %v3707_v13 }
 0x69f   : > { %v3754_v7 = vsel %vm2891_vm6, %v3720_v50, 0 }
 0x6a0   : > { %5670 = vmatprep.subr.msk.bf16.mxu1 %vm2891_vm6, %v3721_v36  ;;  %5683 = vmatprep.subr.msk.bf16.mxu0 %vm2891_vm6, %v3721_v36 }
 0x6a1   : > { %3770 = vmatpush1.bf16.msra.mxu1 %v3754_v7  ;;  %3864 = vmatpush1.bf16.msra.mxu0 %v3754_v7 }
 0x6a2   : > { %3959 = vmatprep.subr.bf16.mxu1 %v7734_v20  ;;  %v6077_v20 = vld [vmem:[%s8224_s8 + $0x20] sm:$0xff]  }
 0x6a4   : > { %5671 = vmatmul.mubr.msk.bf16.vlgmr.msra.gmra.mrb[160].mxu1 %vm3743_vm10, %v6074_v33  ;;  %5684 = vmatmul.mubr.msk.bf16.vlgmr.msra.gmra.mrb[192].mxu0 %vm3743_vm10, %v6075_v3 }
 0x6a5   : > { %3960 = vmatpush1.bf16.msra.mxu1 %v7732_v63  ;;  %3801 = vmatprep.mubr.bf16.mxu1 %v8280_v58  ;;  %v6078_v63 = vld [vmem:[%s8224_s8 + $0x10] sm:$0x7f]  }
 0x6a6   : > { %3961 = vmatprep.subr.bf16.mxu1 %v7747_v32  ;;  %3895 = vmatprep.mubr.bf16.mxu0 %v8280_v58  ;;  %v6080_v32 = vld [vmem:[%s8224_s8 + $0x30] sm:$0xff]  }
 0x6a9   : > { %3962 = vmatpush1.bf16.msra.mxu1 %v7745_v57  ;;  %v6079_v57 = vld [vmem:[%s8224_s8 + $0x28] sm:$0x7f]  }
 0x6aa   : > { %3963 = vmatprep.subr.bf16.mxu1 %v7763_v47 }
 0x6ac   : > { %5672 = vmatmul.mubr.msk.bf16.gmra.mrb[164].mxu1 %vm3743_vm10, %v6076_v12  ;;  %5685 = vmatmul.mubr.msk.bf16.gmra.mrb[196].mxu0 %vm3743_vm10, %v6077_v20 }
 0x6ad   : > { %3964 = vmatpush1.bf16.msra.mxu1 %v7761_v11  ;;  %3811 = vmatprep.mubr.bf16.mxu1 %v8280_v58 }
 0x6ae   : > { %3965 = vmatprep.subr.bf16.mxu1 %v3717_v43  ;;  %3905 = vmatprep.mubr.bf16.mxu0 %v8280_v58 }
 0x6b1   : > { %3966 = vmatpush1.bf16.msra.mxu1 %v7777_v53 }
 0x6b2   : > { %3967 = vmatprep.subr.bf16.mxu1 %v3719_v29 }
 0x6b4   : > { %5673 = vmatmul.mubr.msk.bf16.gmra.mrb[168].mxu1 %vm3743_vm10, %v6078_v63  ;;  %5686 = vmatmul.mubr.msk.bf16.gmra.mrb[200].mxu0 %vm3743_vm10, %v6079_v57 }
 0x6b5   : > { %3968 = vmatpush1.bf16.msra.mxu1 %v3718_v34  ;;  %3991 = vmatprep.mubr.bf16.mxu1 %v8280_v58 }
 0x6b6   : > { %5696 = vmatprep.subr.msk.bf16.mxu1 %vm2891_vm6, %v3721_v36  ;;  %4280 = vmatprep.mubr.bf16.mxu0 %v8280_v58 }
 0x6b9   : > { %3970 = vmatpush1.bf16.msra.mxu1 %v3754_v7 }
 0x6bc   : > { %5697 = vmatmul.mubr.msk.bf16.vlgmr.msra.gmra.mrb[172].mxu1 %vm3743_vm10, %v6080_v32 }
 0x6bd   : > { %4001 = vmatprep.mubr.bf16.mxu1 %v8280_v58 }
 0x6c4   : > { %5698 = vmatmul.mubr.msk.bf16.gmra.mrb[176].mxu1 %vm3743_vm10, %v6081_v41  ;;  %v8281_v41 = vmov 65535  }
 0x6c5   : > { %4011 = vmatprep.mubr.bf16.mxu1 %v8280_v58 }
 0x6cc   : > { %5699 = vmatmul.mubr.msk.bf16.gmra.mrb[180].mxu1 %vm3743_vm10, %v6082_v24  ;;  %v4240_v24 = vsel %vm2892_vm7, 4294967295, %v8281_v41 }
 0x777   : > { %v3793_v55 = vpop.f32.mrb[160].mxu1  ;;  %v3887_v22 = vpop.f32.mrb[192].mxu0 }
 0x778   : > { %v3916_v25 = vmax.f32 %v3793_v55, %v3887_v22  ;;  %v3795_v49 = vpop.f32.mrb[161].mxu1  ;;  %v3889_v48 = vpop.f32.mrb[193].mxu0 }
 0x779   : > { %v3917_v21 = vmax.f32 %v3795_v49, %v3889_v48  ;;  %v3797_v15 = vpop.f32.mrb[162].mxu1  ;;  %v3891_v11 = vpop.f32.mrb[194].mxu0  ;;  %v4241_v48 = vsel %vm4239_vm11, %v4240_v24, 0 }
 0x77a   : > { %v3918_v18 = vmax.f32 %v3797_v15, %v3891_v11  ;;  %v3799_v47 = vpop.f32.mrb[163].mxu1  ;;  %v3893_v35 = vpop.f32.mrb[195].mxu0 }
 0x77b   : > { %v3919_v9 = vmax.f32 %v3799_v47, %v3893_v35  ;;  %v6084_v47 = vld [vmem:[%s8225_s9 + $0x8] sm:$0xff]   ;;  %v6085_v35 = vld [vmem:[%s8225_s9 + $0x10] sm:$0xff]  }
 0x77f   : > { %v3803_v54 = vpop.f32.mrb[164].mxu1  ;;  %v3897_v52 = vpop.f32.mrb[196].mxu0 }
 0x780   : > { %v3920_v38 = vmax.f32 %v3803_v54, %v3897_v52  ;;  %v3805_v30 = vpop.f32.mrb[165].mxu1  ;;  %v3899_v39 = vpop.f32.mrb[197].mxu0  ;;  %v6087_v54 = vld [vmem:[%s8225_s9 + $0x20] sm:$0xff]   ;;  %v6088_v52 = vld [vmem:[%s8225_s9 + $0x28] sm:$0xff]  }
 0x781   : > { %v3921_v14 = vmax.f32 %v3805_v30, %v3899_v39  ;;  %v3807_v23 = vpop.f32.mrb[166].mxu1  ;;  %v3901_v46 = vpop.f32.mrb[198].mxu0  ;;  %v6090_v30 = vld [vmem:[%s8225_s9 + $0x38] sm:$0xff]   ;;  %v6091_v39 = vld [vmem:[%s8225_s9 + $0x40] sm:$0xff]  }
 0x782   : > { %v3922_v10 = vmax.f32 %v3807_v23, %v3901_v46  ;;  %v3809_v53 = vpop.f32.mrb[167].mxu1  ;;  %v3903_v42 = vpop.f32.mrb[199].mxu0  ;;  %v6108_v23 = vld [vmem:[%s8227_s11 + $0x94] ss:$8 sps:$4 sm:$0xff]  }
 0x783   : > { %v3923_v43 = vmax.f32 %v3809_v53, %v3903_v42  ;;  %v4079_v46 = vpop.permute.xlu0 %4078 }
 0x787   : > { %v3813_v28 = vpop.f32.mrb[168].mxu1  ;;  %v3907_v19 = vpop.f32.mrb[200].mxu0 }
 0x788   : > { %v3924_v16 = vmax.f32 %v3813_v28, %v3907_v19  ;;  %v3815_v44 = vpop.f32.mrb[169].mxu1  ;;  %v3909_v45 = vpop.f32.mrb[201].mxu0 }
 0x789   : > { %v3925_v27 = vmax.f32 %v3815_v44, %v3909_v45  ;;  %v3817_v59 = vpop.f32.mrb[170].mxu1  ;;  %v3911_v37 = vpop.f32.mrb[202].mxu0 }
 0x78a   : > { %v3926_v62 = vmax.f32 %v3817_v59, %v3911_v37  ;;  %v3819_v61 = vpop.f32.mrb[171].mxu1  ;;  %v3913_v0 = vpop.f32.mrb[203].mxu0 }
 0x78b   : > { %v3927_v34 = vmax.f32 %v3819_v61, %v3913_v0  ;;  %v4089_v0 = vpop.permute.xlu0 %4088 }
 0x78f   : > { %v3993_v6 = vpop.f32.mrb[172].mxu1 }
 0x790   : > { %v4022_v29 = vmax.f32 %v3916_v25, %v3993_v6  ;;  %v3995_v17 = vpop.f32.mrb[173].mxu1 }
 0x791   : > { %v4023_v1 = vmax.f32 %v3917_v21, %v3995_v17  ;;  %v3997_v40 = vpop.f32.mrb[174].mxu1 }
 0x792   : > { %v4024_v4 = vmax.f32 %v3918_v18, %v3997_v40  ;;  %v3999_v51 = vpop.f32.mrb[175].mxu1  ;;  %v6083_v18 = vld [vmem:[%s8225_s9] sm:$0xff]  }
 0x793   : > { %v4025_v60 = vmax.f32 %v3919_v9, %v3999_v51  ;;  %v6086_v9 = vld [vmem:[%s8225_s9 + $0x18] sm:$0xff]  }
 0x794   : > { %v4034_v56 = vpack.c.bf16 %v4024_v4, %v4022_v29 }
 0x795   : > { %v4035_v13 = vpack.c.bf16 %v4025_v60, %v4023_v1 }
 0x797   : > { %v4003_v8 = vpop.f32.mrb[176].mxu1  ;;  %4248 = vmatprep.subr.bf16.mxu0 %v4035_v13 }
 0x798   : > { %v4026_v26 = vmax.f32 %v3920_v38, %v4003_v8  ;;  %v4005_v5 = vpop.f32.mrb[177].mxu1  ;;  %4249 = vmatpush1.bf16.msra.mxu0 %v4034_v56  ;;  %v6089_v38 = vld [vmem:[%s8225_s9 + $0x30] sm:$0xff]  }
 0x799   : > { %v4027_v2 = vmax.f32 %v3921_v14, %v4005_v5  ;;  %v4007_v31 = vpop.f32.mrb[178].mxu1  ;;  %v6094_v14 = vld [vmem:[%s8227_s11 + $0x4] ss:$8 sps:$4 sm:$0xff]  }
 0x79a   : > { %v4028_v50 = vmax.f32 %v3922_v10, %v4007_v31  ;;  %v4009_v36 = vpop.f32.mrb[179].mxu1  ;;  %5728 = vmatprep.mubr.msk.bf16.mxu1 %vm4476_vm13, %v6094_v14  ;;  %v4099_v31 = vpop.permute.xlu0 %4098 }
 0x79b   : > { %v4029_v7 = vmax.f32 %v3923_v43, %v4009_v36  ;;  %v4084_v43 = vpop.permute.xlu1 %4083 }
 0x79c   : > { %v4036_v33 = vpack.c.bf16 %v4028_v50, %v4026_v26 }
 0x79d   : > { %v4037_v3 = vpack.c.bf16 %v4029_v7, %v4027_v2 }
 0x79f   : > { %v4013_v12 = vpop.f32.mrb[180].mxu1  ;;  %4250 = vmatprep.subr.bf16.mxu0 %v4037_v3  ;;  %v4094_v1 = vpop.permute.xlu1 %4093 }
 0x7a0   : > { %v4030_v20 = vmax.f32 %v3924_v16, %v4013_v12  ;;  %v4015_v63 = vpop.f32.mrb[181].mxu1  ;;  %4251 = vmatpush1.bf16.msra.mxu0 %v4036_v33 }
 0x7a1   : > { %v4031_v57 = vmax.f32 %v3925_v27, %v4015_v63  ;;  %v4017_v32 = vpop.f32.mrb[182].mxu1 }
 0x7a2   : > { %v4032_v55 = vmax.f32 %v3926_v62, %v4017_v32  ;;  %v4019_v22 = vpop.f32.mrb[183].mxu1 }
 0x7a3   : > { %v4033_v25 = vmax.f32 %v3927_v34, %v4019_v22  ;;  %v4104_v3 = vpop.permute.xlu1 %4103 }
 0x7a4   : > { %v4038_v49 = vpack.c.bf16 %v4032_v55, %v4030_v20 }
 0x7a5   : > { %v4039_v21 = vpack.c.bf16 %v4033_v25, %v4031_v57 }
 0x7a6   : > { %v4243_v11 = vand.u32 %v4241_v48, %v4038_v49  ;;  %v4109_v49 = vpop.permute.xlu0 %4108 }
 0x7a7   : > { %v4246_v15 = vand.u32 %v4241_v48, %v4039_v21 }
 0x7a9   : > { %4252 = vmatprep.subr.bf16.mxu0 %v4246_v15 }
 0x7aa   : > { %4253 = vmatpush1.bf16.msra.mxu0 %v4243_v11 }
 0x7ad   : > { %5709 = vmatmul.mubr.msk.bf16.vlgmr.msra.gmra.mrb[204].mxu0 %vm4211_vm12, %v6083_v18  ;;  %v4114_v18 = vpop.permute.xlu1 %4113 }
 0x7ae   : > { %4290 = vmatprep.mubr.bf16.mxu0 %v8280_v58 }
 0x7b5   : > { %5710 = vmatmul.mubr.msk.bf16.gmra.mrb[208].mxu0 %vm4211_vm12, %v6084_v47 }
 0x7b6   : > { %4300 = vmatprep.mubr.bf16.mxu0 %v8280_v58 }
 0x7bd   : > { %5711 = vmatmul.mubr.msk.bf16.gmra.mrb[212].mxu0 %vm4211_vm12, %v6085_v35 }
 0x7be   : > { %4310 = vmatprep.mubr.bf16.mxu0 %v8280_v58 }
 0x7c5   : > { %5712 = vmatmul.mubr.msk.bf16.gmra.mrb[216].mxu0 %vm4211_vm12, %v6086_v9 }
 0x7c6   : > { %4320 = vmatprep.mubr.bf16.mxu0 %v8280_v58 }
 0x7cd   : > { %5713 = vmatmul.mubr.msk.bf16.gmra.mrb[220].mxu0 %vm4211_vm12, %v6087_v54 }
 0x7ce   : > { %4330 = vmatprep.mubr.bf16.mxu0 %v8280_v58 }
 0x7d5   : > { %5714 = vmatmul.mubr.msk.bf16.gmra.mrb[224].mxu0 %vm4211_vm12, %v6088_v52 }
 0x7d6   : > { %4340 = vmatprep.mubr.bf16.mxu0 %v8280_v58 }
 0x7dd   : > { %5715 = vmatmul.mubr.msk.bf16.gmra.mrb[228].mxu0 %vm4211_vm12, %v6089_v38 }
 0x7de   : > { %4350 = vmatprep.mubr.bf16.mxu0 %v8280_v58 }
 0x7e5   : > { %5716 = vmatmul.mubr.msk.bf16.gmra.mrb[232].mxu0 %vm4211_vm12, %v6090_v30 }
 0x7e6   : > { %4360 = vmatprep.mubr.bf16.mxu0 %v8280_v58 }
 0x7ed   : > { %5717 = vmatmul.mubr.msk.bf16.gmra.mrb[236].mxu0 %vm4211_vm12, %v6091_v39 }
 0x7ee   : > { %5776 = vmatprep.mubr.msk.bf16.mxu0 %vm4476_vm13, %v6108_v23 }
 0x880   : > { %v4282_v10 = vpop.f32.mrb[204].mxu0 }
 0x881   : > { %v4283_v53 = vadd.f32 %v4282_v10, %v4079_v46  ;;  %v4284_v42 = vpop.f32.mrb[205].mxu0 }
 0x882   : > { %v4285_v28 = vadd.f32 %v4284_v42, %v4079_v46  ;;  %v4286_v19 = vpop.f32.mrb[206].mxu0  ;;  %v4119_v46 = vpop.permute.xlu0 %4118 }
 0x883   : > { %v4287_v16 = vadd.f32 %v4286_v19, %v4084_v43  ;;  %v4288_v44 = vpop.f32.mrb[207].mxu0  ;;  %v4371_v27 = vmax.f32 %v4283_v53, 0.0 }
 0x884   : > { %v4289_v45 = vadd.f32 %v4288_v44, %v4084_v43  ;;  %v4372_v37 = vmax.f32 %v4285_v28, 0.0  ;;  %v4124_v28 = vpop.permute.xlu1 %4123 }
 0x885   : > { %v4373_v59 = vmax.f32 %v4287_v16, 0.0 }
 0x886   : > { %v4374_v62 = vmax.f32 %v4289_v45, 0.0 }
 0x887   : > { %v7906_v61 = vpack.c.bf16 %v4373_v59, %v4371_v27 }
 0x888   : > { %v7908_v34 = vpack.c.bf16 %v4374_v62, %v4372_v37  ;;  %v4292_v6 = vpop.f32.mrb[208].mxu0 }
 0x889   : > { %v4293_v29 = vadd.f32 %v4292_v6, %v4089_v0  ;;  %v4294_v17 = vpop.f32.mrb[209].mxu0 }
 0x88a   : > { %v4295_v40 = vadd.f32 %v4294_v17, %v4089_v0  ;;  %v4296_v4 = vpop.f32.mrb[210].mxu0  ;;  %4492 = vmatprep.subr.bf16.mxu1 %v7908_v34  ;;  %4806 = vmatprep.subr.bf16.mxu0 %v7908_v34 }
 0x88b   : > { %v4297_v51 = vadd.f32 %v4296_v4, %v4094_v1  ;;  %v4298_v60 = vpop.f32.mrb[211].mxu0  ;;  %4493 = vmatpush1.bf16.msra.mxu1 %v7906_v61  ;;  %4807 = vmatpush1.bf16.msra.mxu0 %v7906_v61  ;;  %v4375_v13 = vmax.f32 %v4293_v29, 0.0  ;;  %v4129_v29 = vpop.permute.xlu0 %4128 }
 0x88c   : > { %v4299_v56 = vadd.f32 %v4298_v60, %v4094_v1  ;;  %v4376_v26 = vmax.f32 %v4295_v40, 0.0 }
 0x88d   : > { %v4377_v8 = vmax.f32 %v4297_v51, 0.0  ;;  %v4134_v51 = vpop.permute.xlu1 %4133 }
 0x88e   : > { %v4378_v5 = vmax.f32 %v4299_v56, 0.0 }
 0x88f   : > { %v7914_v2 = vpack.c.bf16 %v4377_v8, %v4375_v13 }
 0x890   : > { %v7916_v50 = vpack.c.bf16 %v4378_v5, %v4376_v26  ;;  %v4302_v36 = vpop.f32.mrb[212].mxu0 }
 0x891   : > { %v4303_v7 = vadd.f32 %v4302_v36, %v4099_v31  ;;  %v4304_v33 = vpop.f32.mrb[213].mxu0 }
 0x892   : > { %v4305_v12 = vadd.f32 %v4304_v33, %v4099_v31  ;;  %v4306_v20 = vpop.f32.mrb[214].mxu0  ;;  %4494 = vmatprep.subr.bf16.mxu1 %v7916_v50  ;;  %4808 = vmatprep.subr.bf16.mxu0 %v7916_v50 }
 0x893   : > { %v4307_v63 = vadd.f32 %v4306_v20, %v4104_v3  ;;  %v4308_v57 = vpop.f32.mrb[215].mxu0  ;;  %4495 = vmatpush1.bf16.msra.mxu1 %v7914_v2  ;;  %4809 = vmatpush1.bf16.msra.mxu0 %v7914_v2  ;;  %v4379_v41 = vmax.f32 %v4303_v7, 0.0 }
 0x894   : > { %v4309_v32 = vadd.f32 %v4308_v57, %v4104_v3  ;;  %v4380_v55 = vmax.f32 %v4305_v12, 0.0  ;;  %v4139_v3 = vpop.permute.xlu0 %4138 }
 0x895   : > { %v4381_v24 = vmax.f32 %v4307_v63, 0.0 }
 0x896   : > { %v4382_v22 = vmax.f32 %v4309_v32, 0.0  ;;  %v4144_v32 = vpop.permute.xlu1 %4143 }
 0x897   : > { %v7922_v25 = vpack.c.bf16 %v4381_v24, %v4379_v41 }
 0x898   : > { %v7924_v48 = vpack.c.bf16 %v4382_v22, %v4380_v55  ;;  %v4312_v21 = vpop.f32.mrb[216].mxu0 }
 0x899   : > { %v4313_v15 = vadd.f32 %v4312_v21, %v4109_v49  ;;  %v4314_v11 = vpop.f32.mrb[217].mxu0 }
 0x89a   : > { %v4315_v47 = vadd.f32 %v4314_v11, %v4109_v49  ;;  %v4316_v35 = vpop.f32.mrb[218].mxu0  ;;  %4496 = vmatprep.subr.bf16.mxu1 %v7924_v48  ;;  %4810 = vmatprep.subr.bf16.mxu0 %v7924_v48 }
 0x89b   : > { %v4317_v9 = vadd.f32 %v4316_v35, %v4114_v18  ;;  %v4318_v54 = vpop.f32.mrb[219].mxu0  ;;  %4497 = vmatpush1.bf16.msra.mxu1 %v7922_v25  ;;  %4811 = vmatpush1.bf16.msra.mxu0 %v7922_v25  ;;  %v4383_v38 = vmax.f32 %v4313_v15, 0.0  ;;  %v4149_v35 = vpop.permute.xlu0 %4148 }
 0x89c   : > { %v4319_v52 = vadd.f32 %v4318_v54, %v4114_v18  ;;  %v4384_v39 = vmax.f32 %v4315_v47, 0.0 }
 0x89d   : > { %v4385_v30 = vmax.f32 %v4317_v9, 0.0 }
 0x89e   : > { %v4386_v14 = vmax.f32 %v4319_v52, 0.0 }
 0x89f   : > { %v7930_v23 = vpack.c.bf16 %v4385_v30, %v4383_v38  ;;  %v4154_v30 = vpop.permute.xlu1 %4153 }
 0x8a0   : > { %v7932_v10 = vpack.c.bf16 %v4386_v14, %v4384_v39  ;;  %v4322_v53 = vpop.f32.mrb[220].mxu0 }
 0x8a1   : > { %v4323_v42 = vadd.f32 %v4322_v53, %v4119_v46  ;;  %v4324_v43 = vpop.f32.mrb[221].mxu0 }
 0x8a2   : > { %v4325_v19 = vadd.f32 %v4324_v43, %v4119_v46  ;;  %v4326_v16 = vpop.f32.mrb[222].mxu0  ;;  %4498 = vmatprep.subr.bf16.mxu1 %v7932_v10  ;;  %4812 = vmatprep.subr.bf16.mxu0 %v7932_v10 }
 0x8a3   : > { %v4327_v44 = vadd.f32 %v4326_v16, %v4124_v28  ;;  %v4328_v45 = vpop.f32.mrb[223].mxu0  ;;  %4499 = vmatpush1.bf16.msra.mxu1 %v7930_v23  ;;  %4813 = vmatpush1.bf16.msra.mxu0 %v7930_v23  ;;  %v4387_v59 = vmax.f32 %v4323_v42, 0.0 }
 0x8a4   : > { %v4329_v27 = vadd.f32 %v4328_v45, %v4124_v28  ;;  %v4388_v62 = vmax.f32 %v4325_v19, 0.0  ;;  %v4159_v45 = vpop.permute.xlu0 %4158 }
 0x8a5   : > { %v4389_v37 = vmax.f32 %v4327_v44, 0.0 }
 0x8a6   : > { %v4390_v0 = vmax.f32 %v4329_v27, 0.0 }
 0x8a7   : > { %v7938_v6 = vpack.c.bf16 %v4389_v37, %v4387_v59 }
 0x8a8   : > { %v7940_v17 = vpack.c.bf16 %v4390_v0, %v4388_v62  ;;  %v4332_v1 = vpop.f32.mrb[224].mxu0  ;;  %v4164_v0 = vpop.permute.xlu1 %4163 }
 0x8a9   : > { %v4333_v40 = vadd.f32 %v4332_v1, %v4129_v29  ;;  %v4334_v4 = vpop.f32.mrb[225].mxu0 }
 0x8aa   : > { %v4335_v60 = vadd.f32 %v4334_v4, %v4129_v29  ;;  %v4336_v56 = vpop.f32.mrb[226].mxu0  ;;  %4500 = vmatprep.subr.bf16.mxu1 %v7940_v17  ;;  %4814 = vmatprep.subr.bf16.mxu0 %v7940_v17 }
 0x8ab   : > { %v4337_v13 = vadd.f32 %v4336_v56, %v4134_v51  ;;  %v4338_v8 = vpop.f32.mrb[227].mxu0  ;;  %4501 = vmatpush1.bf16.msra.mxu1 %v7938_v6  ;;  %4815 = vmatpush1.bf16.msra.mxu0 %v7938_v6  ;;  %v4391_v5 = vmax.f32 %v4333_v40, 0.0 }
 0x8ac   : > { %v4339_v26 = vadd.f32 %v4338_v8, %v4134_v51  ;;  %v4392_v36 = vmax.f32 %v4335_v60, 0.0 }
 0x8ad   : > { %v4393_v31 = vmax.f32 %v4337_v13, 0.0 }
 0x8ae   : > { %v4394_v7 = vmax.f32 %v4339_v26, 0.0 }
 0x8af   : > { %v7946_v33 = vpack.c.bf16 %v4393_v31, %v4391_v5  ;;  %v6092_v31 = vld [vmem:[%s8227_s11] ss:$8 sps:$4 sm:$0xff]  }
 0x8b0   : > { %v7948_v12 = vpack.c.bf16 %v4394_v7, %v4392_v36  ;;  %v4342_v20 = vpop.f32.mrb[228].mxu0  ;;  %v6106_v36 = vld [vmem:[%s8227_s11 + $0x90] ss:$8 sps:$4 sm:$0xff]   ;;  %v6095_v7 = vld [vmem:[%s8227_s11 + $0x14] ss:$8 sps:$4 sm:$0xff]  }
 0x8b1   : > { %v4343_v63 = vadd.f32 %v4342_v20, %v4139_v3  ;;  %v4344_v57 = vpop.f32.mrb[229].mxu0  ;;  %v6097_v20 = vld [vmem:[%s8227_s11 + $0x10] ss:$8 sps:$4 sm:$0xff]  }
 0x8b2   : > { %v4345_v41 = vadd.f32 %v4344_v57, %v4139_v3  ;;  %v4346_v24 = vpop.f32.mrb[230].mxu0  ;;  %4502 = vmatprep.subr.bf16.mxu1 %v7948_v12  ;;  %4816 = vmatprep.subr.bf16.mxu0 %v7948_v12  ;;  %v6112_v3 = vld [vmem:[%s8227_s11 + $0xa4] ss:$8 sps:$4 sm:$0xff]  }
 0x8b3   : > { %v4347_v55 = vadd.f32 %v4346_v24, %v4144_v32  ;;  %v4348_v22 = vpop.f32.mrb[231].mxu0  ;;  %4503 = vmatpush1.bf16.msra.mxu1 %v7946_v33  ;;  %4817 = vmatpush1.bf16.msra.mxu0 %v7946_v33  ;;  %v4395_v21 = vmax.f32 %v4343_v63, 0.0  ;;  %v6103_v63 = vld [vmem:[%s8227_s11 + $0x30] ss:$8 sps:$4 sm:$0xff]  }
 0x8b4   : > { %v4349_v49 = vadd.f32 %v4348_v22, %v4144_v32  ;;  %v4396_v11 = vmax.f32 %v4345_v41, 0.0  ;;  %v6109_v24 = vld [vmem:[%s8227_s11 + $0x48] ss:$8 sps:$4 sm:$0xff]   ;;  %v6117_v22 = vld [vmem:[%s8227_s11 + $0x58] ss:$8 sps:$4 sm:$0xff]  }
 0x8b5   : > { %v4397_v15 = vmax.f32 %v4347_v55, 0.0  ;;  %v6114_v55 = vld [vmem:[%s8227_s11 + $0x5c] ss:$8 sps:$4 sm:$0xff]  }
 0x8b6   : > { %v4398_v18 = vmax.f32 %v4349_v49, 0.0  ;;  %v6120_v49 = vld [vmem:[%s8227_s11 + $0x6c] ss:$8 sps:$4 sm:$0xff]  }
 0x8b7   : > { %v7954_v47 = vpack.c.bf16 %v4397_v15, %v4395_v21  ;;  %v6123_v21 = vld [vmem:[%s8227_s11 + $0x68] ss:$8 sps:$4 sm:$0xff]   ;;  %v6126_v15 = vld [vmem:[%s8227_s11 + $0x7c] ss:$8 sps:$4 sm:$0xff]  }
 0x8b8   : > { %v7956_v9 = vpack.c.bf16 %v4398_v18, %v4396_v11  ;;  %v4352_v54 = vpop.f32.mrb[232].mxu0  ;;  %v5741_v11 = vld [vmem:[%s8227_s11 + $0x88] sm:$0xff]  ;;  %v6129_v18 = vld [vmem:[%s8227_s11 + $0x78] ss:$8 sps:$4 sm:$0xff]  }
 0x8b9   : > { %v4353_v52 = vadd.f32 %v4352_v54, %v4149_v35  ;;  %v4354_v38 = vpop.f32.mrb[233].mxu0 }
 0x8ba   : > { %v4355_v39 = vadd.f32 %v4354_v38, %v4149_v35  ;;  %v4356_v14 = vpop.f32.mrb[234].mxu0  ;;  %4504 = vmatprep.subr.bf16.mxu1 %v7956_v9  ;;  %4818 = vmatprep.subr.bf16.mxu0 %v7956_v9  ;;  %v5750_v35 = vcombine.low %v5741_v11, %v5741_v11 }
 0x8bb   : > { %v4357_v46 = vadd.f32 %v4356_v14, %v4154_v30  ;;  %v4358_v53 = vpop.f32.mrb[235].mxu0  ;;  %4505 = vmatpush1.bf16.msra.mxu1 %v7954_v47  ;;  %4819 = vmatpush1.bf16.msra.mxu0 %v7954_v47  ;;  %v4399_v43 = vmax.f32 %v4353_v52, 0.0 }
 0x8bc   : > { %v4359_v42 = vadd.f32 %v4358_v53, %v4154_v30  ;;  %v4400_v19 = vmax.f32 %v4355_v39, 0.0 }
 0x8bd   : > { %v4401_v28 = vmax.f32 %v4357_v46, 0.0 }
 0x8be   : > { %v4402_v16 = vmax.f32 %v4359_v42, 0.0 }
 0x8bf   : > { %v7962_v44 = vpack.c.bf16 %v4401_v28, %v4399_v43 }
 0x8c0   : > { %v7964_v27 = vpack.c.bf16 %v4402_v16, %v4400_v19  ;;  %v4362_v59 = vpop.f32.mrb[236].mxu0 }
 0x8c1   : > { %v4363_v37 = vadd.f32 %v4362_v59, %v4159_v45  ;;  %v4364_v62 = vpop.f32.mrb[237].mxu0 }
 0x8c2   : > { %v4365_v29 = vadd.f32 %v4364_v62, %v4159_v45  ;;  %v4366_v1 = vpop.f32.mrb[238].mxu0  ;;  %4506 = vmatprep.subr.bf16.mxu1 %v7964_v27  ;;  %4820 = vmatprep.subr.bf16.mxu0 %v7964_v27 }
 0x8c3   : > { %v4367_v40 = vadd.f32 %v4366_v1, %v4164_v0  ;;  %v4368_v4 = vpop.f32.mrb[239].mxu0  ;;  %4507 = vmatpush1.bf16.msra.mxu1 %v7962_v44  ;;  %4821 = vmatpush1.bf16.msra.mxu0 %v7962_v44  ;;  %v4403_v60 = vmax.f32 %v4363_v37, 0.0 }
 0x8c4   : > { %v4369_v51 = vadd.f32 %v4368_v4, %v4164_v0  ;;  %v4404_v13 = vmax.f32 %v4365_v29, 0.0 }
 0x8c5   : > { %v4405_v56 = vmax.f32 %v4367_v40, 0.0 }
 0x8c6   : > { %v4406_v8 = vmax.f32 %v4369_v51, 0.0 }
 0x8c7   : > { %v4423_v26 = vpack.c.bf16 %v4405_v56, %v4403_v60 }
 0x8c8   : > { %v4424_v5 = vpack.c.bf16 %v4406_v8, %v4404_v13 }
 0x8ca   : > { %4508 = vmatprep.subr.bf16.mxu1 %v4424_v5  ;;  %4822 = vmatprep.subr.bf16.mxu0 %v4424_v5 }
 0x8cb   : > { %4509 = vmatpush1.bf16.msra.mxu1 %v4423_v26  ;;  %4823 = vmatpush1.bf16.msra.mxu0 %v4423_v26 }
 0x8cc   : > { %4640 = vmatprep.subr.bf16.mxu1 %v7908_v34  ;;  %v6116_v34 = vld [vmem:[%s8227_s11 + $0xa0] ss:$8 sps:$4 sm:$0xff]  }
 0x8ce   : > { %4525 = vmatmul.mubr.bf16.vlgmr.msra.gmra.mrb[184].mxu1 %v6092_v31  ;;  %4839 = vmatmul.mubr.bf16.vlgmr.msra.gmra.mrb[240].mxu0 %v6106_v36 }
 0x8cf   : > { %4641 = vmatpush1.bf16.msra.mxu1 %v7906_v61  ;;  %5729 = vmatprep.mubr.msk.bf16.mxu1 %vm4476_vm13, %v6095_v7  ;;  %v6098_v61 = vld [vmem:[%s8227_s11 + $0x24] ss:$8 sps:$4 sm:$0xff]  }
 0x8d0   : > { %4642 = vmatprep.subr.bf16.mxu1 %v7916_v50  ;;  %5777 = vmatprep.mubr.msk.bf16.mxu0 %vm4476_vm13, %v6112_v3  ;;  %v6118_v50 = vld [vmem:[%s8227_s11 + $0xb4] ss:$8 sps:$4 sm:$0xff]  }
 0x8d3   : > { %4643 = vmatpush1.bf16.msra.mxu1 %v7914_v2  ;;  %v6100_v2 = vld [vmem:[%s8227_s11 + $0x20] ss:$8 sps:$4 sm:$0xff]  }
 0x8d4   : > { %4644 = vmatprep.subr.bf16.mxu1 %v7924_v48  ;;  %v6122_v48 = vld [vmem:[%s8227_s11 + $0xb0] ss:$8 sps:$4 sm:$0xff]  }
 0x8d6   : > { %4535 = vmatmul.mubr.bf16.gmra.mrb[188].mxu1 %v6097_v20  ;;  %4849 = vmatmul.mubr.bf16.gmra.mrb[244].mxu0 %v6116_v34 }
 0x8d7   : > { %4645 = vmatpush1.bf16.msra.mxu1 %v7922_v25  ;;  %5730 = vmatprep.mubr.msk.bf16.mxu1 %vm4476_vm13, %v6098_v61  ;;  %v6101_v25 = vld [vmem:[%s8227_s11 + $0x34] ss:$8 sps:$4 sm:$0xff]  }
 0x8d8   : > { %4646 = vmatprep.subr.bf16.mxu1 %v7932_v10  ;;  %5778 = vmatprep.mubr.msk.bf16.mxu0 %vm4476_vm13, %v6118_v50  ;;  %v6124_v10 = vld [vmem:[%s8227_s11 + $0xc4] ss:$8 sps:$4 sm:$0xff]  }
 0x8db   : > { %4647 = vmatpush1.bf16.msra.mxu1 %v7930_v23  ;;  %v4433_v23 = vld [vmem:[%s8227_s11 + $0x40] sm:$0xff] }
 0x8dc   : > { %4648 = vmatprep.subr.bf16.mxu1 %v7940_v17  ;;  %v5765_v17 = vld [vmem:[%s8227_s11 + $0xd0] sm:$0xff]  ;;  %v5726_v32 = vcombine.low %v4433_v23, %v4433_v23 }
 0x8dd   : > { %v5775_v57 = vcombine.high %v5765_v17, %v5765_v17  ;;  %v5774_v41 = vcombine.low %v5765_v17, %v5765_v17 }
 0x8de   : > { %4545 = vmatmul.mubr.bf16.gmra.mrb[192].mxu1 %v6100_v2  ;;  %4859 = vmatmul.mubr.bf16.gmra.mrb[248].mxu0 %v6122_v48 }
 0x8df   : > { %4649 = vmatpush1.bf16.msra.mxu1 %v7938_v6  ;;  %5731 = vmatprep.mubr.msk.bf16.mxu1 %vm4476_vm13, %v6101_v25  ;;  %v6128_v6 = vld [vmem:[%s8227_s11 + $0xc0] ss:$8 sps:$4 sm:$0xff]  }
 0x8e0   : > { %4650 = vmatprep.subr.bf16.mxu1 %v7948_v12  ;;  %5779 = vmatprep.mubr.msk.bf16.mxu0 %vm4476_vm13, %v6124_v10  ;;  %v5727_v12 = vcombine.high %v4433_v23, %v4433_v23 }
 0x8e3   : > { %4651 = vmatpush1.bf16.msra.mxu1 %v7946_v33  ;;  %v6111_v33 = vld [vmem:[%s8227_s11 + $0x4c] ss:$8 sps:$4 sm:$0xff]  }
 0x8e4   : > { %4652 = vmatprep.subr.bf16.mxu1 %v7956_v9 }
 0x8e6   : > { %4555 = vmatmul.mubr.bf16.gmra.mrb[196].mxu1 %v6103_v63  ;;  %4869 = vmatmul.mubr.bf16.gmra.mrb[252].mxu0 %v6128_v6 }
 0x8e7   : > { %4653 = vmatpush1.bf16.msra.mxu1 %v7954_v47  ;;  %5732 = vmatprep.mubr.msk.bf16.mxu1 %vm4476_vm13, %v5727_v12  ;;  %v5751_v47 = vcombine.high %v5741_v11, %v5741_v11 }
 0x8e8   : > { %4654 = vmatprep.subr.bf16.mxu1 %v7964_v27  ;;  %5780 = vmatprep.mubr.msk.bf16.mxu0 %vm4476_vm13, %v5775_v57 }
 0x8eb   : > { %4655 = vmatpush1.bf16.msra.mxu1 %v7962_v44 }
 0x8ec   : > { %4656 = vmatprep.subr.bf16.mxu1 %v4424_v5 }
 0x8ee   : > { %4565 = vmatmul.mubr.bf16.gmra.mrb[200].mxu1 %v5726_v32  ;;  %4879 = vmatmul.mubr.bf16.gmra.mrb[0].mxu0 %v5774_v41 }
 0x8ef   : > { %4657 = vmatpush1.bf16.msra.mxu1 %v4423_v26  ;;  %5752 = vmatprep.mubr.msk.bf16.mxu1 %vm4476_vm13, %v6111_v33 }
 0x8f0   : > { %5070 = vmatprep.mubr.bf16.mxu0 %v8280_v58 }
 0x8f6   : > { %4673 = vmatmul.mubr.bf16.vlgmr.msra.gmra.mrb[204].mxu1 %v6109_v24 }
 0x8f7   : > { %5753 = vmatprep.mubr.msk.bf16.mxu1 %vm4476_vm13, %v6114_v55 }
 0x8fe   : > { %4683 = vmatmul.mubr.bf16.gmra.mrb[208].mxu1 %v6117_v22 }
 0x8ff   : > { %5754 = vmatprep.mubr.msk.bf16.mxu1 %vm4476_vm13, %v6120_v49 }
 0x906   : > { %4693 = vmatmul.mubr.bf16.gmra.mrb[212].mxu1 %v6123_v21 }
 0x907   : > { %5755 = vmatprep.mubr.msk.bf16.mxu1 %vm4476_vm13, %v6126_v15 }
 0x90e   : > { %4703 = vmatmul.mubr.bf16.gmra.mrb[216].mxu1 %v6129_v18 }
 0x90f   : > { %5756 = vmatprep.mubr.msk.bf16.mxu1 %vm4476_vm13, %v5751_v47 }
 0x916   : > { %4713 = vmatmul.mubr.bf16.gmra.mrb[220].mxu1 %v5750_v35 }
 0x917   : > { %4981 = vmatprep.mubr.bf16.mxu1 %v8280_v58 }
 0x9a1   : > { %v4526_v9 = vpop.f32.mrb[184].mxu1  ;;  %v4840_v54 = vpop.f32.mrb[240].mxu0 }
 0x9a2   : > { %v4528_v52 = vpop.f32.mrb[185].mxu1  ;;  %v4842_v38 = vpop.f32.mrb[241].mxu0 }
 0x9a3   : > { %v4530_v30 = vpop.f32.mrb[186].mxu1  ;;  %v4844_v39 = vpop.f32.mrb[242].mxu0 }
 0x9a4   : > { %v4532_v14 = vpop.f32.mrb[187].mxu1  ;;  %v4846_v46 = vpop.f32.mrb[243].mxu0 }
 0x9a9   : > { %v4536_v53 = vpop.f32.mrb[188].mxu1  ;;  %v4850_v42 = vpop.f32.mrb[244].mxu0 }
 0x9aa   : > { %v4538_v43 = vpop.f32.mrb[189].mxu1  ;;  %v4852_v28 = vpop.f32.mrb[245].mxu0 }
 0x9ab   : > { %v4540_v19 = vpop.f32.mrb[190].mxu1  ;;  %v4854_v16 = vpop.f32.mrb[246].mxu0 }
 0x9ac   : > { %v4542_v44 = vpop.f32.mrb[191].mxu1  ;;  %v4856_v45 = vpop.f32.mrb[247].mxu0 }
 0x9b1   : > { %v8076_v27 = vpop.f32.mrb[192].mxu1  ;;  %v4860_v59 = vpop.f32.mrb[248].mxu0 }
 0x9b2   : > { %v8078_v37 = vpop.f32.mrb[193].mxu1  ;;  %v8080_v62 = vpop.f32.mrb[249].mxu0 }
 0x9b3   : > { %v8082_v0 = vpop.f32.mrb[194].mxu1  ;;  %v8084_v29 = vpop.f32.mrb[250].mxu0 }
 0x9b4   : > { %v8086_v1 = vpop.f32.mrb[195].mxu1  ;;  %v8088_v40 = vpop.f32.mrb[251].mxu0 }
 0x9b9   : > { %v8090_v4 = vpop.f32.mrb[196].mxu1  ;;  %v8092_v51 = vpop.f32.mrb[252].mxu0 }
 0x9ba   : > { %v8094_v60 = vpop.f32.mrb[197].mxu1  ;;  %v8096_v56 = vpop.f32.mrb[253].mxu0 }
 0x9bb   : > { %v8098_v13 = vpop.f32.mrb[198].mxu1  ;;  %v8100_v8 = vpop.f32.mrb[254].mxu0 }
 0x9bc   : > { %v8102_v26 = vpop.f32.mrb[199].mxu1  ;;  %v8104_v5 = vpop.f32.mrb[255].mxu0 }
 0x9c1   : > { %v8106_v31 = vpop.f32.mrb[200].mxu1  ;;  %v8108_v36 = vpop.f32.mrb[0].mxu0 }
 0x9c2   : > { %v8110_v7 = vpop.f32.mrb[201].mxu1  ;;  %v8112_v3 = vpop.f32.mrb[1].mxu0 }
 0x9c3   : > { %v4570_v20 = vpop.f32.mrb[202].mxu1  ;;  %v4884_v34 = vpop.f32.mrb[2].mxu0 }
 0x9c4   : > { %v4571_v61 = vpop.f32.mrb[203].mxu1  ;;  %v4885_v50 = vpop.f32.mrb[3].mxu0 }
 0x9c9   : > { %v4674_v2 = vpop.f32.mrb[204].mxu1 }
 0x9ca   : > { %v4721_v48 = vmax.f32 %v4526_v9, %v4674_v2  ;;  %v4676_v25 = vpop.f32.mrb[205].mxu1 }
 0x9cb   : > { %v4722_v10 = vmax.f32 %v4528_v52, %v4676_v25  ;;  %v4678_v23 = vpop.f32.mrb[206].mxu1 }
 0x9cc   : > { %v4887_v17 = vmax.f32 %v4721_v48, %v4840_v54  ;;  %v4723_v63 = vmax.f32 %v4530_v30, %v4678_v23  ;;  %v4680_v6 = vpop.f32.mrb[207].mxu1 }
 0x9cd   : > { %v4888_v12 = vmax.f32 %v4722_v10, %v4842_v38  ;;  %v4724_v57 = vmax.f32 %v4532_v14, %v4680_v6 }
 0x9ce   : > { %v4889_v32 = vmax.f32 %v4723_v63, %v4844_v39 }
 0x9cf   : > { %v4890_v41 = vmax.f32 %v4724_v57, %v4846_v46  ;;  %v6139_v57 = vld [vmem:[%s8228_s12 + $0x24] ss:$0 sps:$4 sm:$0x33]  }
 0x9d0   : > { %v8114_v33 = vpack.c.bf16 %v4889_v32, %v4887_v17  ;;  %v6140_v32 = vld [vmem:[%s8228_s12 + $0x28] sm:$0xff]  }
 0x9d1   : > { %v4684_v24 = vpop.f32.mrb[208].mxu1  ;;  %v8116_v55 = vpack.c.bf16 %v4890_v41, %v4888_v12  ;;  %v6138_v12 = vld [vmem:[%s8228_s12 + $0x10] ss:$0 sps:$4 sm:$0x33]  }
 0x9d2   : > { %v4725_v22 = vmax.f32 %v4536_v53, %v4684_v24  ;;  %v4686_v49 = vpop.f32.mrb[209].mxu1  ;;  %v6141_v41 = vld [vmem:[%s8228_s12 + $0x30] sm:$0xff]  }
 0x9d3   : > { %v4726_v21 = vmax.f32 %v4538_v43, %v4686_v49  ;;  %v4688_v15 = vpop.f32.mrb[210].mxu1  ;;  %4949 = vmatprep.subr.bf16.mxu1 %v8116_v55  ;;  %5038 = vmatprep.subr.bf16.mxu0 %v8116_v55 }
 0x9d4   : > { %v4891_v11 = vmax.f32 %v4725_v22, %v4850_v42  ;;  %v4727_v18 = vmax.f32 %v4540_v19, %v4688_v15  ;;  %v4690_v47 = vpop.f32.mrb[211].mxu1  ;;  %4950 = vmatpush1.bf16.msra.mxu1 %v8114_v33  ;;  %5039 = vmatpush1.bf16.msra.mxu0 %v8114_v33 }
 0x9d5   : > { %v4892_v35 = vmax.f32 %v4726_v21, %v4852_v28  ;;  %v4728_v9 = vmax.f32 %v4542_v44, %v4690_v47 }
 0x9d6   : > { %v4893_v54 = vmax.f32 %v4727_v18, %v4854_v16 }
 0x9d7   : > { %v4894_v52 = vmax.f32 %v4728_v9, %v4856_v45 }
 0x9d8   : > { %v8122_v38 = vpack.c.bf16 %v4893_v54, %v4891_v11 }
 0x9d9   : > { %v4694_v30 = vpop.f32.mrb[212].mxu1  ;;  %v4908_v39 = vpack.c.bf16 %v4894_v52, %v4892_v35 }
 0x9da   : > { %v4729_v14 = vmax.f32 %v8076_v27, %v4694_v30  ;;  %v4696_v46 = vpop.f32.mrb[213].mxu1 }
 0x9db   : > { %v4730_v53 = vmax.f32 %v8078_v37, %v4696_v46  ;;  %v4698_v42 = vpop.f32.mrb[214].mxu1  ;;  %4951 = vmatprep.subr.bf16.mxu1 %v4908_v39  ;;  %5040 = vmatprep.subr.bf16.mxu0 %v4908_v39 }
 0x9dc   : > { %v4895_v43 = vmax.f32 %v4729_v14, %v4860_v59  ;;  %v4731_v19 = vmax.f32 %v8082_v0, %v4698_v42  ;;  %v4700_v20 = vpop.f32.mrb[215].mxu1  ;;  %4952 = vmatpush1.bf16.msra.mxu1 %v8122_v38  ;;  %5041 = vmatpush1.bf16.msra.mxu0 %v8122_v38 }
 0x9dd   : > { %v4896_v28 = vmax.f32 %v4730_v53, %v8080_v62  ;;  %v4732_v16 = vmax.f32 %v8086_v1, %v4700_v20 }
 0x9de   : > { %v4897_v44 = vmax.f32 %v4731_v19, %v8084_v29 }
 0x9df   : > { %v4898_v45 = vmax.f32 %v4732_v16, %v8088_v40 }
 0x9e0   : > { %v4909_v27 = vpack.c.bf16 %v4897_v44, %v4895_v43 }
 0x9e1   : > { %v4704_v37 = vpop.f32.mrb[216].mxu1  ;;  %v4910_v34 = vpack.c.bf16 %v4898_v45, %v4896_v28 }
 0x9e2   : > { %v4733_v59 = vmax.f32 %v8090_v4, %v4704_v37  ;;  %v4706_v61 = vpop.f32.mrb[217].mxu1 }
 0x9e3   : > { %v4734_v0 = vmax.f32 %v8094_v60, %v4706_v61  ;;  %v4708_v50 = vpop.f32.mrb[218].mxu1  ;;  %4953 = vmatprep.subr.bf16.mxu1 %v4910_v34  ;;  %5042 = vmatprep.subr.bf16.mxu0 %v4910_v34 }
 0x9e4   : > { %v4899_v2 = vmax.f32 %v4733_v59, %v8092_v51  ;;  %v4735_v62 = vmax.f32 %v8098_v13, %v4708_v50  ;;  %v4710_v1 = vpop.f32.mrb[219].mxu1  ;;  %4954 = vmatpush1.bf16.msra.mxu1 %v4909_v27  ;;  %5043 = vmatpush1.bf16.msra.mxu0 %v4909_v27 }
 0x9e5   : > { %v4900_v29 = vmax.f32 %v4734_v0, %v8096_v56  ;;  %v4736_v40 = vmax.f32 %v8102_v26, %v4710_v1 }
 0x9e6   : > { %v4901_v48 = vmax.f32 %v4735_v62, %v8100_v8 }
 0x9e7   : > { %v4902_v4 = vmax.f32 %v4736_v40, %v8104_v5 }
 0x9e8   : > { %v4911_v25 = vpack.c.bf16 %v4901_v48, %v4899_v2 }
 0x9e9   : > { %v4714_v60 = vpop.f32.mrb[220].mxu1  ;;  %v4912_v10 = vpack.c.bf16 %v4902_v4, %v4900_v29 }
 0x9ea   : > { %v4737_v23 = vmax.f32 %v8106_v31, %v4714_v60  ;;  %v4716_v17 = vpop.f32.mrb[221].mxu1  ;;  %v6134_v31 = vld [vmem:[%s8228_s12] sm:$0xff]  }
 0x9eb   : > { %v4738_v51 = vmax.f32 %v8110_v7, %v4716_v17  ;;  %v4718_v13 = vpop.f32.mrb[222].mxu1  ;;  %4955 = vmatprep.subr.bf16.mxu1 %v4912_v10  ;;  %5044 = vmatprep.subr.bf16.mxu0 %v4912_v10  ;;  %v6136_v7 = vld [vmem:[%s8228_s12 + $0x8] sm:$0xff]  }
 0x9ec   : > { %v4903_v63 = vmax.f32 %v4737_v23, %v8108_v36  ;;  %v4719_v56 = vpop.f32.mrb[223].mxu1  ;;  %4956 = vmatpush1.bf16.msra.mxu1 %v4911_v25  ;;  %5045 = vmatpush1.bf16.msra.mxu0 %v4911_v25  ;;  %v6135_v36 = vld [vmem:[%s8228_s12 + $0x14] sm:$0xff]  }
 0x9ed   : > { %v4904_v8 = vmax.f32 %v4738_v51, %v8112_v3  ;;  %v6137_v3 = vld [vmem:[%s8228_s12 + $0x1c] sm:$0xff]  }
 0x9ee   : > { %v4913_v26 = vpack.c.bf16 %v4903_v63, %v4903_v63 }
 0x9ef   : > { %v4914_v5 = vpack.c.bf16 %v4904_v8, %v4904_v8 }
 0x9f0   : > { %v4944_v6 = vsel %vm2185_vm5, %v4913_v26, 0 }
 0x9f1   : > { %5784 = vmatprep.subr.msk.bf16.mxu1 %vm2185_vm5, %v4914_v5  ;;  %5796 = vmatprep.subr.msk.bf16.mxu0 %vm2185_vm5, %v4914_v5 }
 0x9f2   : > { %4958 = vmatpush1.bf16.msra.mxu1 %v4944_v6  ;;  %5047 = vmatpush1.bf16.msra.mxu0 %v4944_v6 }
 0x9f3   : > { %5137 = vmatprep.subr.bf16.mxu1 %v8116_v55 }
 0x9f5   : > { %5785 = vmatmul.mubr.msk.bf16.vlgmr.msra.gmra.mrb[224].mxu1 %vm4933_vm14, %v6134_v31  ;;  %5797 = vmatmul.mubr.msk.bf16.vlgmr.msra.gmra.mrb[4].mxu0 %vm4933_vm14, %v6135_v36 }
 0x9f6   : > { %5138 = vmatpush1.bf16.msra.mxu1 %v8114_v33  ;;  %4991 = vmatprep.mubr.bf16.mxu1 %v8280_v58  ;;  %v6142_v33 = vld [vmem:[%s8228_s12 + $0x38] ss:$0 sps:$4 sm:$0x33]  }
 0x9f7   : > { %5139 = vmatprep.subr.bf16.mxu1 %v4908_v39  ;;  %5080 = vmatprep.mubr.bf16.mxu0 %v8280_v58 }
 0x9fa   : > { %5140 = vmatpush1.bf16.msra.mxu1 %v8122_v38 }
 0x9fb   : > { %5141 = vmatprep.subr.bf16.mxu1 %v4910_v34 }
 0x9fd   : > { %5786 = vmatmul.mubr.msk.bf16.gmra.mrb[228].mxu1 %vm4933_vm14, %v6136_v7  ;;  %5798 = vmatmul.mubr.msk.bf16.gmra.mrb[8].mxu0 %vm4933_vm14, %v6137_v3 }
 0x9fe   : > { %5142 = vmatpush1.bf16.msra.mxu1 %v4909_v27  ;;  %5001 = vmatprep.mubr.bf16.mxu1 %v8280_v58 }
 0x9ff   : > { %5143 = vmatprep.subr.bf16.mxu1 %v4912_v10  ;;  %5090 = vmatprep.mubr.bf16.mxu0 %v8280_v58 }
 0xa02   : > { %5144 = vmatpush1.bf16.msra.mxu1 %v4911_v25 }
 0xa03   : > { %5808 = vmatprep.subr.msk.bf16.mxu1 %vm2185_vm5, %v4914_v5 }
 0xa05   : > { %5787 = vmatmul.mubr.msk.bf16.gmra.mrb[232].mxu1 %vm4933_vm14, %v6138_v12  ;;  %5799 = vmatmul.mubr.msk.bf16.gmra.mrb[12].mxu0 %vm4933_vm14, %v6139_v57 }
 0xa06   : > { %5146 = vmatpush1.bf16.msra.mxu1 %v4944_v6  ;;  %5169 = vmatprep.mubr.bf16.mxu1 %v8280_v58 }
 0xa07   : > { %5263 = vmatprep.mubr.bf16.mxu0 %v8280_v58 }
 0xa0d   : > { %5809 = vmatmul.mubr.msk.bf16.vlgmr.msra.gmra.mrb[236].mxu1 %vm4933_vm14, %v6140_v32 }
 0xa0e   : > { %5179 = vmatprep.mubr.bf16.mxu1 %v8280_v58 }
 0xa15   : > { %5810 = vmatmul.mubr.msk.bf16.gmra.mrb[240].mxu1 %vm4933_vm14, %v6141_v41 }
 0xa16   : > { %5189 = vmatprep.mubr.bf16.mxu1 %v8280_v58 }
 0xa1d   : > { %5811 = vmatmul.mubr.msk.bf16.gmra.mrb[244].mxu1 %vm4933_vm14, %v6142_v33  ;;  %v5208_v33 = vld [vmem:[%s8229_s13] sm:$0x3] }
 0xac8   : > { %v4983_v24 = vpop.f32.mrb[224].mxu1  ;;  %v5072_v55 = vpop.f32.mrb[4].mxu0 }
 0xac9   : > { %v5099_v22 = vmax.f32 %v4983_v24, %v5072_v55  ;;  %v4985_v49 = vpop.f32.mrb[225].mxu1  ;;  %v5074_v21 = vpop.f32.mrb[5].mxu0 }
 0xaca   : > { %v5100_v15 = vmax.f32 %v4985_v49, %v5074_v21  ;;  %v4987_v11 = vpop.f32.mrb[226].mxu1  ;;  %v5076_v18 = vpop.f32.mrb[6].mxu0 }
 0xacb   : > { %v5101_v47 = vmax.f32 %v4987_v11, %v5076_v18  ;;  %v4989_v35 = vpop.f32.mrb[227].mxu1  ;;  %v5078_v9 = vpop.f32.mrb[7].mxu0 }
 0xacc   : > { %v5102_v54 = vmax.f32 %v4989_v35, %v5078_v9  ;;  %v5219_v24 = vpop.permute.xlu0 %5218 }
 0xad0   : > { %v4993_v52 = vpop.f32.mrb[228].mxu1  ;;  %v5082_v58 = vpop.f32.mrb[8].mxu0 }
 0xad1   : > { %v5103_v38 = vmax.f32 %v4993_v52, %v5082_v58  ;;  %v4995_v30 = vpop.f32.mrb[229].mxu1  ;;  %v5084_v39 = vpop.f32.mrb[9].mxu0 }
 0xad2   : > { %v5104_v14 = vmax.f32 %v4995_v30, %v5084_v39  ;;  %v4997_v46 = vpop.f32.mrb[230].mxu1  ;;  %v5086_v53 = vpop.f32.mrb[10].mxu0 }
 0xad3   : > { %v5105_v42 = vmax.f32 %v4997_v46, %v5086_v53  ;;  %v4999_v43 = vpop.f32.mrb[231].mxu1  ;;  %v5088_v19 = vpop.f32.mrb[11].mxu0 }
 0xad4   : > { %v5106_v20 = vmax.f32 %v4999_v43, %v5088_v19 }
 0xad8   : > { %v5003_v28 = vpop.f32.mrb[232].mxu1  ;;  %v5092_v16 = vpop.f32.mrb[12].mxu0 }
 0xad9   : > { %v5107_v44 = vmax.f32 %v5003_v28, %v5092_v16  ;;  %v5005_v45 = vpop.f32.mrb[233].mxu1  ;;  %v5094_v27 = vpop.f32.mrb[13].mxu0 }
 0xada   : > { %v5108_v37 = vmax.f32 %v5005_v45, %v5094_v27  ;;  %v5007_v34 = vpop.f32.mrb[234].mxu1  ;;  %v5096_v59 = vpop.f32.mrb[14].mxu0 }
 0xadb   : > { %v5008_v61 = vpop.f32.mrb[235].mxu1  ;;  %v5097_v0 = vpop.f32.mrb[15].mxu0 }
 0xae0   : > { %v5171_v50 = vpop.f32.mrb[236].mxu1 }
 0xae1   : > { %v5198_v2 = vmax.f32 %v5099_v22, %v5171_v50  ;;  %v5173_v62 = vpop.f32.mrb[237].mxu1 }
 0xae2   : > { %v5199_v1 = vmax.f32 %v5100_v15, %v5173_v62  ;;  %v5175_v29 = vpop.f32.mrb[238].mxu1 }
 0xae3   : > { %v5200_v40 = vmax.f32 %v5101_v47, %v5175_v29  ;;  %v5177_v48 = vpop.f32.mrb[239].mxu1 }
 0xae4   : > { %v5201_v4 = vmax.f32 %v5102_v54, %v5177_v48 }
 0xae5   : > { %v5209_v25 = vpack.c.bf16 %v5200_v40, %v5198_v2 }
 0xae6   : > { %v5210_v60 = vpack.c.bf16 %v5201_v4, %v5199_v1 }
 0xae8   : > { %v5181_v10 = vpop.f32.mrb[240].mxu1  ;;  %5231 = vmatprep.subr.bf16.mxu0 %v5210_v60 }
 0xae9   : > { %v5202_v23 = vmax.f32 %v5103_v38, %v5181_v10  ;;  %v5183_v17 = vpop.f32.mrb[241].mxu1  ;;  %5232 = vmatpush1.bf16.msra.mxu0 %v5209_v25 }
 0xaea   : > { %v5203_v51 = vmax.f32 %v5104_v14, %v5183_v17  ;;  %v5185_v13 = vpop.f32.mrb[242].mxu1 }
 0xaeb   : > { %v5204_v63 = vmax.f32 %v5105_v42, %v5185_v13  ;;  %v5187_v56 = vpop.f32.mrb[243].mxu1 }
 0xaec   : > { %v5205_v8 = vmax.f32 %v5106_v20, %v5187_v56 }
 0xaed   : > { %v5211_v26 = vpack.c.bf16 %v5204_v63, %v5202_v23 }
 0xaee   : > { %v5212_v5 = vpack.c.bf16 %v5205_v8, %v5203_v51 }
 0xaf0   : > { %v5191_v6 = vpop.f32.mrb[244].mxu1  ;;  %5233 = vmatprep.subr.bf16.mxu0 %v5212_v5 }
 0xaf1   : > { %v5206_v31 = vmax.f32 %v5107_v44, %v5191_v6  ;;  %v5193_v36 = vpop.f32.mrb[245].mxu1  ;;  %5234 = vmatpush1.bf16.msra.mxu0 %v5211_v26 }
 0xaf2   : > { %v5207_v7 = vmax.f32 %v5108_v37, %v5193_v36  ;;  %v5195_v3 = vpop.f32.mrb[246].mxu1 }
 0xaf3   : > { %v5213_v12 = vpack.c.bf16 %v5206_v31, %v5206_v31  ;;  %v5196_v57 = vpop.f32.mrb[247].mxu1 }
 0xaf4   : > { %v5214_v32 = vpack.c.bf16 %v5207_v7, %v5207_v7 }
 0xaf5   : > { %v5226_v41 = vsel %vm1409_vm2, %v5213_v12, 0 }
 0xaf6   : > { %5812 = vmatprep.subr.msk.bf16.mxu0 %vm1409_vm2, %v5214_v32 }
 0xaf7   : > { %5236 = vmatpush1.bf16.msra.mxu0 %v5226_v41 }
 0xafa   : > { %5813 = vmatmul.mubr.msk.bf16.vlgmr.msra.gmra.mrb[16].mxu0 %vm5221_vm15, %v5208_v33 }
 0xbcd   : > { %v5265_v55 = vpop.f32.mrb[16].mxu0 }
 0xbce   : > { %v5266_v22 = vadd.f32 %v5265_v55, %v5219_v24  ;;  %v5267_v49 = vpop.f32.mrb[17].mxu0 }
 0xbcf   : > { %v5268_v21 = vadd.f32 %v5267_v49, %v5219_v24  ;;  %v5269_v15 = vpop.f32.mrb[18].mxu0 }
 0xbd0   : > { %v5270_v11 = vpop.f32.mrb[19].mxu0 }
 0xbd1   : > { %v5274_v18 = vcombine.low %v5266_v22, %v5268_v21 }
 0xbd3   : > { %5276 = vst [vmem:[%s590_s29] sm:$0xff] %v5274_v18 }
 0xbd4 PF: > { %p22_p9 = scmp.ge.s32.totalorder %s6266_s22, 4   ;;  %s8282_s18 = smov %s6161_s19 }
 0xbd5   : > { %s8283_s19 = smov %s6275_s25  ;;  %s8284_s20 = smov %s6266_s22 }
 0xbd6   :  { %24 = sbr.rel (!%p22_p9) target bundleno = 2 (0x2), region = 165 }

</bundles_post_ra>
